<compile_context>
chip_gen: v7x
topology: tpu7x:2x2x1
jax: 0.10.0
libtpu: 0.0.40
codegen_flags: <defaults>
</compile_context>

<pallas_src>
import math
import functools

import jax
import jax.numpy as jnp
from jax.experimental import pallas as pl

_LANE = 128


# --------------------------------------------------------------------------- init-time helpers

def _round_up(n, m):
    return ((n + m - 1) // m) * m


def sinusoidal_pe(max_len, d_model):
    pos = jnp.arange(max_len, dtype=jnp.float32)[:, None]
    i = jnp.arange(d_model, dtype=jnp.float32)[None, :]
    angle = pos / jnp.power(10000.0, (2.0 * jnp.floor(i / 2.0)) / d_model)
    return jnp.where(jnp.mod(jnp.arange(d_model), 2) == 0,
                     jnp.sin(angle), jnp.cos(angle))           # (max_len, d_model)


def _init_linear(key, din, dout):
    w = jax.random.normal(key, (din, dout), dtype=jnp.float32) / math.sqrt(din)
    b = jnp.zeros((1, dout), jnp.float32)
    return w, b


def _init_ln(d):
    return jnp.ones((1, d), jnp.float32), jnp.zeros((1, d), jnp.float32)


def init_params(key, cfg):
    d, dff = cfg["d_model"], cfg["d_ff"]
    ks = iter(jax.random.split(key, 64))
    p = {}
    p["enc_embed_w"], p["enc_embed_b"] = _init_linear(next(ks), cfg["enc_feature_len"], d)
    p["dec_embed_w"], p["dec_embed_b"] = _init_linear(next(ks), cfg["dec_feature_len"], d)

    enc_layers = []
    for _ in range(cfg["enc_layer_num"]):
        lp = {}
        lp["w_qkv"], lp["b_qkv"] = _init_linear(next(ks), d, 3 * d)     # fused Q|K|V
        lp["w_o"], lp["b_o"] = _init_linear(next(ks), d, d)
        lp["ln1_g"], lp["ln1_b"] = _init_ln(d)
        lp["w_ff1"], lp["b_ff1"] = _init_linear(next(ks), d, dff)
        lp["w_ff2"], lp["b_ff2"] = _init_linear(next(ks), dff, d)
        lp["ln2_g"], lp["ln2_b"] = _init_ln(d)
        enc_layers.append(lp)
    p["enc_layers"] = enc_layers

    dec_layers = []
    for _ in range(cfg["dec_layer_num"]):
        lp = {}
        lp["sw_qkv"], lp["sb_qkv"] = _init_linear(next(ks), d, 3 * d)   # fused Q|K|V
        lp["sw_o"], lp["sb_o"] = _init_linear(next(ks), d, d)
        lp["ln1_g"], lp["ln1_b"] = _init_ln(d)
        lp["cw_q"], lp["cb_q"] = _init_linear(next(ks), d, d)
        lp["cw_kv"], lp["cb_kv"] = _init_linear(next(ks), d, 2 * d)     # fused K|V
        lp["cw_o"], lp["cb_o"] = _init_linear(next(ks), d, d)
        lp["ln2_g"], lp["ln2_b"] = _init_ln(d)
        lp["w_ff1"], lp["b_ff1"] = _init_linear(next(ks), d, dff)
        lp["w_ff2"], lp["b_ff2"] = _init_linear(next(ks), dff, d)
        lp["ln3_g"], lp["ln3_b"] = _init_ln(d)
        dec_layers.append(lp)
    p["dec_layers"] = dec_layers

    p["proj_w"], p["proj_b"] = _init_linear(next(ks), d, cfg["output_length"])

    # positional-encoding buffers ('pure' embedding) -- computed once at init
    p["pe_enc"] = sinusoidal_pe(cfg["x_len"], d)
    p["pe_dec"] = sinusoidal_pe(cfg["y_len"], d)
    return p


def pack_params(p, cfg):
    """Pack all parameters into lane-aligned VMEM slabs (done ONCE at init).

    Returns (slabs, layout).  `layout` maps names -> static Python int offsets
    that the kernel closure uses for zero-cost static ref slicing.
    """
    d, dff = cfg["d_model"], cfg["d_ff"]
    lay = {}

    def pad_rc(a, rows, cols):
        return jnp.pad(a, ((0, rows - a.shape[0]), (0, cols - a.shape[1])))

    # ---- WE: embedding weights, one 128-lane column block each -------------
    ef, df = p["enc_embed_w"].shape[0], p["dec_embed_w"].shape[0]
    rmax = max(ef, df)
    we_parts, col = [], 0
    for name, w in (("we.enc", p["enc_embed_w"]), ("we.dec", p["dec_embed_w"])):
        blk = _round_up(w.shape[1], _LANE)
        we_parts.append(pad_rc(w, rmax, blk))
        lay[name] = (col, w.shape[0], w.shape[1])
        col += blk
    WE = jnp.concatenate(we_parts, axis=1)

    # ---- WD: every (d_model -> *) weight, 128-lane aligned column blocks ---
    wd_items = []
    for l, lp in enumerate(p["enc_layers"]):
        wd_items += [(f"wd.e{l}.w_qkv", lp["w_qkv"]), (f"wd.e{l}.w_o", lp["w_o"]),
                     (f"wd.e{l}.w_ff1", lp["w_ff1"])]
    for l, lp in enumerate(p["dec_layers"]):
        wd_items += [(f"wd.d{l}.sw_qkv", lp["sw_qkv"]), (f"wd.d{l}.sw_o", lp["sw_o"]),
                     (f"wd.d{l}.cw_q", lp["cw_q"]), (f"wd.d{l}.cw_kv", lp["cw_kv"]),
                     (f"wd.d{l}.cw_o", lp["cw_o"]), (f"wd.d{l}.w_ff1", lp["w_ff1"])]
    wd_items += [("wd.proj_w", p["proj_w"])]
    wd_parts, col = [], 0
    for name, w in wd_items:
        blk = _round_up(w.shape[1], _LANE)
        wd_parts.append(pad_rc(w, d, blk))
        lay[name] = (col, w.shape[1])
        col += blk
    WD = jnp.concatenate(wd_parts, axis=1)

    # ---- WF: every (d_ff -> d_model) weight ---------------------------------
    wf_items = [(f"wf.e{l}.w_ff2", lp["w_ff2"]) for l, lp in enumerate(p["enc_layers"])]
    wf_items += [(f"wf.d{l}.w_ff2", lp["w_ff2"]) for l, lp in enumerate(p["dec_layers"])]
    wf_parts, col = [], 0
    for name, w in wf_items:
        blk = _round_up(w.shape[1], _LANE)
        wf_parts.append(pad_rc(w, dff, blk))
        lay[name] = (col, w.shape[1])
        col += blk
    WF = (jnp.concatenate(wf_parts, axis=1) if wf_parts
          else jnp.zeros((dff, _LANE), jnp.float32))

    # ---- V: every bias / LayerNorm vector as one lane-padded row -----------
    v_items = []
    for l, lp in enumerate(p["enc_layers"]):
        v_items += [(f"v.e{l}.b_qkv", lp["b_qkv"]), (f"v.e{l}.b_o", lp["b_o"]),
                    (f"v.e{l}.ln1_g", lp["ln1_g"]), (f"v.e{l}.ln1_b", lp["ln1_b"]),
                    (f"v.e{l}.b_ff1", lp["b_ff1"]), (f"v.e{l}.b_ff2", lp["b_ff2"]),
                    (f"v.e{l}.ln2_g", lp["ln2_g"]), (f"v.e{l}.ln2_b", lp["ln2_b"])]
    for l, lp in enumerate(p["dec_layers"]):
        v_items += [(f"v.d{l}.sb_qkv", lp["sb_qkv"]), (f"v.d{l}.sb_o", lp["sb_o"]),
                    (f"v.d{l}.ln1_g", lp["ln1_g"]), (f"v.d{l}.ln1_b", lp["ln1_b"]),
                    (f"v.d{l}.cb_q", lp["cb_q"]), (f"v.d{l}.cb_kv", lp["cb_kv"]),
                    (f"v.d{l}.cb_o", lp["cb_o"]),
                    (f"v.d{l}.ln2_g", lp["ln2_g"]), (f"v.d{l}.ln2_b", lp["ln2_b"]),
                    (f"v.d{l}.b_ff1", lp["b_ff1"]), (f"v.d{l}.b_ff2", lp["b_ff2"]),
                    (f"v.d{l}.ln3_g", lp["ln3_g"]), (f"v.d{l}.ln3_b", lp["ln3_b"])]
    v_items += [("v.proj_b", p["proj_b"])]
    vw = _round_up(max(v.shape[1] for _, v in v_items), _LANE)
    v_rows = []
    for i, (name, v) in enumerate(v_items):
        v_rows.append(pad_rc(v, 1, vw))
        lay[name] = (i, v.shape[1])
    V = jnp.concatenate(v_rows, axis=0)

    # ---- PE: positional encodings with the embedding biases folded in ------
    PE = jnp.concatenate([p["pe_enc"] + p["enc_embed_b"],
                          p["pe_dec"] + p["dec_embed_b"]], axis=0)

    slabs = {"WE": WE, "WD": WD, "WF": WF, "V": V, "PE": PE}
    return slabs, lay


# --------------------------------------------------------------------------- the fused kernel

def _vnaw_kernel(*refs, cfg, B, lay, has_masks):
    d = cfg["d_model"]
    H = cfg["n_heads"]
    dh = d // H
    Sx = cfg["x_len"]
    Sy = cfg["y_len"]
    scale = 1.0 / math.sqrt(dh)

    has_em, has_lm, has_xm = has_masks
    x_ref, y_ref, pe_ref, we_ref, wd_ref, wf_ref, v_ref = refs[:7]
    mrefs = list(refs[7:-1])
    o_ref = refs[-1]

    m_enc = mrefs.pop(0)[...] if has_em else None
    if has_lm:
        m_la = mrefs.pop(0)[...]
    else:                                   # default: causal mask built in-kernel
        r = jax.lax.broadcasted_iota(jnp.int32, (Sy, Sy), 0)
        c = jax.lax.broadcasted_iota(jnp.int32, (Sy, Sy), 1)
        m_la = jnp.where(c > r, -1e9, 0.0).astype(jnp.float32)
    m_xd = mrefs.pop(0)[...] if has_xm else None

    # ---- static-layout accessors (all offsets are Python ints -> static refs)
    def WD(name):
        off, w = lay["wd." + name]
        return wd_ref[:, off:off + w]

    def WF(name):
        off, w = lay["wf." + name]
        return wf_ref[:, off:off + w]

    def V(name):
        row, w = lay["v." + name]
        return v_ref[row:row + 1, 0:w]

    def WE(name):
        off, rows, w = lay["we." + name]
        return we_ref[0:rows, off:off + w]

    # ---- in-kernel math helpers
    def linear(x, w, b, relu=False):
        y = jnp.dot(x, w, preferred_element_type=jnp.float32) + b
        return jnp.maximum(y, 0.0) if relu else y

    def add_ln(x, res, g, b, eps=1e-5):
        h = x + res
        mu = jnp.mean(h, axis=-1, keepdims=True)
        var = jnp.mean((h - mu) * (h - mu), axis=-1, keepdims=True)
        return (h - mu) * jax.lax.rsqrt(var + eps) * g + b

    def mha(q2, k2, v2, w_o, b_o, mask, Sq, Sk):
        """Multi-head attention: batch-dim einsums, H heads unrolled."""
        q3 = q2.reshape(B, Sq, d)
        k3 = k2.reshape(B, Sk, d)
        v3 = v2.reshape(B, Sk, d)
        heads = []
        for h_ in range(H):
            sl = slice(h_ * dh, (h_ + 1) * dh)
            s = jnp.einsum("bqd,bkd->bqk", q3[:, :, sl] * scale, k3[:, :, sl],
                           preferred_element_type=jnp.float32)
            if mask is not None:
                s = s + mask                                  # (Sq,Sk) shared over B
            s = s - jnp.max(s, axis=-1, keepdims=True)        # stable softmax
            p_ = jnp.exp(s)
            p_ = p_ * pl.reciprocal(jnp.sum(p_, axis=-1, keepdims=True), approx=True)
            heads.append(jnp.einsum("bqk,bkd->bqd", p_, v3[:, :, sl],
                                    preferred_element_type=jnp.float32))
        ctx = jnp.concatenate(heads, axis=-1).reshape(B * Sq, d)
        return jnp.dot(ctx, w_o, preferred_element_type=jnp.float32) + b_o

    # ---- 'pure' embeddings: value linear + PE (embed bias pre-folded into PE;
    #      dropout is identity in eval mode)
    enc = jnp.dot(x_ref[...], WE("enc"), preferred_element_type=jnp.float32)
    enc = (enc.reshape(B, Sx, d) + pe_ref[0:Sx, 0:d]).reshape(B * Sx, d)

    # ---- encoder (post-LN transformer layers)
    h = enc
    for l in range(cfg["enc_layer_num"]):
        e = f"e{l}."
        qkv = linear(h, WD(e + "w_qkv"), V(e + "b_qkv"))                 # fused Q|K|V
        a = mha(qkv[:, 0:d], qkv[:, d:2 * d], qkv[:, 2 * d:3 * d],
                WD(e + "w_o"), V(e + "b_o"), m_enc, Sx, Sx)
        h = add_ln(a, h, V(e + "ln1_g"), V(e + "ln1_b"))
        f = linear(linear(h, WD(e + "w_ff1"), V(e + "b_ff1"), relu=True),
                   WF(e + "w_ff2"), V(e + "b_ff2"))
        h = add_ln(f, h, V(e + "ln2_g"), V(e + "ln2_b"))
    enc_out = h

    # ---- decoder
    if cfg["dec_layer_num"] > 0:
        g = jnp.dot(y_ref[...], WE("dec"), preferred_element_type=jnp.float32)
        g = (g.reshape(B, Sy, d) + pe_ref[Sx:Sx + Sy, 0:d]).reshape(B * Sy, d)
        for l in range(cfg["dec_layer_num"]):
            dp = f"d{l}."
            # masked self-attention
            qkv = linear(g, WD(dp + "sw_qkv"), V(dp + "sb_qkv"))         # fused Q|K|V
            a = mha(qkv[:, 0:d], qkv[:, d:2 * d], qkv[:, 2 * d:3 * d],
                    WD(dp + "sw_o"), V(dp + "sb_o"), m_la, Sy, Sy)
            g = add_ln(a, g, V(dp + "ln1_g"), V(dp + "ln1_b"))
            # encoder-decoder cross-attention
            q = linear(g, WD(dp + "cw_q"), V(dp + "cb_q"))
            kv = linear(enc_out, WD(dp + "cw_kv"), V(dp + "cb_kv"))      # fused K|V
            a = mha(q, kv[:, 0:d], kv[:, d:2 * d],
                    WD(dp + "cw_o"), V(dp + "cb_o"), m_xd, Sy, Sx)
            g = add_ln(a, g, V(dp + "ln2_g"), V(dp + "ln2_b"))
            # feed-forward
            f = linear(linear(g, WD(dp + "w_ff1"), V(dp + "b_ff1"), relu=True),
                       WF(dp + "w_ff2"), V(dp + "b_ff2"))
            g = add_ln(f, g, V(dp + "ln3_g"), V(dp + "ln3_b"))
        dec_out = g
    else:
        dec_out = enc_out

    # ---- projection_type == 'linear'
    o_ref[...] = jnp.dot(dec_out, WD("proj_w"),
                         preferred_element_type=jnp.float32) + V("proj_b")


# --------------------------------------------------------------------------- wrapper

def vnaw_forward(slabs, lay, cfg, x, x_mark, y, y_mark,
                 enc_self_mask=None, look_ahead_mask=None, enc_dec_mask=None):
    # x_mark / y_mark are unused (embed_type='pure', temporal_type='none').
    del x_mark, y_mark
    B, x_len, ef = x.shape
    _, y_len, df = y.shape
    out_len = cfg["output_length"]

    x2 = x.reshape(B * x_len, ef)
    y2 = y.reshape(B * y_len, df)
    out_rows = B * (y_len if cfg["dec_layer_num"] > 0 else x_len)

    has_masks = (enc_self_mask is not None,
                 look_ahead_mask is not None,
                 enc_dec_mask is not None)
    operands = [x2, y2, slabs["PE"], slabs["WE"], slabs["WD"], slabs["WF"], slabs["V"]]
    for m in (enc_self_mask, look_ahead_mask, enc_dec_mask):
        if m is not None:
            operands.append(m.astype(jnp.float32))

    out2 = pl.pallas_call(
        functools.partial(_vnaw_kernel, cfg=cfg, B=B, lay=lay, has_masks=has_masks),
        out_shape=jax.ShapeDtypeStruct((out_rows, out_len), jnp.float32),
    )(*operands)
    return out2.reshape(B, out_rows // B, out_len)


# --------------------------------------------------------------------------- main

if __name__ == "__main__":
    cfg = dict(
        x_len=16, y_len=8, d_model=32, d_ff=64, n_heads=4,
        projection_type="linear", embed_type="pure", temporal_type="none",
        enc_layer_num=1, dec_layer_num=1,
        enc_feature_len=4, dec_feature_len=4,
        enc_temporal_len=3, dec_temporal_len=3,
        enc_act="relu", dec_act="relu", dropout_p=0.0, output_length=1,
    )

    key = jax.random.PRNGKey(0)
    kp, kx, kxm, ky, kym = jax.random.split(key, 5)

    params = init_params(kp, cfg)
    slabs, lay = pack_params(params, cfg)          # init-time packing (once)

    B = 2
    x = jax.random.normal(kx, (B, cfg["x_len"], cfg["enc_feature_len"]), jnp.float32)
    x_mark = jax.random.normal(kxm, (B, cfg["x_len"], cfg["enc_temporal_len"]), jnp.float32)
    y = jax.random.normal(ky, (B, cfg["y_len"], cfg["dec_feature_len"]), jnp.float32)
    y_mark = jax.random.normal(kym, (B, cfg["y_len"], cfg["dec_temporal_len"]), jnp.float32)

    fwd = jax.jit(lambda s, xx, xm, yy, ym: vnaw_forward(s, lay, cfg, xx, xm, yy, ym))
    out = jax.block_until_ready(fwd(slabs, x, x_mark, y, y_mark))

    assert out.shape == (B, cfg["y_len"], cfg["output_length"])
    assert bool(jnp.all(jnp.isfinite(out)))
    print("KERNEL_OK")
</pallas_src>

<mosaic_0001>
module attributes {stable_mosaic.version = 11 : i64} {
  func.func @_vnaw_kernel(%arg0: memref<32x4xf32, #tpu.memory_space<vmem>>, %arg1: memref<16x4xf32, #tpu.memory_space<vmem>>, %arg2: memref<24x32xf32, #tpu.memory_space<vmem>>, %arg3: memref<4x256xf32, #tpu.memory_space<vmem>>, %arg4: memref<32x1280xf32, #tpu.memory_space<vmem>>, %arg5: memref<64x256xf32, #tpu.memory_space<vmem>>, %arg6: memref<22x128xf32, #tpu.memory_space<vmem>>, %arg7: memref<16x1xf32, #tpu.memory_space<vmem>>) attributes {dimension_semantics = [], scalar_prefetch = 0 : i64, scratch_operands = 0 : i64, tpu.core_type = #tpu.core_type<tc>} {
    %0 = tpu.iota {dimensions = array<i32: 0>} : vector<8x8xi32>
    %1 = tpu.iota {dimensions = array<i32: 1>} : vector<8x8xi32>
    %2 = arith.cmpi sgt, %1, %0 : vector<8x8xi32>
    %cst = arith.constant -1.000000e+09 : f32
    %cst_0 = arith.constant 0.000000e+00 : f32
    %3 = vector.broadcast %cst : f32 to vector<8x8xf32>
    %4 = vector.broadcast %cst_0 : f32 to vector<8x8xf32>
    %5 = arith.select %2, %3, %4 : vector<8x8xi1>, vector<8x8xf32>
    %c0 = arith.constant 0 : index
    %c0_1 = arith.constant 0 : index
    %6 = vector.load %arg0[%c0, %c0_1] : memref<32x4xf32, #tpu.memory_space<vmem>>, vector<32x4xf32>
    %c0_2 = arith.constant 0 : index
    %c0_3 = arith.constant 0 : index
    %7 = vector.load %arg3[%c0_2, %c0_3] : memref<4x256xf32, #tpu.memory_space<vmem>>, vector<4x32xf32>
    %cst_4 = arith.constant dense<0.000000e+00> : vector<32x32xf32>
    %8 = tpu.matmul %6, %7, %cst_4 {dimension_numbers = #tpu.dot_dimension_numbers<[1], [0], [0], [1], [0, 0, 1, 1], [], []>} : vector<32x4xf32>, vector<4x32xf32>, vector<32x32xf32> -> vector<32x32xf32>
    %9 = vector.shape_cast %8 : vector<32x32xf32> to vector<2x16x32xf32>
    %c0_5 = arith.constant 0 : index
    %c0_6 = arith.constant 0 : index
    %10 = vector.load %arg2[%c0_5, %c0_6] : memref<24x32xf32, #tpu.memory_space<vmem>>, vector<16x32xf32>
    %11 = vector.shape_cast %10 : vector<16x32xf32> to vector<1x16x32xf32>
    %12 = vector.broadcast %11 : vector<1x16x32xf32> to vector<2x16x32xf32>
    %13 = arith.addf %9, %12 : vector<2x16x32xf32>
    %14 = vector.shape_cast %13 : vector<2x16x32xf32> to vector<32x32xf32>
    %c0_7 = arith.constant 0 : index
    %c0_8 = arith.constant 0 : index
    %15 = vector.load %arg4[%c0_7, %c0_8] : memref<32x1280xf32, #tpu.memory_space<vmem>>, vector<32x96xf32>
    %c0_9 = arith.constant 0 : index
    %c0_10 = arith.constant 0 : index
    %16 = vector.load %arg6[%c0_9, %c0_10] : memref<22x128xf32, #tpu.memory_space<vmem>>, vector<1x96xf32>
    %cst_11 = arith.constant dense<0.000000e+00> : vector<32x96xf32>
    %17 = tpu.matmul %14, %15, %cst_11 {dimension_numbers = #tpu.dot_dimension_numbers<[1], [0], [0], [1], [0, 0, 1, 1], [], []>} : vector<32x32xf32>, vector<32x96xf32>, vector<32x96xf32> -> vector<32x96xf32>
    %18 = vector.broadcast %16 : vector<1x96xf32> to vector<32x96xf32>
    %19 = arith.addf %17, %18 : vector<32x96xf32>
    %20 = vector.extract_strided_slice %19 {offsets = [0, 0], sizes = [32, 32], strides = [1, 1]} : vector<32x96xf32> to vector<32x32xf32>
    %21 = vector.extract_strided_slice %19 {offsets = [0, 32], sizes = [32, 32], strides = [1, 1]} : vector<32x96xf32> to vector<32x32xf32>
    %22 = vector.extract_strided_slice %19 {offsets = [0, 64], sizes = [32, 32], strides = [1, 1]} : vector<32x96xf32> to vector<32x32xf32>
    %c0_12 = arith.constant 0 : index
    %c128 = arith.constant 128 : index
    %23 = vector.load %arg4[%c0_12, %c128] : memref<32x1280xf32, #tpu.memory_space<vmem>>, vector<32x32xf32>
    %c1 = arith.constant 1 : index
    %c0_13 = arith.constant 0 : index
    %24 = vector.load %arg6[%c1, %c0_13] : memref<22x128xf32, #tpu.memory_space<vmem>>, vector<1x32xf32>
    %25 = vector.shape_cast %20 : vector<32x32xf32> to vector<2x16x32xf32>
    %26 = vector.shape_cast %21 : vector<32x32xf32> to vector<2x16x32xf32>
    %27 = vector.shape_cast %22 : vector<32x32xf32> to vector<2x16x32xf32>
    %28 = vector.extract_strided_slice %25 {offsets = [0, 0, 0], sizes = [2, 16, 8], strides = [1, 1, 1]} : vector<2x16x32xf32> to vector<2x16x8xf32>
    %cst_14 = arith.constant 0.353553385 : f32
    %29 = vector.broadcast %cst_14 : f32 to vector<2x16x8xf32>
    %30 = arith.mulf %28, %29 : vector<2x16x8xf32>
    %31 = vector.extract_strided_slice %26 {offsets = [0, 0, 0], sizes = [2, 16, 8], strides = [1, 1, 1]} : vector<2x16x32xf32> to vector<2x16x8xf32>
    "tpu.trace_start"() <{level = 10 : i32, message = "bqd,bkd->bqk"}> : () -> ()
    %cst_15 = arith.constant dense<0.000000e+00> : vector<2x16x16xf32>
    %32 = tpu.matmul %30, %31, %cst_15 {dimension_numbers = #tpu.dot_dimension_numbers<[2], [2], [1], [1], [0, 0, 0, 1, 1, 1], [0], [0]>} : vector<2x16x8xf32>, vector<2x16x8xf32>, vector<2x16x16xf32> -> vector<2x16x16xf32>
    "tpu.trace_stop"() : () -> ()
    %cst_16 = arith.constant dense<0xFF800000> : vector<2x16xf32>
    %33 = vector.multi_reduction <maximumf>, %32, %cst_16 [2] : vector<2x16x16xf32> to vector<2x16xf32>
    %34 = vector.shape_cast %33 : vector<2x16xf32> to vector<2x16x1xf32>
    %35 = vector.broadcast %34 : vector<2x16x1xf32> to vector<2x16x16xf32>
    %36 = arith.subf %32, %35 : vector<2x16x16xf32>
    %37 = math.exp %36 : vector<2x16x16xf32>
    %cst_17 = arith.constant dense<0.000000e+00> : vector<2x16xf32>
    %38 = vector.multi_reduction <add>, %37, %cst_17 [2] : vector<2x16x16xf32> to vector<2x16xf32>
    %39 = vector.shape_cast %38 : vector<2x16xf32> to vector<2x16x1xf32>
    %40 = tpu.reciprocal %39 {approx = true} : vector<2x16x1xf32> -> vector<2x16x1xf32>
    %41 = vector.broadcast %40 : vector<2x16x1xf32> to vector<2x16x16xf32>
    %42 = arith.mulf %37, %41 : vector<2x16x16xf32>
    %43 = vector.extract_strided_slice %27 {offsets = [0, 0, 0], sizes = [2, 16, 8], strides = [1, 1, 1]} : vector<2x16x32xf32> to vector<2x16x8xf32>
    "tpu.trace_start"() <{level = 10 : i32, message = "bqk,bkd->bqd"}> : () -> ()
    %cst_18 = arith.constant dense<0.000000e+00> : vector<2x16x8xf32>
    %44 = tpu.matmul %42, %43, %cst_18 {dimension_numbers = #tpu.dot_dimension_numbers<[2], [1], [1], [2], [0, 0, 0, 1, 1, 2], [0], [0]>} : vector<2x16x16xf32>, vector<2x16x8xf32>, vector<2x16x8xf32> -> vector<2x16x8xf32>
    "tpu.trace_stop"() : () -> ()
    %45 = vector.extract_strided_slice %25 {offsets = [0, 0, 8], sizes = [2, 16, 8], strides = [1, 1, 1]} : vector<2x16x32xf32> to vector<2x16x8xf32>
    %cst_19 = arith.constant 0.353553385 : f32
    %46 = vector.broadcast %cst_19 : f32 to vector<2x16x8xf32>
    %47 = arith.mulf %45, %46 : vector<2x16x8xf32>
    %48 = vector.extract_strided_slice %26 {offsets = [0, 0, 8], sizes = [2, 16, 8], strides = [1, 1, 1]} : vector<2x16x32xf32> to vector<2x16x8xf32>
    "tpu.trace_start"() <{level = 10 : i32, message = "bqd,bkd->bqk"}> : () -> ()
    %cst_20 = arith.constant dense<0.000000e+00> : vector<2x16x16xf32>
    %49 = tpu.matmul %47, %48, %cst_20 {dimension_numbers = #tpu.dot_dimension_numbers<[2], [2], [1], [1], [0, 0, 0, 1, 1, 1], [0], [0]>} : vector<2x16x8xf32>, vector<2x16x8xf32>, vector<2x16x16xf32> -> vector<2x16x16xf32>
    "tpu.trace_stop"() : () -> ()
    %cst_21 = arith.constant dense<0xFF800000> : vector<2x16xf32>
    %50 = vector.multi_reduction <maximumf>, %49, %cst_21 [2] : vector<2x16x16xf32> to vector<2x16xf32>
    %51 = vector.shape_cast %50 : vector<2x16xf32> to vector<2x16x1xf32>
    %52 = vector.broadcast %51 : vector<2x16x1xf32> to vector<2x16x16xf32>
    %53 = arith.subf %49, %52 : vector<2x16x16xf32>
    %54 = math.exp %53 : vector<2x16x16xf32>
    %cst_22 = arith.constant dense<0.000000e+00> : vector<2x16xf32>
    %55 = vector.multi_reduction <add>, %54, %cst_22 [2] : vector<2x16x16xf32> to vector<2x16xf32>
    %56 = vector.shape_cast %55 : vector<2x16xf32> to vector<2x16x1xf32>
    %57 = tpu.reciprocal %56 {approx = true} : vector<2x16x1xf32> -> vector<2x16x1xf32>
    %58 = vector.broadcast %57 : vector<2x16x1xf32> to vector<2x16x16xf32>
    %59 = arith.mulf %54, %58 : vector<2x16x16xf32>
    %60 = vector.extract_strided_slice %27 {offsets = [0, 0, 8], sizes = [2, 16, 8], strides = [1, 1, 1]} : vector<2x16x32xf32> to vector<2x16x8xf32>
    "tpu.trace_start"() <{level = 10 : i32, message = "bqk,bkd->bqd"}> : () -> ()
    %cst_23 = arith.constant dense<0.000000e+00> : vector<2x16x8xf32>
    %61 = tpu.matmul %59, %60, %cst_23 {dimension_numbers = #tpu.dot_dimension_numbers<[2], [1], [1], [2], [0, 0, 0, 1, 1, 2], [0], [0]>} : vector<2x16x16xf32>, vector<2x16x8xf32>, vector<2x16x8xf32> -> vector<2x16x8xf32>
    "tpu.trace_stop"() : () -> ()
    %62 = vector.extract_strided_slice %25 {offsets = [0, 0, 16], sizes = [2, 16, 8], strides = [1, 1, 1]} : vector<2x16x32xf32> to vector<2x16x8xf32>
    %cst_24 = arith.constant 0.353553385 : f32
    %63 = vector.broadcast %cst_24 : f32 to vector<2x16x8xf32>
    %64 = arith.mulf %62, %63 : vector<2x16x8xf32>
    %65 = vector.extract_strided_slice %26 {offsets = [0, 0, 16], sizes = [2, 16, 8], strides = [1, 1, 1]} : vector<2x16x32xf32> to vector<2x16x8xf32>
    "tpu.trace_start"() <{level = 10 : i32, message = "bqd,bkd->bqk"}> : () -> ()
    %cst_25 = arith.constant dense<0.000000e+00> : vector<2x16x16xf32>
    %66 = tpu.matmul %64, %65, %cst_25 {dimension_numbers = #tpu.dot_dimension_numbers<[2], [2], [1], [1], [0, 0, 0, 1, 1, 1], [0], [0]>} : vector<2x16x8xf32>, vector<2x16x8xf32>, vector<2x16x16xf32> -> vector<2x16x16xf32>
    "tpu.trace_stop"() : () -> ()
    %cst_26 = arith.constant dense<0xFF800000> : vector<2x16xf32>
    %67 = vector.multi_reduction <maximumf>, %66, %cst_26 [2] : vector<2x16x16xf32> to vector<2x16xf32>
    %68 = vector.shape_cast %67 : vector<2x16xf32> to vector<2x16x1xf32>
    %69 = vector.broadcast %68 : vector<2x16x1xf32> to vector<2x16x16xf32>
    %70 = arith.subf %66, %69 : vector<2x16x16xf32>
    %71 = math.exp %70 : vector<2x16x16xf32>
    %cst_27 = arith.constant dense<0.000000e+00> : vector<2x16xf32>
    %72 = vector.multi_reduction <add>, %71, %cst_27 [2] : vector<2x16x16xf32> to vector<2x16xf32>
    %73 = vector.shape_cast %72 : vector<2x16xf32> to vector<2x16x1xf32>
    %74 = tpu.reciprocal %73 {approx = true} : vector<2x16x1xf32> -> vector<2x16x1xf32>
    %75 = vector.broadcast %74 : vector<2x16x1xf32> to vector<2x16x16xf32>
    %76 = arith.mulf %71, %75 : vector<2x16x16xf32>
    %77 = vector.extract_strided_slice %27 {offsets = [0, 0, 16], sizes = [2, 16, 8], strides = [1, 1, 1]} : vector<2x16x32xf32> to vector<2x16x8xf32>
    "tpu.trace_start"() <{level = 10 : i32, message = "bqk,bkd->bqd"}> : () -> ()
    %cst_28 = arith.constant dense<0.000000e+00> : vector<2x16x8xf32>
    %78 = tpu.matmul %76, %77, %cst_28 {dimension_numbers = #tpu.dot_dimension_numbers<[2], [1], [1], [2], [0, 0, 0, 1, 1, 2], [0], [0]>} : vector<2x16x16xf32>, vector<2x16x8xf32>, vector<2x16x8xf32> -> vector<2x16x8xf32>
    "tpu.trace_stop"() : () -> ()
    %79 = vector.extract_strided_slice %25 {offsets = [0, 0, 24], sizes = [2, 16, 8], strides = [1, 1, 1]} : vector<2x16x32xf32> to vector<2x16x8xf32>
    %cst_29 = arith.constant 0.353553385 : f32
    %80 = vector.broadcast %cst_29 : f32 to vector<2x16x8xf32>
    %81 = arith.mulf %79, %80 : vector<2x16x8xf32>
    %82 = vector.extract_strided_slice %26 {offsets = [0, 0, 24], sizes = [2, 16, 8], strides = [1, 1, 1]} : vector<2x16x32xf32> to vector<2x16x8xf32>
    "tpu.trace_start"() <{level = 10 : i32, message = "bqd,bkd->bqk"}> : () -> ()
    %cst_30 = arith.constant dense<0.000000e+00> : vector<2x16x16xf32>
    %83 = tpu.matmul %81, %82, %cst_30 {dimension_numbers = #tpu.dot_dimension_numbers<[2], [2], [1], [1], [0, 0, 0, 1, 1, 1], [0], [0]>} : vector<2x16x8xf32>, vector<2x16x8xf32>, vector<2x16x16xf32> -> vector<2x16x16xf32>
    "tpu.trace_stop"() : () -> ()
    %cst_31 = arith.constant dense<0xFF800000> : vector<2x16xf32>
    %84 = vector.multi_reduction <maximumf>, %83, %cst_31 [2] : vector<2x16x16xf32> to vector<2x16xf32>
    %85 = vector.shape_cast %84 : vector<2x16xf32> to vector<2x16x1xf32>
    %86 = vector.broadcast %85 : vector<2x16x1xf32> to vector<2x16x16xf32>
    %87 = arith.subf %83, %86 : vector<2x16x16xf32>
    %88 = math.exp %87 : vector<2x16x16xf32>
    %cst_32 = arith.constant dense<0.000000e+00> : vector<2x16xf32>
    %89 = vector.multi_reduction <add>, %88, %cst_32 [2] : vector<2x16x16xf32> to vector<2x16xf32>
    %90 = vector.shape_cast %89 : vector<2x16xf32> to vector<2x16x1xf32>
    %91 = tpu.reciprocal %90 {approx = true} : vector<2x16x1xf32> -> vector<2x16x1xf32>
    %92 = vector.broadcast %91 : vector<2x16x1xf32> to vector<2x16x16xf32>
    %93 = arith.mulf %88, %92 : vector<2x16x16xf32>
    %94 = vector.extract_strided_slice %27 {offsets = [0, 0, 24], sizes = [2, 16, 8], strides = [1, 1, 1]} : vector<2x16x32xf32> to vector<2x16x8xf32>
    "tpu.trace_start"() <{level = 10 : i32, message = "bqk,bkd->bqd"}> : () -> ()
    %cst_33 = arith.constant dense<0.000000e+00> : vector<2x16x8xf32>
    %95 = tpu.matmul %93, %94, %cst_33 {dimension_numbers = #tpu.dot_dimension_numbers<[2], [1], [1], [2], [0, 0, 0, 1, 1, 2], [0], [0]>} : vector<2x16x16xf32>, vector<2x16x8xf32>, vector<2x16x8xf32> -> vector<2x16x8xf32>
    "tpu.trace_stop"() : () -> ()
    %96 = tpu.concatenate %44, %61, %78, %95 in 2 : vector<2x16x8xf32>, vector<2x16x8xf32>, vector<2x16x8xf32>, vector<2x16x8xf32> -> vector<2x16x32xf32>
    %97 = vector.shape_cast %96 : vector<2x16x32xf32> to vector<32x32xf32>
    %cst_34 = arith.constant dense<0.000000e+00> : vector<32x32xf32>
    %98 = tpu.matmul %97, %23, %cst_34 {dimension_numbers = #tpu.dot_dimension_numbers<[1], [0], [0], [1], [0, 0, 1, 1], [], []>} : vector<32x32xf32>, vector<32x32xf32>, vector<32x32xf32> -> vector<32x32xf32>
    %99 = vector.broadcast %24 : vector<1x32xf32> to vector<32x32xf32>
    %100 = arith.addf %98, %99 : vector<32x32xf32>
    %c2 = arith.constant 2 : index
    %c0_35 = arith.constant 0 : index
    %101 = vector.load %arg6[%c2, %c0_35] : memref<22x128xf32, #tpu.memory_space<vmem>>, vector<1x32xf32>
    %c3 = arith.constant 3 : index
    %c0_36 = arith.constant 0 : index
    %102 = vector.load %arg6[%c3, %c0_36] : memref<22x128xf32, #tpu.memory_space<vmem>>, vector<1x32xf32>
    %103 = arith.addf %100, %14 : vector<32x32xf32>
    %cst_37 = arith.constant dense<0.000000e+00> : vector<32xf32>
    %104 = vector.multi_reduction <add>, %103, %cst_37 [1] : vector<32x32xf32> to vector<32xf32>
    %105 = vector.shape_cast %104 : vector<32xf32> to vector<32x1xf32>
    %cst_38 = arith.constant 3.200000e+01 : f32
    %106 = vector.broadcast %cst_38 : f32 to vector<32x1xf32>
    %107 = arith.divf %105, %106 : vector<32x1xf32>
    %108 = vector.broadcast %107 : vector<32x1xf32> to vector<32x32xf32>
    %109 = arith.subf %103, %108 : vector<32x32xf32>
    %110 = vector.broadcast %107 : vector<32x1xf32> to vector<32x32xf32>
    %111 = arith.subf %103, %110 : vector<32x32xf32>
    %112 = arith.mulf %109, %111 : vector<32x32xf32>
    %cst_39 = arith.constant dense<0.000000e+00> : vector<32xf32>
    %113 = vector.multi_reduction <add>, %112, %cst_39 [1] : vector<32x32xf32> to vector<32xf32>
    %114 = vector.shape_cast %113 : vector<32xf32> to vector<32x1xf32>
    %cst_40 = arith.constant 3.200000e+01 : f32
    %115 = vector.broadcast %cst_40 : f32 to vector<32x1xf32>
    %116 = arith.divf %114, %115 : vector<32x1xf32>
    %117 = vector.broadcast %107 : vector<32x1xf32> to vector<32x32xf32>
    %118 = arith.subf %103, %117 : vector<32x32xf32>
    %cst_41 = arith.constant 9.99999974E-6 : f32
    %119 = vector.broadcast %cst_41 : f32 to vector<32x1xf32>
    %120 = arith.addf %116, %119 : vector<32x1xf32>
    %121 = math.rsqrt %120 : vector<32x1xf32>
    %122 = vector.broadcast %121 : vector<32x1xf32> to vector<32x32xf32>
    %123 = arith.mulf %118, %122 : vector<32x32xf32>
    %124 = vector.broadcast %101 : vector<1x32xf32> to vector<32x32xf32>
    %125 = arith.mulf %123, %124 : vector<32x32xf32>
    %126 = vector.broadcast %102 : vector<1x32xf32> to vector<32x32xf32>
    %127 = arith.addf %125, %126 : vector<32x32xf32>
    %c0_42 = arith.constant 0 : index
    %c256 = arith.constant 256 : index
    %128 = vector.load %arg4[%c0_42, %c256] : memref<32x1280xf32, #tpu.memory_space<vmem>>, vector<32x64xf32>
    %c4 = arith.constant 4 : index
    %c0_43 = arith.constant 0 : index
    %129 = vector.load %arg6[%c4, %c0_43] : memref<22x128xf32, #tpu.memory_space<vmem>>, vector<1x64xf32>
    %cst_44 = arith.constant dense<0.000000e+00> : vector<32x64xf32>
    %130 = tpu.matmul %127, %128, %cst_44 {dimension_numbers = #tpu.dot_dimension_numbers<[1], [0], [0], [1], [0, 0, 1, 1], [], []>} : vector<32x32xf32>, vector<32x64xf32>, vector<32x64xf32> -> vector<32x64xf32>
    %131 = vector.broadcast %129 : vector<1x64xf32> to vector<32x64xf32>
    %132 = arith.addf %130, %131 : vector<32x64xf32>
    %cst_45 = arith.constant 0.000000e+00 : f32
    %133 = vector.broadcast %cst_45 : f32 to vector<32x64xf32>
    %134 = arith.maximumf %132, %133 : vector<32x64xf32>
    %c0_46 = arith.constant 0 : index
    %c0_47 = arith.constant 0 : index
    %135 = vector.load %arg5[%c0_46, %c0_47] : memref<64x256xf32, #tpu.memory_space<vmem>>, vector<64x32xf32>
    %c5 = arith.constant 5 : index
    %c0_48 = arith.constant 0 : index
    %136 = vector.load %arg6[%c5, %c0_48] : memref<22x128xf32, #tpu.memory_space<vmem>>, vector<1x32xf32>
    %cst_49 = arith.constant dense<0.000000e+00> : vector<32x32xf32>
    %137 = tpu.matmul %134, %135, %cst_49 {dimension_numbers = #tpu.dot_dimension_numbers<[1], [0], [0], [1], [0, 0, 1, 1], [], []>} : vector<32x64xf32>, vector<64x32xf32>, vector<32x32xf32> -> vector<32x32xf32>
    %138 = vector.broadcast %136 : vector<1x32xf32> to vector<32x32xf32>
    %139 = arith.addf %137, %138 : vector<32x32xf32>
    %c6 = arith.constant 6 : index
    %c0_50 = arith.constant 0 : index
    %140 = vector.load %arg6[%c6, %c0_50] : memref<22x128xf32, #tpu.memory_space<vmem>>, vector<1x32xf32>
    %c7 = arith.constant 7 : index
    %c0_51 = arith.constant 0 : index
    %141 = vector.load %arg6[%c7, %c0_51] : memref<22x128xf32, #tpu.memory_space<vmem>>, vector<1x32xf32>
    %142 = arith.addf %139, %127 : vector<32x32xf32>
    %cst_52 = arith.constant dense<0.000000e+00> : vector<32xf32>
    %143 = vector.multi_reduction <add>, %142, %cst_52 [1] : vector<32x32xf32> to vector<32xf32>
    %144 = vector.shape_cast %143 : vector<32xf32> to vector<32x1xf32>
    %cst_53 = arith.constant 3.200000e+01 : f32
    %145 = vector.broadcast %cst_53 : f32 to vector<32x1xf32>
    %146 = arith.divf %144, %145 : vector<32x1xf32>
    %147 = vector.broadcast %146 : vector<32x1xf32> to vector<32x32xf32>
    %148 = arith.subf %142, %147 : vector<32x32xf32>
    %149 = vector.broadcast %146 : vector<32x1xf32> to vector<32x32xf32>
    %150 = arith.subf %142, %149 : vector<32x32xf32>
    %151 = arith.mulf %148, %150 : vector<32x32xf32>
    %cst_54 = arith.constant dense<0.000000e+00> : vector<32xf32>
    %152 = vector.multi_reduction <add>, %151, %cst_54 [1] : vector<32x32xf32> to vector<32xf32>
    %153 = vector.shape_cast %152 : vector<32xf32> to vector<32x1xf32>
    %cst_55 = arith.constant 3.200000e+01 : f32
    %154 = vector.broadcast %cst_55 : f32 to vector<32x1xf32>
    %155 = arith.divf %153, %154 : vector<32x1xf32>
    %156 = vector.broadcast %146 : vector<32x1xf32> to vector<32x32xf32>
    %157 = arith.subf %142, %156 : vector<32x32xf32>
    %cst_56 = arith.constant 9.99999974E-6 : f32
    %158 = vector.broadcast %cst_56 : f32 to vector<32x1xf32>
    %159 = arith.addf %155, %158 : vector<32x1xf32>
    %160 = math.rsqrt %159 : vector<32x1xf32>
    %161 = vector.broadcast %160 : vector<32x1xf32> to vector<32x32xf32>
    %162 = arith.mulf %157, %161 : vector<32x32xf32>
    %163 = vector.broadcast %140 : vector<1x32xf32> to vector<32x32xf32>
    %164 = arith.mulf %162, %163 : vector<32x32xf32>
    %165 = vector.broadcast %141 : vector<1x32xf32> to vector<32x32xf32>
    %166 = arith.addf %164, %165 : vector<32x32xf32>
    %c0_57 = arith.constant 0 : index
    %c0_58 = arith.constant 0 : index
    %167 = vector.load %arg1[%c0_57, %c0_58] : memref<16x4xf32, #tpu.memory_space<vmem>>, vector<16x4xf32>
    %c0_59 = arith.constant 0 : index
    %c128_60 = arith.constant 128 : index
    %168 = vector.load %arg3[%c0_59, %c128_60] : memref<4x256xf32, #tpu.memory_space<vmem>>, vector<4x32xf32>
    %cst_61 = arith.constant dense<0.000000e+00> : vector<16x32xf32>
    %169 = tpu.matmul %167, %168, %cst_61 {dimension_numbers = #tpu.dot_dimension_numbers<[1], [0], [0], [1], [0, 0, 1, 1], [], []>} : vector<16x4xf32>, vector<4x32xf32>, vector<16x32xf32> -> vector<16x32xf32>
    %170 = vector.shape_cast %169 : vector<16x32xf32> to vector<2x8x32xf32>
    %c16 = arith.constant 16 : index
    %c0_62 = arith.constant 0 : index
    %171 = vector.load %arg2[%c16, %c0_62] : memref<24x32xf32, #tpu.memory_space<vmem>>, vector<8x32xf32>
    %172 = vector.shape_cast %171 : vector<8x32xf32> to vector<1x8x32xf32>
    %173 = vector.broadcast %172 : vector<1x8x32xf32> to vector<2x8x32xf32>
    %174 = arith.addf %170, %173 : vector<2x8x32xf32>
    %175 = vector.shape_cast %174 : vector<2x8x32xf32> to vector<16x32xf32>
    %c0_63 = arith.constant 0 : index
    %c384 = arith.constant 384 : index
    %176 = vector.load %arg4[%c0_63, %c384] : memref<32x1280xf32, #tpu.memory_space<vmem>>, vector<32x96xf32>
    %c8 = arith.constant 8 : index
    %c0_64 = arith.constant 0 : index
    %177 = vector.load %arg6[%c8, %c0_64] : memref<22x128xf32, #tpu.memory_space<vmem>>, vector<1x96xf32>
    %cst_65 = arith.constant dense<0.000000e+00> : vector<16x96xf32>
    %178 = tpu.matmul %175, %176, %cst_65 {dimension_numbers = #tpu.dot_dimension_numbers<[1], [0], [0], [1], [0, 0, 1, 1], [], []>} : vector<16x32xf32>, vector<32x96xf32>, vector<16x96xf32> -> vector<16x96xf32>
    %179 = vector.broadcast %177 : vector<1x96xf32> to vector<16x96xf32>
    %180 = arith.addf %178, %179 : vector<16x96xf32>
    %181 = vector.extract_strided_slice %180 {offsets = [0, 0], sizes = [16, 32], strides = [1, 1]} : vector<16x96xf32> to vector<16x32xf32>
    %182 = vector.extract_strided_slice %180 {offsets = [0, 32], sizes = [16, 32], strides = [1, 1]} : vector<16x96xf32> to vector<16x32xf32>
    %183 = vector.extract_strided_slice %180 {offsets = [0, 64], sizes = [16, 32], strides = [1, 1]} : vector<16x96xf32> to vector<16x32xf32>
    %c0_66 = arith.constant 0 : index
    %c512 = arith.constant 512 : index
    %184 = vector.load %arg4[%c0_66, %c512] : memref<32x1280xf32, #tpu.memory_space<vmem>>, vector<32x32xf32>
    %c9 = arith.constant 9 : index
    %c0_67 = arith.constant 0 : index
    %185 = vector.load %arg6[%c9, %c0_67] : memref<22x128xf32, #tpu.memory_space<vmem>>, vector<1x32xf32>
    %186 = vector.shape_cast %181 : vector<16x32xf32> to vector<2x8x32xf32>
    %187 = vector.shape_cast %182 : vector<16x32xf32> to vector<2x8x32xf32>
    %188 = vector.shape_cast %183 : vector<16x32xf32> to vector<2x8x32xf32>
    %189 = vector.extract_strided_slice %186 {offsets = [0, 0, 0], sizes = [2, 8, 8], strides = [1, 1, 1]} : vector<2x8x32xf32> to vector<2x8x8xf32>
    %cst_68 = arith.constant 0.353553385 : f32
    %190 = vector.broadcast %cst_68 : f32 to vector<2x8x8xf32>
    %191 = arith.mulf %189, %190 : vector<2x8x8xf32>
    %192 = vector.extract_strided_slice %187 {offsets = [0, 0, 0], sizes = [2, 8, 8], strides = [1, 1, 1]} : vector<2x8x32xf32> to vector<2x8x8xf32>
    "tpu.trace_start"() <{level = 10 : i32, message = "bqd,bkd->bqk"}> : () -> ()
    %cst_69 = arith.constant dense<0.000000e+00> : vector<2x8x8xf32>
    %193 = tpu.matmul %191, %192, %cst_69 {dimension_numbers = #tpu.dot_dimension_numbers<[2], [2], [1], [1], [0, 0, 0, 1, 1, 1], [0], [0]>} : vector<2x8x8xf32>, vector<2x8x8xf32>, vector<2x8x8xf32> -> vector<2x8x8xf32>
    "tpu.trace_stop"() : () -> ()
    %194 = vector.shape_cast %5 : vector<8x8xf32> to vector<1x8x8xf32>
    %195 = vector.broadcast %194 : vector<1x8x8xf32> to vector<2x8x8xf32>
    %196 = arith.addf %193, %195 : vector<2x8x8xf32>
    %cst_70 = arith.constant dense<0xFF800000> : vector<2x8xf32>
    %197 = vector.multi_reduction <maximumf>, %196, %cst_70 [2] : vector<2x8x8xf32> to vector<2x8xf32>
    %198 = vector.shape_cast %197 : vector<2x8xf32> to vector<2x8x1xf32>
    %199 = vector.broadcast %198 : vector<2x8x1xf32> to vector<2x8x8xf32>
    %200 = arith.subf %196, %199 : vector<2x8x8xf32>
    %201 = math.exp %200 : vector<2x8x8xf32>
    %cst_71 = arith.constant dense<0.000000e+00> : vector<2x8xf32>
    %202 = vector.multi_reduction <add>, %201, %cst_71 [2] : vector<2x8x8xf32> to vector<2x8xf32>
    %203 = vector.shape_cast %202 : vector<2x8xf32> to vector<2x8x1xf32>
    %204 = tpu.reciprocal %203 {approx = true} : vector<2x8x1xf32> -> vector<2x8x1xf32>
    %205 = vector.broadcast %204 : vector<2x8x1xf32> to vector<2x8x8xf32>
    %206 = arith.mulf %201, %205 : vector<2x8x8xf32>
    %207 = vector.extract_strided_slice %188 {offsets = [0, 0, 0], sizes = [2, 8, 8], strides = [1, 1, 1]} : vector<2x8x32xf32> to vector<2x8x8xf32>
    "tpu.trace_start"() <{level = 10 : i32, message = "bqk,bkd->bqd"}> : () -> ()
    %cst_72 = arith.constant dense<0.000000e+00> : vector<2x8x8xf32>
    %208 = tpu.matmul %206, %207, %cst_72 {dimension_numbers = #tpu.dot_dimension_numbers<[2], [1], [1], [2], [0, 0, 0, 1, 1, 2], [0], [0]>} : vector<2x8x8xf32>, vector<2x8x8xf32>, vector<2x8x8xf32> -> vector<2x8x8xf32>
    "tpu.trace_stop"() : () -> ()
    %209 = vector.extract_strided_slice %186 {offsets = [0, 0, 8], sizes = [2, 8, 8], strides = [1, 1, 1]} : vector<2x8x32xf32> to vector<2x8x8xf32>
    %cst_73 = arith.constant 0.353553385 : f32
    %210 = vector.broadcast %cst_73 : f32 to vector<2x8x8xf32>
    %211 = arith.mulf %209, %210 : vector<2x8x8xf32>
    %212 = vector.extract_strided_slice %187 {offsets = [0, 0, 8], sizes = [2, 8, 8], strides = [1, 1, 1]} : vector<2x8x32xf32> to vector<2x8x8xf32>
    "tpu.trace_start"() <{level = 10 : i32, message = "bqd,bkd->bqk"}> : () -> ()
    %cst_74 = arith.constant dense<0.000000e+00> : vector<2x8x8xf32>
    %213 = tpu.matmul %211, %212, %cst_74 {dimension_numbers = #tpu.dot_dimension_numbers<[2], [2], [1], [1], [0, 0, 0, 1, 1, 1], [0], [0]>} : vector<2x8x8xf32>, vector<2x8x8xf32>, vector<2x8x8xf32> -> vector<2x8x8xf32>
    "tpu.trace_stop"() : () -> ()
    %214 = vector.shape_cast %5 : vector<8x8xf32> to vector<1x8x8xf32>
    %215 = vector.broadcast %214 : vector<1x8x8xf32> to vector<2x8x8xf32>
    %216 = arith.addf %213, %215 : vector<2x8x8xf32>
    %cst_75 = arith.constant dense<0xFF800000> : vector<2x8xf32>
    %217 = vector.multi_reduction <maximumf>, %216, %cst_75 [2] : vector<2x8x8xf32> to vector<2x8xf32>
    %218 = vector.shape_cast %217 : vector<2x8xf32> to vector<2x8x1xf32>
    %219 = vector.broadcast %218 : vector<2x8x1xf32> to vector<2x8x8xf32>
    %220 = arith.subf %216, %219 : vector<2x8x8xf32>
    %221 = math.exp %220 : vector<2x8x8xf32>
    %cst_76 = arith.constant dense<0.000000e+00> : vector<2x8xf32>
    %222 = vector.multi_reduction <add>, %221, %cst_76 [2] : vector<2x8x8xf32> to vector<2x8xf32>
    %223 = vector.shape_cast %222 : vector<2x8xf32> to vector<2x8x1xf32>
    %224 = tpu.reciprocal %223 {approx = true} : vector<2x8x1xf32> -> vector<2x8x1xf32>
    %225 = vector.broadcast %224 : vector<2x8x1xf32> to vector<2x8x8xf32>
    %226 = arith.mulf %221, %225 : vector<2x8x8xf32>
    %227 = vector.extract_strided_slice %188 {offsets = [0, 0, 8], sizes = [2, 8, 8], strides = [1, 1, 1]} : vector<2x8x32xf32> to vector<2x8x8xf32>
    "tpu.trace_start"() <{level = 10 : i32, message = "bqk,bkd->bqd"}> : () -> ()
    %cst_77 = arith.constant dense<0.000000e+00> : vector<2x8x8xf32>
    %228 = tpu.matmul %226, %227, %cst_77 {dimension_numbers = #tpu.dot_dimension_numbers<[2], [1], [1], [2], [0, 0, 0, 1, 1, 2], [0], [0]>} : vector<2x8x8xf32>, vector<2x8x8xf32>, vector<2x8x8xf32> -> vector<2x8x8xf32>
    "tpu.trace_stop"() : () -> ()
    %229 = vector.extract_strided_slice %186 {offsets = [0, 0, 16], sizes = [2, 8, 8], strides = [1, 1, 1]} : vector<2x8x32xf32> to vector<2x8x8xf32>
    %cst_78 = arith.constant 0.353553385 : f32
    %230 = vector.broadcast %cst_78 : f32 to vector<2x8x8xf32>
    %231 = arith.mulf %229, %230 : vector<2x8x8xf32>
    %232 = vector.extract_strided_slice %187 {offsets = [0, 0, 16], sizes = [2, 8, 8], strides = [1, 1, 1]} : vector<2x8x32xf32> to vector<2x8x8xf32>
    "tpu.trace_start"() <{level = 10 : i32, message = "bqd,bkd->bqk"}> : () -> ()
    %cst_79 = arith.constant dense<0.000000e+00> : vector<2x8x8xf32>
    %233 = tpu.matmul %231, %232, %cst_79 {dimension_numbers = #tpu.dot_dimension_numbers<[2], [2], [1], [1], [0, 0, 0, 1, 1, 1], [0], [0]>} : vector<2x8x8xf32>, vector<2x8x8xf32>, vector<2x8x8xf32> -> vector<2x8x8xf32>
    "tpu.trace_stop"() : () -> ()
    %234 = vector.shape_cast %5 : vector<8x8xf32> to vector<1x8x8xf32>
    %235 = vector.broadcast %234 : vector<1x8x8xf32> to vector<2x8x8xf32>
    %236 = arith.addf %233, %235 : vector<2x8x8xf32>
    %cst_80 = arith.constant dense<0xFF800000> : vector<2x8xf32>
    %237 = vector.multi_reduction <maximumf>, %236, %cst_80 [2] : vector<2x8x8xf32> to vector<2x8xf32>
    %238 = vector.shape_cast %237 : vector<2x8xf32> to vector<2x8x1xf32>
    %239 = vector.broadcast %238 : vector<2x8x1xf32> to vector<2x8x8xf32>
    %240 = arith.subf %236, %239 : vector<2x8x8xf32>
    %241 = math.exp %240 : vector<2x8x8xf32>
    %cst_81 = arith.constant dense<0.000000e+00> : vector<2x8xf32>
    %242 = vector.multi_reduction <add>, %241, %cst_81 [2] : vector<2x8x8xf32> to vector<2x8xf32>
    %243 = vector.shape_cast %242 : vector<2x8xf32> to vector<2x8x1xf32>
    %244 = tpu.reciprocal %243 {approx = true} : vector<2x8x1xf32> -> vector<2x8x1xf32>
    %245 = vector.broadcast %244 : vector<2x8x1xf32> to vector<2x8x8xf32>
    %246 = arith.mulf %241, %245 : vector<2x8x8xf32>
    %247 = vector.extract_strided_slice %188 {offsets = [0, 0, 16], sizes = [2, 8, 8], strides = [1, 1, 1]} : vector<2x8x32xf32> to vector<2x8x8xf32>
    "tpu.trace_start"() <{level = 10 : i32, message = "bqk,bkd->bqd"}> : () -> ()
    %cst_82 = arith.constant dense<0.000000e+00> : vector<2x8x8xf32>
    %248 = tpu.matmul %246, %247, %cst_82 {dimension_numbers = #tpu.dot_dimension_numbers<[2], [1], [1], [2], [0, 0, 0, 1, 1, 2], [0], [0]>} : vector<2x8x8xf32>, vector<2x8x8xf32>, vector<2x8x8xf32> -> vector<2x8x8xf32>
    "tpu.trace_stop"() : () -> ()
    %249 = vector.extract_strided_slice %186 {offsets = [0, 0, 24], sizes = [2, 8, 8], strides = [1, 1, 1]} : vector<2x8x32xf32> to vector<2x8x8xf32>
    %cst_83 = arith.constant 0.353553385 : f32
    %250 = vector.broadcast %cst_83 : f32 to vector<2x8x8xf32>
    %251 = arith.mulf %249, %250 : vector<2x8x8xf32>
    %252 = vector.extract_strided_slice %187 {offsets = [0, 0, 24], sizes = [2, 8, 8], strides = [1, 1, 1]} : vector<2x8x32xf32> to vector<2x8x8xf32>
    "tpu.trace_start"() <{level = 10 : i32, message = "bqd,bkd->bqk"}> : () -> ()
    %cst_84 = arith.constant dense<0.000000e+00> : vector<2x8x8xf32>
    %253 = tpu.matmul %251, %252, %cst_84 {dimension_numbers = #tpu.dot_dimension_numbers<[2], [2], [1], [1], [0, 0, 0, 1, 1, 1], [0], [0]>} : vector<2x8x8xf32>, vector<2x8x8xf32>, vector<2x8x8xf32> -> vector<2x8x8xf32>
    "tpu.trace_stop"() : () -> ()
    %254 = vector.shape_cast %5 : vector<8x8xf32> to vector<1x8x8xf32>
    %255 = vector.broadcast %254 : vector<1x8x8xf32> to vector<2x8x8xf32>
    %256 = arith.addf %253, %255 : vector<2x8x8xf32>
    %cst_85 = arith.constant dense<0xFF800000> : vector<2x8xf32>
    %257 = vector.multi_reduction <maximumf>, %256, %cst_85 [2] : vector<2x8x8xf32> to vector<2x8xf32>
    %258 = vector.shape_cast %257 : vector<2x8xf32> to vector<2x8x1xf32>
    %259 = vector.broadcast %258 : vector<2x8x1xf32> to vector<2x8x8xf32>
    %260 = arith.subf %256, %259 : vector<2x8x8xf32>
    %261 = math.exp %260 : vector<2x8x8xf32>
    %cst_86 = arith.constant dense<0.000000e+00> : vector<2x8xf32>
    %262 = vector.multi_reduction <add>, %261, %cst_86 [2] : vector<2x8x8xf32> to vector<2x8xf32>
    %263 = vector.shape_cast %262 : vector<2x8xf32> to vector<2x8x1xf32>
    %264 = tpu.reciprocal %263 {approx = true} : vector<2x8x1xf32> -> vector<2x8x1xf32>
    %265 = vector.broadcast %264 : vector<2x8x1xf32> to vector<2x8x8xf32>
    %266 = arith.mulf %261, %265 : vector<2x8x8xf32>
    %267 = vector.extract_strided_slice %188 {offsets = [0, 0, 24], sizes = [2, 8, 8], strides = [1, 1, 1]} : vector<2x8x32xf32> to vector<2x8x8xf32>
    "tpu.trace_start"() <{level = 10 : i32, message = "bqk,bkd->bqd"}> : () -> ()
    %cst_87 = arith.constant dense<0.000000e+00> : vector<2x8x8xf32>
    %268 = tpu.matmul %266, %267, %cst_87 {dimension_numbers = #tpu.dot_dimension_numbers<[2], [1], [1], [2], [0, 0, 0, 1, 1, 2], [0], [0]>} : vector<2x8x8xf32>, vector<2x8x8xf32>, vector<2x8x8xf32> -> vector<2x8x8xf32>
    "tpu.trace_stop"() : () -> ()
    %269 = tpu.concatenate %208, %228, %248, %268 in 2 : vector<2x8x8xf32>, vector<2x8x8xf32>, vector<2x8x8xf32>, vector<2x8x8xf32> -> vector<2x8x32xf32>
    %270 = vector.shape_cast %269 : vector<2x8x32xf32> to vector<16x32xf32>
    %cst_88 = arith.constant dense<0.000000e+00> : vector<16x32xf32>
    %271 = tpu.matmul %270, %184, %cst_88 {dimension_numbers = #tpu.dot_dimension_numbers<[1], [0], [0], [1], [0, 0, 1, 1], [], []>} : vector<16x32xf32>, vector<32x32xf32>, vector<16x32xf32> -> vector<16x32xf32>
    %272 = vector.broadcast %185 : vector<1x32xf32> to vector<16x32xf32>
    %273 = arith.addf %271, %272 : vector<16x32xf32>
    %c10 = arith.constant 10 : index
    %c0_89 = arith.constant 0 : index
    %274 = vector.load %arg6[%c10, %c0_89] : memref<22x128xf32, #tpu.memory_space<vmem>>, vector<1x32xf32>
    %c11 = arith.constant 11 : index
    %c0_90 = arith.constant 0 : index
    %275 = vector.load %arg6[%c11, %c0_90] : memref<22x128xf32, #tpu.memory_space<vmem>>, vector<1x32xf32>
    %276 = arith.addf %273, %175 : vector<16x32xf32>
    %cst_91 = arith.constant dense<0.000000e+00> : vector<16xf32>
    %277 = vector.multi_reduction <add>, %276, %cst_91 [1] : vector<16x32xf32> to vector<16xf32>
    %278 = vector.shape_cast %277 : vector<16xf32> to vector<16x1xf32>
    %cst_92 = arith.constant 3.200000e+01 : f32
    %279 = vector.broadcast %cst_92 : f32 to vector<16x1xf32>
    %280 = arith.divf %278, %279 : vector<16x1xf32>
    %281 = vector.broadcast %280 : vector<16x1xf32> to vector<16x32xf32>
    %282 = arith.subf %276, %281 : vector<16x32xf32>
    %283 = vector.broadcast %280 : vector<16x1xf32> to vector<16x32xf32>
    %284 = arith.subf %276, %283 : vector<16x32xf32>
    %285 = arith.mulf %282, %284 : vector<16x32xf32>
    %cst_93 = arith.constant dense<0.000000e+00> : vector<16xf32>
    %286 = vector.multi_reduction <add>, %285, %cst_93 [1] : vector<16x32xf32> to vector<16xf32>
    %287 = vector.shape_cast %286 : vector<16xf32> to vector<16x1xf32>
    %cst_94 = arith.constant 3.200000e+01 : f32
    %288 = vector.broadcast %cst_94 : f32 to vector<16x1xf32>
    %289 = arith.divf %287, %288 : vector<16x1xf32>
    %290 = vector.broadcast %280 : vector<16x1xf32> to vector<16x32xf32>
    %291 = arith.subf %276, %290 : vector<16x32xf32>
    %cst_95 = arith.constant 9.99999974E-6 : f32
    %292 = vector.broadcast %cst_95 : f32 to vector<16x1xf32>
    %293 = arith.addf %289, %292 : vector<16x1xf32>
    %294 = math.rsqrt %293 : vector<16x1xf32>
    %295 = vector.broadcast %294 : vector<16x1xf32> to vector<16x32xf32>
    %296 = arith.mulf %291, %295 : vector<16x32xf32>
    %297 = vector.broadcast %274 : vector<1x32xf32> to vector<16x32xf32>
    %298 = arith.mulf %296, %297 : vector<16x32xf32>
    %299 = vector.broadcast %275 : vector<1x32xf32> to vector<16x32xf32>
    %300 = arith.addf %298, %299 : vector<16x32xf32>
    %c0_96 = arith.constant 0 : index
    %c640 = arith.constant 640 : index
    %301 = vector.load %arg4[%c0_96, %c640] : memref<32x1280xf32, #tpu.memory_space<vmem>>, vector<32x32xf32>
    %c12 = arith.constant 12 : index
    %c0_97 = arith.constant 0 : index
    %302 = vector.load %arg6[%c12, %c0_97] : memref<22x128xf32, #tpu.memory_space<vmem>>, vector<1x32xf32>
    %cst_98 = arith.constant dense<0.000000e+00> : vector<16x32xf32>
    %303 = tpu.matmul %300, %301, %cst_98 {dimension_numbers = #tpu.dot_dimension_numbers<[1], [0], [0], [1], [0, 0, 1, 1], [], []>} : vector<16x32xf32>, vector<32x32xf32>, vector<16x32xf32> -> vector<16x32xf32>
    %304 = vector.broadcast %302 : vector<1x32xf32> to vector<16x32xf32>
    %305 = arith.addf %303, %304 : vector<16x32xf32>
    %c0_99 = arith.constant 0 : index
    %c768 = arith.constant 768 : index
    %306 = vector.load %arg4[%c0_99, %c768] : memref<32x1280xf32, #tpu.memory_space<vmem>>, vector<32x64xf32>
    %c13 = arith.constant 13 : index
    %c0_100 = arith.constant 0 : index
    %307 = vector.load %arg6[%c13, %c0_100] : memref<22x128xf32, #tpu.memory_space<vmem>>, vector<1x64xf32>
    %cst_101 = arith.constant dense<0.000000e+00> : vector<32x64xf32>
    %308 = tpu.matmul %166, %306, %cst_101 {dimension_numbers = #tpu.dot_dimension_numbers<[1], [0], [0], [1], [0, 0, 1, 1], [], []>} : vector<32x32xf32>, vector<32x64xf32>, vector<32x64xf32> -> vector<32x64xf32>
    %309 = vector.broadcast %307 : vector<1x64xf32> to vector<32x64xf32>
    %310 = arith.addf %308, %309 : vector<32x64xf32>
    %311 = vector.extract_strided_slice %310 {offsets = [0, 0], sizes = [32, 32], strides = [1, 1]} : vector<32x64xf32> to vector<32x32xf32>
    %312 = vector.extract_strided_slice %310 {offsets = [0, 32], sizes = [32, 32], strides = [1, 1]} : vector<32x64xf32> to vector<32x32xf32>
    %c0_102 = arith.constant 0 : index
    %c896 = arith.constant 896 : index
    %313 = vector.load %arg4[%c0_102, %c896] : memref<32x1280xf32, #tpu.memory_space<vmem>>, vector<32x32xf32>
    %c14 = arith.constant 14 : index
    %c0_103 = arith.constant 0 : index
    %314 = vector.load %arg6[%c14, %c0_103] : memref<22x128xf32, #tpu.memory_space<vmem>>, vector<1x32xf32>
    %315 = vector.shape_cast %305 : vector<16x32xf32> to vector<2x8x32xf32>
    %316 = vector.shape_cast %311 : vector<32x32xf32> to vector<2x16x32xf32>
    %317 = vector.shape_cast %312 : vector<32x32xf32> to vector<2x16x32xf32>
    %318 = vector.extract_strided_slice %315 {offsets = [0, 0, 0], sizes = [2, 8, 8], strides = [1, 1, 1]} : vector<2x8x32xf32> to vector<2x8x8xf32>
    %cst_104 = arith.constant 0.353553385 : f32
    %319 = vector.broadcast %cst_104 : f32 to vector<2x8x8xf32>
    %320 = arith.mulf %318, %319 : vector<2x8x8xf32>
    %321 = vector.extract_strided_slice %316 {offsets = [0, 0, 0], sizes = [2, 16, 8], strides = [1, 1, 1]} : vector<2x16x32xf32> to vector<2x16x8xf32>
    "tpu.trace_start"() <{level = 10 : i32, message = "bqd,bkd->bqk"}> : () -> ()
    %cst_105 = arith.constant dense<0.000000e+00> : vector<2x8x16xf32>
    %322 = tpu.matmul %320, %321, %cst_105 {dimension_numbers = #tpu.dot_dimension_numbers<[2], [2], [1], [1], [0, 0, 0, 1, 1, 1], [0], [0]>} : vector<2x8x8xf32>, vector<2x16x8xf32>, vector<2x8x16xf32> -> vector<2x8x16xf32>
    "tpu.trace_stop"() : () -> ()
    %cst_106 = arith.constant dense<0xFF800000> : vector<2x8xf32>
    %323 = vector.multi_reduction <maximumf>, %322, %cst_106 [2] : vector<2x8x16xf32> to vector<2x8xf32>
    %324 = vector.shape_cast %323 : vector<2x8xf32> to vector<2x8x1xf32>
    %325 = vector.broadcast %324 : vector<2x8x1xf32> to vector<2x8x16xf32>
    %326 = arith.subf %322, %325 : vector<2x8x16xf32>
    %327 = math.exp %326 : vector<2x8x16xf32>
    %cst_107 = arith.constant dense<0.000000e+00> : vector<2x8xf32>
    %328 = vector.multi_reduction <add>, %327, %cst_107 [2] : vector<2x8x16xf32> to vector<2x8xf32>
    %329 = vector.shape_cast %328 : vector<2x8xf32> to vector<2x8x1xf32>
    %330 = tpu.reciprocal %329 {approx = true} : vector<2x8x1xf32> -> vector<2x8x1xf32>
    %331 = vector.broadcast %330 : vector<2x8x1xf32> to vector<2x8x16xf32>
    %332 = arith.mulf %327, %331 : vector<2x8x16xf32>
    %333 = vector.extract_strided_slice %317 {offsets = [0, 0, 0], sizes = [2, 16, 8], strides = [1, 1, 1]} : vector<2x16x32xf32> to vector<2x16x8xf32>
    "tpu.trace_start"() <{level = 10 : i32, message = "bqk,bkd->bqd"}> : () -> ()
    %cst_108 = arith.constant dense<0.000000e+00> : vector<2x8x8xf32>
    %334 = tpu.matmul %332, %333, %cst_108 {dimension_numbers = #tpu.dot_dimension_numbers<[2], [1], [1], [2], [0, 0, 0, 1, 1, 2], [0], [0]>} : vector<2x8x16xf32>, vector<2x16x8xf32>, vector<2x8x8xf32> -> vector<2x8x8xf32>
    "tpu.trace_stop"() : () -> ()
    %335 = vector.extract_strided_slice %315 {offsets = [0, 0, 8], sizes = [2, 8, 8], strides = [1, 1, 1]} : vector<2x8x32xf32> to vector<2x8x8xf32>
    %cst_109 = arith.constant 0.353553385 : f32
    %336 = vector.broadcast %cst_109 : f32 to vector<2x8x8xf32>
    %337 = arith.mulf %335, %336 : vector<2x8x8xf32>
    %338 = vector.extract_strided_slice %316 {offsets = [0, 0, 8], sizes = [2, 16, 8], strides = [1, 1, 1]} : vector<2x16x32xf32> to vector<2x16x8xf32>
    "tpu.trace_start"() <{level = 10 : i32, message = "bqd,bkd->bqk"}> : () -> ()
    %cst_110 = arith.constant dense<0.000000e+00> : vector<2x8x16xf32>
    %339 = tpu.matmul %337, %338, %cst_110 {dimension_numbers = #tpu.dot_dimension_numbers<[2], [2], [1], [1], [0, 0, 0, 1, 1, 1], [0], [0]>} : vector<2x8x8xf32>, vector<2x16x8xf32>, vector<2x8x16xf32> -> vector<2x8x16xf32>
    "tpu.trace_stop"() : () -> ()
    %cst_111 = arith.constant dense<0xFF800000> : vector<2x8xf32>
    %340 = vector.multi_reduction <maximumf>, %339, %cst_111 [2] : vector<2x8x16xf32> to vector<2x8xf32>
    %341 = vector.shape_cast %340 : vector<2x8xf32> to vector<2x8x1xf32>
    %342 = vector.broadcast %341 : vector<2x8x1xf32> to vector<2x8x16xf32>
    %343 = arith.subf %339, %342 : vector<2x8x16xf32>
    %344 = math.exp %343 : vector<2x8x16xf32>
    %cst_112 = arith.constant dense<0.000000e+00> : vector<2x8xf32>
    %345 = vector.multi_reduction <add>, %344, %cst_112 [2] : vector<2x8x16xf32> to vector<2x8xf32>
    %346 = vector.shape_cast %345 : vector<2x8xf32> to vector<2x8x1xf32>
    %347 = tpu.reciprocal %346 {approx = true} : vector<2x8x1xf32> -> vector<2x8x1xf32>
    %348 = vector.broadcast %347 : vector<2x8x1xf32> to vector<2x8x16xf32>
    %349 = arith.mulf %344, %348 : vector<2x8x16xf32>
    %350 = vector.extract_strided_slice %317 {offsets = [0, 0, 8], sizes = [2, 16, 8], strides = [1, 1, 1]} : vector<2x16x32xf32> to vector<2x16x8xf32>
    "tpu.trace_start"() <{level = 10 : i32, message = "bqk,bkd->bqd"}> : () -> ()
    %cst_113 = arith.constant dense<0.000000e+00> : vector<2x8x8xf32>
    %351 = tpu.matmul %349, %350, %cst_113 {dimension_numbers = #tpu.dot_dimension_numbers<[2], [1], [1], [2], [0, 0, 0, 1, 1, 2], [0], [0]>} : vector<2x8x16xf32>, vector<2x16x8xf32>, vector<2x8x8xf32> -> vector<2x8x8xf32>
    "tpu.trace_stop"() : () -> ()
    %352 = vector.extract_strided_slice %315 {offsets = [0, 0, 16], sizes = [2, 8, 8], strides = [1, 1, 1]} : vector<2x8x32xf32> to vector<2x8x8xf32>
    %cst_114 = arith.constant 0.353553385 : f32
    %353 = vector.broadcast %cst_114 : f32 to vector<2x8x8xf32>
    %354 = arith.mulf %352, %353 : vector<2x8x8xf32>
    %355 = vector.extract_strided_slice %316 {offsets = [0, 0, 16], sizes = [2, 16, 8], strides = [1, 1, 1]} : vector<2x16x32xf32> to vector<2x16x8xf32>
    "tpu.trace_start"() <{level = 10 : i32, message = "bqd,bkd->bqk"}> : () -> ()
    %cst_115 = arith.constant dense<0.000000e+00> : vector<2x8x16xf32>
    %356 = tpu.matmul %354, %355, %cst_115 {dimension_numbers = #tpu.dot_dimension_numbers<[2], [2], [1], [1], [0, 0, 0, 1, 1, 1], [0], [0]>} : vector<2x8x8xf32>, vector<2x16x8xf32>, vector<2x8x16xf32> -> vector<2x8x16xf32>
    "tpu.trace_stop"() : () -> ()
    %cst_116 = arith.constant dense<0xFF800000> : vector<2x8xf32>
    %357 = vector.multi_reduction <maximumf>, %356, %cst_116 [2] : vector<2x8x16xf32> to vector<2x8xf32>
    %358 = vector.shape_cast %357 : vector<2x8xf32> to vector<2x8x1xf32>
    %359 = vector.broadcast %358 : vector<2x8x1xf32> to vector<2x8x16xf32>
    %360 = arith.subf %356, %359 : vector<2x8x16xf32>
    %361 = math.exp %360 : vector<2x8x16xf32>
    %cst_117 = arith.constant dense<0.000000e+00> : vector<2x8xf32>
    %362 = vector.multi_reduction <add>, %361, %cst_117 [2] : vector<2x8x16xf32> to vector<2x8xf32>
    %363 = vector.shape_cast %362 : vector<2x8xf32> to vector<2x8x1xf32>
    %364 = tpu.reciprocal %363 {approx = true} : vector<2x8x1xf32> -> vector<2x8x1xf32>
    %365 = vector.broadcast %364 : vector<2x8x1xf32> to vector<2x8x16xf32>
    %366 = arith.mulf %361, %365 : vector<2x8x16xf32>
    %367 = vector.extract_strided_slice %317 {offsets = [0, 0, 16], sizes = [2, 16, 8], strides = [1, 1, 1]} : vector<2x16x32xf32> to vector<2x16x8xf32>
    "tpu.trace_start"() <{level = 10 : i32, message = "bqk,bkd->bqd"}> : () -> ()
    %cst_118 = arith.constant dense<0.000000e+00> : vector<2x8x8xf32>
    %368 = tpu.matmul %366, %367, %cst_118 {dimension_numbers = #tpu.dot_dimension_numbers<[2], [1], [1], [2], [0, 0, 0, 1, 1, 2], [0], [0]>} : vector<2x8x16xf32>, vector<2x16x8xf32>, vector<2x8x8xf32> -> vector<2x8x8xf32>
    "tpu.trace_stop"() : () -> ()
    %369 = vector.extract_strided_slice %315 {offsets = [0, 0, 24], sizes = [2, 8, 8], strides = [1, 1, 1]} : vector<2x8x32xf32> to vector<2x8x8xf32>
    %cst_119 = arith.constant 0.353553385 : f32
    %370 = vector.broadcast %cst_119 : f32 to vector<2x8x8xf32>
    %371 = arith.mulf %369, %370 : vector<2x8x8xf32>
    %372 = vector.extract_strided_slice %316 {offsets = [0, 0, 24], sizes = [2, 16, 8], strides = [1, 1, 1]} : vector<2x16x32xf32> to vector<2x16x8xf32>
    "tpu.trace_start"() <{level = 10 : i32, message = "bqd,bkd->bqk"}> : () -> ()
    %cst_120 = arith.constant dense<0.000000e+00> : vector<2x8x16xf32>
    %373 = tpu.matmul %371, %372, %cst_120 {dimension_numbers = #tpu.dot_dimension_numbers<[2], [2], [1], [1], [0, 0, 0, 1, 1, 1], [0], [0]>} : vector<2x8x8xf32>, vector<2x16x8xf32>, vector<2x8x16xf32> -> vector<2x8x16xf32>
    "tpu.trace_stop"() : () -> ()
    %cst_121 = arith.constant dense<0xFF800000> : vector<2x8xf32>
    %374 = vector.multi_reduction <maximumf>, %373, %cst_121 [2] : vector<2x8x16xf32> to vector<2x8xf32>
    %375 = vector.shape_cast %374 : vector<2x8xf32> to vector<2x8x1xf32>
    %376 = vector.broadcast %375 : vector<2x8x1xf32> to vector<2x8x16xf32>
    %377 = arith.subf %373, %376 : vector<2x8x16xf32>
    %378 = math.exp %377 : vector<2x8x16xf32>
    %cst_122 = arith.constant dense<0.000000e+00> : vector<2x8xf32>
    %379 = vector.multi_reduction <add>, %378, %cst_122 [2] : vector<2x8x16xf32> to vector<2x8xf32>
    %380 = vector.shape_cast %379 : vector<2x8xf32> to vector<2x8x1xf32>
    %381 = tpu.reciprocal %380 {approx = true} : vector<2x8x1xf32> -> vector<2x8x1xf32>
    %382 = vector.broadcast %381 : vector<2x8x1xf32> to vector<2x8x16xf32>
    %383 = arith.mulf %378, %382 : vector<2x8x16xf32>
    %384 = vector.extract_strided_slice %317 {offsets = [0, 0, 24], sizes = [2, 16, 8], strides = [1, 1, 1]} : vector<2x16x32xf32> to vector<2x16x8xf32>
    "tpu.trace_start"() <{level = 10 : i32, message = "bqk,bkd->bqd"}> : () -> ()
    %cst_123 = arith.constant dense<0.000000e+00> : vector<2x8x8xf32>
    %385 = tpu.matmul %383, %384, %cst_123 {dimension_numbers = #tpu.dot_dimension_numbers<[2], [1], [1], [2], [0, 0, 0, 1, 1, 2], [0], [0]>} : vector<2x8x16xf32>, vector<2x16x8xf32>, vector<2x8x8xf32> -> vector<2x8x8xf32>
    "tpu.trace_stop"() : () -> ()
    %386 = tpu.concatenate %334, %351, %368, %385 in 2 : vector<2x8x8xf32>, vector<2x8x8xf32>, vector<2x8x8xf32>, vector<2x8x8xf32> -> vector<2x8x32xf32>
    %387 = vector.shape_cast %386 : vector<2x8x32xf32> to vector<16x32xf32>
    %cst_124 = arith.constant dense<0.000000e+00> : vector<16x32xf32>
    %388 = tpu.matmul %387, %313, %cst_124 {dimension_numbers = #tpu.dot_dimension_numbers<[1], [0], [0], [1], [0, 0, 1, 1], [], []>} : vector<16x32xf32>, vector<32x32xf32>, vector<16x32xf32> -> vector<16x32xf32>
    %389 = vector.broadcast %314 : vector<1x32xf32> to vector<16x32xf32>
    %390 = arith.addf %388, %389 : vector<16x32xf32>
    %c15 = arith.constant 15 : index
    %c0_125 = arith.constant 0 : index
    %391 = vector.load %arg6[%c15, %c0_125] : memref<22x128xf32, #tpu.memory_space<vmem>>, vector<1x32xf32>
    %c16_126 = arith.constant 16 : index
    %c0_127 = arith.constant 0 : index
    %392 = vector.load %arg6[%c16_126, %c0_127] : memref<22x128xf32, #tpu.memory_space<vmem>>, vector<1x32xf32>
    %393 = arith.addf %390, %300 : vector<16x32xf32>
    %cst_128 = arith.constant dense<0.000000e+00> : vector<16xf32>
    %394 = vector.multi_reduction <add>, %393, %cst_128 [1] : vector<16x32xf32> to vector<16xf32>
    %395 = vector.shape_cast %394 : vector<16xf32> to vector<16x1xf32>
    %cst_129 = arith.constant 3.200000e+01 : f32
    %396 = vector.broadcast %cst_129 : f32 to vector<16x1xf32>
    %397 = arith.divf %395, %396 : vector<16x1xf32>
    %398 = vector.broadcast %397 : vector<16x1xf32> to vector<16x32xf32>
    %399 = arith.subf %393, %398 : vector<16x32xf32>
    %400 = vector.broadcast %397 : vector<16x1xf32> to vector<16x32xf32>
    %401 = arith.subf %393, %400 : vector<16x32xf32>
    %402 = arith.mulf %399, %401 : vector<16x32xf32>
    %cst_130 = arith.constant dense<0.000000e+00> : vector<16xf32>
    %403 = vector.multi_reduction <add>, %402, %cst_130 [1] : vector<16x32xf32> to vector<16xf32>
    %404 = vector.shape_cast %403 : vector<16xf32> to vector<16x1xf32>
    %cst_131 = arith.constant 3.200000e+01 : f32
    %405 = vector.broadcast %cst_131 : f32 to vector<16x1xf32>
    %406 = arith.divf %404, %405 : vector<16x1xf32>
    %407 = vector.broadcast %397 : vector<16x1xf32> to vector<16x32xf32>
    %408 = arith.subf %393, %407 : vector<16x32xf32>
    %cst_132 = arith.constant 9.99999974E-6 : f32
    %409 = vector.broadcast %cst_132 : f32 to vector<16x1xf32>
    %410 = arith.addf %406, %409 : vector<16x1xf32>
    %411 = math.rsqrt %410 : vector<16x1xf32>
    %412 = vector.broadcast %411 : vector<16x1xf32> to vector<16x32xf32>
    %413 = arith.mulf %408, %412 : vector<16x32xf32>
    %414 = vector.broadcast %391 : vector<1x32xf32> to vector<16x32xf32>
    %415 = arith.mulf %413, %414 : vector<16x32xf32>
    %416 = vector.broadcast %392 : vector<1x32xf32> to vector<16x32xf32>
    %417 = arith.addf %415, %416 : vector<16x32xf32>
    %c0_133 = arith.constant 0 : index
    %c1024 = arith.constant 1024 : index
    %418 = vector.load %arg4[%c0_133, %c1024] : memref<32x1280xf32, #tpu.memory_space<vmem>>, vector<32x64xf32>
    %c17 = arith.constant 17 : index
    %c0_134 = arith.constant 0 : index
    %419 = vector.load %arg6[%c17, %c0_134] : memref<22x128xf32, #tpu.memory_space<vmem>>, vector<1x64xf32>
    %cst_135 = arith.constant dense<0.000000e+00> : vector<16x64xf32>
    %420 = tpu.matmul %417, %418, %cst_135 {dimension_numbers = #tpu.dot_dimension_numbers<[1], [0], [0], [1], [0, 0, 1, 1], [], []>} : vector<16x32xf32>, vector<32x64xf32>, vector<16x64xf32> -> vector<16x64xf32>
    %421 = vector.broadcast %419 : vector<1x64xf32> to vector<16x64xf32>
    %422 = arith.addf %420, %421 : vector<16x64xf32>
    %cst_136 = arith.constant 0.000000e+00 : f32
    %423 = vector.broadcast %cst_136 : f32 to vector<16x64xf32>
    %424 = arith.maximumf %422, %423 : vector<16x64xf32>
    %c0_137 = arith.constant 0 : index
    %c128_138 = arith.constant 128 : index
    %425 = vector.load %arg5[%c0_137, %c128_138] : memref<64x256xf32, #tpu.memory_space<vmem>>, vector<64x32xf32>
    %c18 = arith.constant 18 : index
    %c0_139 = arith.constant 0 : index
    %426 = vector.load %arg6[%c18, %c0_139] : memref<22x128xf32, #tpu.memory_space<vmem>>, vector<1x32xf32>
    %cst_140 = arith.constant dense<0.000000e+00> : vector<16x32xf32>
    %427 = tpu.matmul %424, %425, %cst_140 {dimension_numbers = #tpu.dot_dimension_numbers<[1], [0], [0], [1], [0, 0, 1, 1], [], []>} : vector<16x64xf32>, vector<64x32xf32>, vector<16x32xf32> -> vector<16x32xf32>
    %428 = vector.broadcast %426 : vector<1x32xf32> to vector<16x32xf32>
    %429 = arith.addf %427, %428 : vector<16x32xf32>
    %c19 = arith.constant 19 : index
    %c0_141 = arith.constant 0 : index
    %430 = vector.load %arg6[%c19, %c0_141] : memref<22x128xf32, #tpu.memory_space<vmem>>, vector<1x32xf32>
    %c20 = arith.constant 20 : index
    %c0_142 = arith.constant 0 : index
    %431 = vector.load %arg6[%c20, %c0_142] : memref<22x128xf32, #tpu.memory_space<vmem>>, vector<1x32xf32>
    %432 = arith.addf %429, %417 : vector<16x32xf32>
    %cst_143 = arith.constant dense<0.000000e+00> : vector<16xf32>
    %433 = vector.multi_reduction <add>, %432, %cst_143 [1] : vector<16x32xf32> to vector<16xf32>
    %434 = vector.shape_cast %433 : vector<16xf32> to vector<16x1xf32>
    %cst_144 = arith.constant 3.200000e+01 : f32
    %435 = vector.broadcast %cst_144 : f32 to vector<16x1xf32>
    %436 = arith.divf %434, %435 : vector<16x1xf32>
    %437 = vector.broadcast %436 : vector<16x1xf32> to vector<16x32xf32>
    %438 = arith.subf %432, %437 : vector<16x32xf32>
    %439 = vector.broadcast %436 : vector<16x1xf32> to vector<16x32xf32>
    %440 = arith.subf %432, %439 : vector<16x32xf32>
    %441 = arith.mulf %438, %440 : vector<16x32xf32>
    %cst_145 = arith.constant dense<0.000000e+00> : vector<16xf32>
    %442 = vector.multi_reduction <add>, %441, %cst_145 [1] : vector<16x32xf32> to vector<16xf32>
    %443 = vector.shape_cast %442 : vector<16xf32> to vector<16x1xf32>
    %cst_146 = arith.constant 3.200000e+01 : f32
    %444 = vector.broadcast %cst_146 : f32 to vector<16x1xf32>
    %445 = arith.divf %443, %444 : vector<16x1xf32>
    %446 = vector.broadcast %436 : vector<16x1xf32> to vector<16x32xf32>
    %447 = arith.subf %432, %446 : vector<16x32xf32>
    %cst_147 = arith.constant 9.99999974E-6 : f32
    %448 = vector.broadcast %cst_147 : f32 to vector<16x1xf32>
    %449 = arith.addf %445, %448 : vector<16x1xf32>
    %450 = math.rsqrt %449 : vector<16x1xf32>
    %451 = vector.broadcast %450 : vector<16x1xf32> to vector<16x32xf32>
    %452 = arith.mulf %447, %451 : vector<16x32xf32>
    %453 = vector.broadcast %430 : vector<1x32xf32> to vector<16x32xf32>
    %454 = arith.mulf %452, %453 : vector<16x32xf32>
    %455 = vector.broadcast %431 : vector<1x32xf32> to vector<16x32xf32>
    %456 = arith.addf %454, %455 : vector<16x32xf32>
    %c0_148 = arith.constant 0 : index
    %c1152 = arith.constant 1152 : index
    %457 = vector.load %arg4[%c0_148, %c1152] : memref<32x1280xf32, #tpu.memory_space<vmem>>, vector<32x1xf32>
    %cst_149 = arith.constant dense<0.000000e+00> : vector<16x1xf32>
    %458 = tpu.matmul %456, %457, %cst_149 {dimension_numbers = #tpu.dot_dimension_numbers<[1], [0], [0], [1], [0, 0, 1, 1], [], []>} : vector<16x32xf32>, vector<32x1xf32>, vector<16x1xf32> -> vector<16x1xf32>
    %c21 = arith.constant 21 : index
    %c0_150 = arith.constant 0 : index
    %459 = vector.load %arg6[%c21, %c0_150] : memref<22x128xf32, #tpu.memory_space<vmem>>, vector<1x1xf32>
    %460 = vector.broadcast %459 : vector<1x1xf32> to vector<16x1xf32>
    %461 = arith.addf %458, %460 : vector<16x1xf32>
    %c0_151 = arith.constant 0 : index
    %c0_152 = arith.constant 0 : index
    %462 = vector.load %arg7[%c0_151, %c0_152] : memref<16x1xf32, #tpu.memory_space<vmem>>, vector<16x1xf32>
    tpu.vector_store %arg7[%c0_151, %c0_152], %461 {strides = array<i32>} : memref<16x1xf32, #tpu.memory_space<vmem>>, vector<16x1xf32>,
    return
  }
}

</mosaic_0001>

<bundles_post_ra>
// kernel: _lambda_.1
= control target key start
LH: loop header
LB: loop body
LE: loop exit
PB: predicated region body
PF: predicated region fallthrough
CT: control target
= control target key end

     0   :  { %12 = vsyncpa [#allocation3], 0  ;;  %s8595_s0 = inlined_call_operand.vmem [shape: f32[32,4], index: 0, kind: input, shape index: {}]   ;;  %s8596_s1 = inlined_call_operand.vmem [shape: f32[16,4], index: 1, kind: input, shape index: {}]   ;;  %s8597_s2 = inlined_call_operand.vmem [shape: f32[24,32], index: 2, kind: input, shape index: {}]   ;;  %s8598_s3 = inlined_call_operand.vmem [shape: f32[4,256], index: 3, kind: input, shape index: {}]   ;;  %s8599_s4 = inlined_call_operand.hbm [shape: f32[32,1280], index: 4, kind: input, shape index: {}]   ;;  %s8600_s5 = inlined_call_operand.hbm [shape: f32[64,256], index: 5, kind: input, shape index: {}]   ;;  %s8601_s6 = inlined_call_operand.vmem [shape: f32[22,128], index: 6, kind: input, shape index: {}]   ;;  %s8602_s7 = inlined_call_operand.vmem [shape: f32[16,1], index: 7, kind: output, shape index: {}]  }
   0x1   :  { %13 = vsyncpa [#allocation5], 0  ;;  %s7657_s24 = smov [#allocation2]   ;;  %s7609_s28 = scalar_lea.hbm %s8599_s4, 5120 }
   0x2   :  { %s27_s25 = sshll.u32 %s7657_s24, 4  ;;  %p7610_p0 = scmp.ne.s32.totalorder %s8599_s4, %s7609_s28  ;;  %s28_s25 = int_to_ptr.vmem [resolvable:$true] %s27_s25 }
   0x3   :  { %p7613_p1 = scmp.lt.u32.totalorder %s7609_s28, %s8599_s4 }
   0x5   :  { %p7615_p2 = pnand %p7613_p1, %p7610_p0 }
   0x7   :  { %7618 = shalt.err (!%p7615_p2)
}
   0x8   :  { %s7619_s10 = scalar_lea.vmem %s28_s25, 5120  ;;  %p7624_p4 = scmp.lt.s32.totalorder %s28_s25, %s28_s25 }
   0x9   :  { %p7620_p3 = scmp.ne.s32.totalorder %s28_s25, %s7619_s10  ;;  %p7625_p5 = scmp.lt.s32.totalorder %s7619_s10, %s7619_s10 }
   0xb   :  { %p7626_p6 = por %p7625_p5, %p7624_p4 }
   0xd   :  { %p7627_p7 = pnand %p7626_p6, %p7620_p3 }
   0xf   :  { %7630 = shalt.err (!%p7627_p7)
}
  0x10   :  { %s7658_s11 = smov 1280   ;;  %s7659_s12 = smov 80  }
  0x11   :  { %33 = dma.hbm_to_vmem [thread:$0]  %s8599_s4, 5120, %s28_s25, [#allocation3], %s7658_s11, %s7658_s11, %s7659_s12  }
  0x12   :  { %s7660_s15 = smov [#allocation4]   ;;  %s7631_s19 = scalar_lea.hbm %s8600_s5, 2048 }
  0x13   :  { %s39_s16 = sshll.u32 %s7660_s15, 4  ;;  %p7632_p8 = scmp.ne.s32.totalorder %s8600_s5, %s7631_s19  ;;  %s40_s16 = int_to_ptr.vmem [resolvable:$true] %s39_s16 }
  0x14   :  { %p7635_p9 = scmp.lt.u32.totalorder %s7631_s19, %s8600_s5 }
  0x16   :  { %p7637_p10 = pnand %p7635_p9, %p7632_p8 }
  0x18   :  { %7640 = shalt.err (!%p7637_p10)
}
  0x19   :  { %s7641_s24 = scalar_lea.vmem %s40_s16, 2048  ;;  %p7646_p12 = scmp.lt.s32.totalorder %s40_s16, %s40_s16 }
  0x1a   :  { %p7642_p11 = scmp.ne.s32.totalorder %s40_s16, %s7641_s24  ;;  %p7647_p13 = scmp.lt.s32.totalorder %s7641_s24, %s7641_s24 }
  0x1c   :  { %p7648_p0 = por %p7647_p13, %p7646_p12 }
  0x1e   :  { %p7649_p1 = pnand %p7648_p0, %p7642_p11 }
  0x20   :  { %7652 = shalt.err (!%p7649_p1)
}
  0x21   :  { %s7661_s4 = smov 256   ;;  %s7662_s25 = smov 16  }
  0x22   :  { %45 = dma.hbm_to_vmem [thread:$0]  %s8600_s5, 2048, %s40_s16, [#allocation5], %s7661_s4, %s7661_s4, %s7662_s25  }
  0x23   :  { %7653 = dma.done.wait [#allocation3], 5120  }
  0x24   :  { %7654 = vsyncadd [#allocation3], 4294962176 }
  0x25   :  { %7655 = dma.done.wait [#allocation5], 2048  }
  0x26   :  { %7656 = vsyncadd [#allocation5], 4294965248  ;;  %vm78_vm0 = vcmask 1043456   ;;  %vm65_vm1 = vcmask 31744   ;;  %v64_v0 = vld [vmem:[%s8598_s3] sm:$0xf] }
  0x27   :  { %v60_v1 = vld [vmem:[%s8595_s0] sm:$0xff]  ;;  %v61_v2 = vld [vmem:[%s8595_s0 + $0x8] sm:$0xff]  ;;  %6554 = vmatprep.subr.msk.mxu1 %vm78_vm0, %v64_v0  ;;  %v62_v3 = vld [vmem:[%s8595_s0 + $0x10] sm:$0xff]  ;;  %vm182_vm2 = vcmask 261120   ;;  %vm295_vm3 = vcmask 64512   ;;  %s7663_s20 = smov 96  }
  0x28   :  { %6556 = vmatprep.mubr.msk.f32.mxu1 %vm65_vm1, %v60_v1  ;;  %v173_v4 = vld [vmem:[#allocation2] sm:$0xff]  ;;  %6555 = vmatpush3.msk.msra.mxu1 %vm78_vm0, %v64_v0  ;;  %v174_v5 = vld [vmem:[#allocation2 + $0x50] sm:$0xff]  ;;  %v63_v7 = vld [vmem:[%s8595_s0 + $0x18] sm:$0xff]  ;;  %vm472_vm5 = vcmask 130048   ;;  %s7664_s21 = smov 64   ;;  %s7665_s22 = smov 88  }
  0x29   :  { %6557 = vmatmul.mubr.msk.f32.vlgmr.msra.gmra.mrb[0].mxu1 %vm65_vm1, %v61_v2  ;;  %v7034_v6 = vpack.c.bf16 %v174_v5, %v173_v4  ;;  %v175_v8 = vld [vmem:[#allocation2 + $0xa0] sm:$0xff]  ;;  %v176_v9 = vld [vmem:[#allocation2 + $0xf0] sm:$0xff]  ;;  %v168_v13 = vld [vmem:[%s8597_s2 + $0x8] sm:$0xff]  ;;  %s7666_s23 = smov 120   ;;  %s7667_s24 = smov 56   ;;  %vm1947_vm6 = vcmask 195584  }
  0x2a   :  { %6559 = vmatprep.mubr.msk.f32.mxu1 %vm65_vm1, %v62_v3  ;;  %v7038_v10 = vpack.c.bf16 %v176_v9, %v175_v8  ;;  %v167_v11 = vld [vmem:[%s8597_s2] sm:$0xff]  ;;  %vm7808_vm4 = vmpackc.low %vm295_vm3, %vm295_vm3  ;;  %s7668_s4 = smov 112   ;;  %s7669_s26 = smov 48   ;;  %vm2251_vm7 = vcmask 523264   ;;  %vm7676_vm8 = vmmov 0   ;;  %vm6135_vm10 = vcmask 7168  }
  0x2b   :  { %7035 = vmatprep.subr.bf16.mxu1 %v7034_v6  ;;  %v6149_v21 = vld [vmem:[%s8601_s6] ss:$0 sm:$0xff]  ;;  %s7670_s27 = smov 72   ;;  %s7671_s28 = smov 104  }
  0x2c   :  { %7037 = vmatpush3.bf16.msra.mxu1 %v7034_v6  ;;  %s7672_s29 = smov 40   ;;  %s7673_s30 = smov 8  }
  0x2d   :  { %6560 = vmatmul.mubr.msk.f32.gmra.mrb[2].mxu1 %vm65_vm1, %v63_v7  ;;  %7039 = vmatprep.subr.bf16.mxu1 %v7038_v10  ;;  %s7674_s8 = smov 24  }
  0x30   :  { %7041 = vmatpush3.bf16.msra.mxu1 %v7038_v10 }
  0xfc   :  { %v6558_v12 = vpop.f32.mrb[0].mxu1 }
  0xfd   :  { %v148_v14 = vpop.f32.mrb[1].mxu1  ;;  %v7773_v16 = vadd.f32 %v6558_v12, %v168_v13 }
  0xfe   :  { %v7771_v15 = vadd.f32 %v167_v11, %v148_v14 }
 0x100   :  { %v6561_v17 = vpop.f32.mrb[2].mxu1  ;;  %6570 = vmatprep.mubr.msk.f32.mxu1 %vm182_vm2, %v7771_v15 }
 0x101   :  { %v7777_v18 = vadd.f32 %v6561_v17, %v168_v13  ;;  %v158_v19 = vpop.f32.mrb[3].mxu1  ;;  %6571 = vmatmul.mubr.msk.f32.vlgmr.msra.gmra.mrb[4].mxu1 %vm182_vm2, %v7773_v16 }
 0x102   :  { %v7781_v20 = vadd.f32 %v167_v11, %v158_v19 }
 0x104   :  { %6573 = vmatprep.mubr.msk.f32.mxu1 %vm182_vm2, %v7781_v20 }
 0x105   :  { %6574 = vmatmul.mubr.msk.f32.gmra.mrb[6].mxu1 %vm182_vm2, %v7777_v18 }
 0x1d4   :  { %v6572_v22 = vpop.f32.mrb[4].mxu1 }
 0x1d5   :  { %v267_v23 = vadd.f32 %v6572_v22, %v6149_v21  ;;  %v261_v24 = vpop.f32.mrb[5].mxu1 }
 0x1d6   :  { %v262_v25 = vadd.f32 %v6149_v21, %v261_v24 }
 0x1d7   :  { %v7820_v43 = vmul.f32 0.35355338, %v267_v23 }
 0x1d8   :  { %v6575_v26 = vpop.f32.mrb[6].mxu1  ;;  %v7790_v27 = vpack.i.bf16 %v267_v23, %v262_v25  ;;  %v7792_v28 = vmul.f32 0.35355338, %v262_v25 }
 0x1d9   :  { %v277_v29 = vadd.f32 %v6575_v26, %v6149_v21  ;;  %v271_v30 = vpop.f32.mrb[7].mxu1 }
 0x1da   :  { %v272_v31 = vadd.f32 %v6149_v21, %v271_v30  ;;  %7304 = vrot.lane.b32.xlu0 %v7790_v27, %s7663_s20  ;;  %6580 = vmatprep.mubr.msk.f32.mxu0 %vm295_vm3, %v7792_v28 }
 0x1db   :  { %v7824_v44 = vmul.f32 0.35355338, %v277_v29 }
 0x1dc   :  { %v7798_v32 = vpack.i.bf16 %v277_v29, %v272_v31  ;;  %v7800_v33 = vmul.f32 0.35355338, %v272_v31 }
 0x1de   :  { %7309 = vrot.lane.b32.xlu0 %v7798_v32, %s7663_s20  ;;  %6587 = vmatprep.mubr.msk.f32.mxu1 %vm295_vm3, %v7800_v33 }
 0x24c   :  { %v7305_v34 = vpop.permute.xlu0 %7304 }
 0x24d   :  { %v7307_v35 = vunpack.i.h.bf16 %v7305_v34  ;;  %v7306_v36 = vunpack.i.l.bf16 %v7305_v34 }
 0x24f   :  { %v7042_v38 = vpack.c.bf16 %v7307_v35, %v7306_v36 }
 0x250   :  { %v7310_v39 = vpop.permute.xlu0 %7309 }
 0x251   :  { %v7312_v40 = vunpack.i.h.bf16 %v7310_v39  ;;  %v7311_v41 = vunpack.i.l.bf16 %v7310_v39  ;;  %7044 = vmatprep.subr.msk.bf16.mxu0 %vm7808_vm4, %v7042_v38 }
 0x252   :  { %7047 = vmatpush3.bf16.xpose.msk.msra.mxu0 %vm7808_vm4, %v7042_v38 }
 0x253   :  { %v7048_v42 = vpack.c.bf16 %v7312_v40, %v7311_v41 }
 0x255   :  { %7050 = vmatprep.subr.msk.bf16.mxu1 %vm7808_vm4, %v7048_v42 }
 0x256   :  { %7053 = vmatpush3.bf16.xpose.msk.msra.mxu1 %vm7808_vm4, %v7048_v42 }
 0x259   :  { %6581 = vmatmul.mubr.msk.f32.vlgmr.msra.gmra.mrb[0].mxu0 %vm295_vm3, %v7820_v43 }
 0x25d   :  { %6588 = vmatmul.mubr.msk.f32.vlgmr.msra.gmra.mrb[8].mxu1 %vm295_vm3, %v7824_v44 }
 0x32c   :  { %v6582_v45 = vpop.f32.mrb[0].mxu0 }
 0x32d   :  { %v372_v46 = vpop.f32.mrb[1].mxu0  ;;  %v476_v50 = vsel %vm472_vm5, %v6582_v45, -inf }
 0x32e   :  { %v473_v47 = vsel %vm472_vm5, %v372_v46, -inf }
 0x32f   :  { %474 = vmax.xlane.f32.xlu1 %v473_v47 }
 0x330   :  { %v6589_v48 = vpop.f32.mrb[8].mxu1 }
 0x331   :  { %v463_v49 = vpop.f32.mrb[9].mxu1  ;;  %v482_v52 = vsel %vm472_vm5, %v6589_v48, -inf }
 0x332   :  { %v479_v51 = vsel %vm472_vm5, %v463_v49, -inf }
 0x333   :  { %477 = vmax.xlane.f32.xlu1 %v476_v50  ;;  %480 = vmax.xlane.f32.xlu0 %v479_v51 }
 0x337   :  { %483 = vmax.xlane.f32.xlu1 %v482_v52 }
 0x348   :  { %7314 = vrot.lane.b32.xlu1 %v7790_v27, %s7664_s21 }
 0x349   :  { %7319 = vrot.lane.b32.xlu0 %v7798_v32, %s7664_s21 }
 0x34c   :  { %7324 = vrot.lane.b32.xlu1 %v7790_v27, %s7665_s22 }
 0x34d   :  { %782 = vrot.lane.b32.xlu0 %v7800_v33, %s7666_s23 }
 0x350   :  { %7329 = vrot.lane.b32.xlu1 %v7798_v32, %s7665_s22 }
 0x354   :  { %691 = vrot.lane.b32.xlu1 %v7792_v28, %s7666_s23 }
 0x358   :  { %693 = vrot.lane.b32.xlu1 %v7820_v43, %s7666_s23 }
 0x3bc   :  { %v475_v53 = vpop.xlane.xlu1 %474 }
 0x3bd   :  { %v485_v54 = vsub.f32 %v372_v46, %v475_v53 }
 0x3bf   :  { %v489_v58 = vmul.f32 1.442695, %v485_v54 }
 0x3c0   :  { %v478_v55 = vpop.xlane.xlu1 %477  ;;  %v481_v56 = vpop.xlane.xlu0 %480 }
 0x3c1   :  { %v486_v57 = vsub.f32 %v6582_v45, %v478_v55  ;;  %v487_v63 = vsub.f32 %v463_v49, %v481_v56 }
 0x3c3   :  { %v491_v59 = vmul.f32 1.442695, %v486_v57  ;;  %v493_v6 = vmul.f32 1.442695, %v487_v63 }
 0x3c4   :  { %v484_v60 = vpop.xlane.xlu1 %483  ;;  %v7320_v62 = vpop.permute.xlu0 %7319 }
 0x3c5   :  { %7453 = vpow2.f32 %v491_v59  ;;  %v488_v61 = vsub.f32 %v6589_v48, %v484_v60  ;;  %v7322_v2 = vunpack.i.h.bf16 %v7320_v62  ;;  %v7321_v3 = vunpack.i.l.bf16 %v7320_v62 }
 0x3c6   :  { %7455 = vpow2.f32 %v489_v58 }
 0x3c7   :  { %v495_v0 = vmul.f32 1.442695, %v488_v61  ;;  %v7058_v11 = vpack.c.bf16 %v7322_v2, %v7321_v3 }
 0x3c8   :  { %v7315_v1 = vpop.permute.xlu1 %7314  ;;  %v783_v50 = vpop.permute.xlu0 %782 }
 0x3c9   :  { %v7317_v4 = vunpack.i.h.bf16 %v7315_v1  ;;  %v7316_v5 = vunpack.i.l.bf16 %v7315_v1  ;;  %7457 = vpow2.f32 %v495_v0 }
 0x3ca   :  { %7459 = vpow2.f32 %v493_v6 }
 0x3cb   :  { %v7054_v7 = vpack.c.bf16 %v7317_v4, %v7316_v5 }
 0x3cc   :  { %v7325_v8 = vpop.permute.xlu1 %7324 }
 0x3cd   :  { %v7327_v9 = vunpack.i.h.bf16 %v7325_v8  ;;  %v7326_v10 = vunpack.i.l.bf16 %v7325_v8  ;;  %7055 = vmatprep.subr.bf16.mxu0 %v7054_v7 }
 0x3ce   :  { %7057 = vmatpush3.bf16.msra.mxu0 %v7054_v7 }
 0x3cf   :  { %v7454_v12 = vpop.eup %7453  ;;  %v7062_v13 = vpack.c.bf16 %v7327_v9, %v7326_v10  ;;  %7059 = vmatprep.subr.bf16.mxu0 %v7058_v11 }
 0x3d0   :  { %v7330_v14 = vpop.permute.xlu1 %7329  ;;  %v500_v17 = vsel %vm472_vm5, %v7454_v12, 0.0  ;;  %v7456_v19 = vpop.eup %7455 }
 0x3d1   :  { %501 = vadd.xlane.f32.xlu1 %v500_v17  ;;  %7064 = vmatprep.subr.msk.bf16.mxu1 %vm7808_vm4, %v7062_v13  ;;  %v497_v22 = vsel %vm472_vm5, %v7456_v19, 0.0  ;;  %v7332_v39 = vunpack.i.h.bf16 %v7330_v14  ;;  %v7331_v40 = vunpack.i.l.bf16 %v7330_v14 }
 0x3d2   :  { %7067 = vmatpush3.bf16.xpose.msk.msra.mxu1 %vm7808_vm4, %v7062_v13 }
 0x3d3   :  { %v7458_v23 = vpop.eup %7457  ;;  %v7068_v45 = vpack.c.bf16 %v7332_v39, %v7331_v40 }
 0x3d4   :  { %v692_v21 = vpop.permute.xlu1 %691  ;;  %v506_v25 = vsel %vm472_vm5, %v7458_v23, 0.0  ;;  %v7460_v26 = vpop.eup %7459 }
 0x3d5   :  { %498 = vadd.xlane.f32.xlu1 %v497_v22  ;;  %6608 = vmatprep.mubr.msk.f32.mxu1 %vm295_vm3, %v692_v21  ;;  %v503_v29 = vsel %vm472_vm5, %v7460_v26, 0.0 }
 0x3d8   :  { %v694_v24 = vpop.permute.xlu1 %693 }
 0x3d9   :  { %507 = vadd.xlane.f32.xlu1 %v506_v25  ;;  %6609 = vmatmul.mubr.msk.f32.vlgmr.msra.gmra.mrb[10].mxu1 %vm295_vm3, %v694_v24 }
 0x3dd   :  { %504 = vadd.xlane.f32.xlu1 %v503_v29 }
 0x3ee   :  { %784 = vrot.lane.b32.xlu1 %v7824_v44, %s7666_s23 }
 0x45e   :  { %v502_v30 = vpop.xlane.xlu1 %501 }
 0x45f   :  { %7461 = vrcp.f32 %v502_v30 }
 0x462   :  { %v499_v31 = vpop.xlane.xlu1 %498 }
 0x463   :  { %7463 = vrcp.f32 %v499_v31 }
 0x466   :  { %v508_v34 = vpop.xlane.xlu1 %507 }
 0x467   :  { %7465 = vrcp.f32 %v508_v34 }
 0x469   :  { %v7462_v36 = vpop.eup %7461 }
 0x46a   :  { %v505_v35 = vpop.xlane.xlu1 %504  ;;  %v514_v42 = vmul.f32 %v7462_v36, %v7454_v12 }
 0x46b   :  { %7467 = vrcp.f32 %v505_v35 }
 0x46d   :  { %v7464_v38 = vpop.eup %7463 }
 0x46e   :  { %v513_v41 = vmul.f32 %v7464_v38, %v7456_v19  ;;  %v785_v51 = vpop.permute.xlu1 %784 }
 0x470   :  { %6594 = vmatprep.mubr.msk.f32.mxu0 %vm472_vm5, %v513_v41 }
 0x471   :  { %6595 = vmatmul.mubr.msk.f32.vlgmr.msra.gmra.mrb[2].mxu0 %vm472_vm5, %v514_v42  ;;  %v7466_v46 = vpop.eup %7465 }
 0x472   :  { %7061 = vmatpush3.bf16.msra.mxu0 %v7058_v11  ;;  %v516_v49 = vmul.f32 %v7466_v46, %v7458_v23 }
 0x473   :  { %7070 = vmatprep.subr.msk.bf16.mxu0 %vm7808_vm4, %v7068_v45 }
 0x475   :  { %v7468_v47 = vpop.eup %7467 }
 0x476   :  { %v515_v48 = vmul.f32 %v7468_v47, %v7460_v26 }
 0x478   :  { %6601 = vmatprep.mubr.msk.f32.mxu0 %vm472_vm5, %v515_v48 }
 0x479   :  { %6602 = vmatmul.mubr.msk.f32.vlgmr.msra.gmra.mrb[4].mxu0 %vm472_vm5, %v516_v49 }
 0x47a   :  { %6615 = vmatprep.mubr.msk.f32.mxu0 %vm295_vm3, %v783_v50 }
 0x47b   :  { %7073 = vmatpush3.bf16.xpose.msk.msra.mxu0 %vm7808_vm4, %v7068_v45 }
 0x482   :  { %6616 = vmatmul.mubr.msk.f32.vlgmr.msra.gmra.mrb[6].mxu0 %vm295_vm3, %v785_v51 }
 0x4ac   :  { %v6610_v52 = vpop.f32.mrb[10].mxu1 }
 0x4ad   :  { %v773_v53 = vpop.f32.mrb[11].mxu1  ;;  %v876_v54 = vsel %vm472_vm5, %v6610_v52, -inf }
 0x4ae   :  { %877 = vmax.xlane.f32.xlu1 %v876_v54  ;;  %v873_v55 = vsel %vm472_vm5, %v773_v53, -inf }
 0x4af   :  { %874 = vmax.xlane.f32.xlu0 %v873_v55 }
 0x53b   :  { %v878_v61 = vpop.xlane.xlu1 %877 }
 0x53c   :  { %v875_v56 = vpop.xlane.xlu0 %874  ;;  %v886_v62 = vsub.f32 %v6610_v52, %v878_v61 }
 0x53d   :  { %v885_v57 = vsub.f32 %v773_v53, %v875_v56 }
 0x53e   :  { %v891_v3 = vmul.f32 1.442695, %v886_v62 }
 0x53f   :  { %v889_v58 = vmul.f32 1.442695, %v885_v57 }
 0x541   :  { %7469 = vpow2.f32 %v889_v58 }
 0x542   :  { %7471 = vpow2.f32 %v891_v3 }
 0x544   :  { %v7870_v59 = vpop.f32.mrb[2].mxu0 }
 0x545   :  { %v7872_v60 = vpop.f32.mrb[3].mxu0 }
 0x54b   :  { %v7470_v63 = vpop.eup %7469 }
 0x54c   :  { %v7874_v0 = vpop.f32.mrb[4].mxu0  ;;  %v897_v1 = vsel %vm472_vm5, %v7470_v63, 0.0  ;;  %v7472_v8 = vpop.eup %7471 }
 0x54d   :  { %898 = vadd.xlane.f32.xlu1 %v897_v1  ;;  %v7877_v2 = vpop.f32.mrb[5].mxu0  ;;  %v900_v9 = vsel %vm472_vm5, %v7472_v8, 0.0 }
 0x555   :  { %v6617_v4 = vpop.f32.mrb[6].mxu0 }
 0x556   :  { %v864_v5 = vpop.f32.mrb[7].mxu0  ;;  %v882_v7 = vsel %vm472_vm5, %v6617_v4, -inf }
 0x557   :  { %v879_v6 = vsel %vm472_vm5, %v864_v5, -inf }
 0x558   :  { %880 = vmax.xlane.f32.xlu0 %v879_v6 }
 0x55c   :  { %883 = vmax.xlane.f32.xlu0 %v882_v7 }
 0x55e   :  { %7334 = vrot.lane.b32.xlu1 %v7790_v27, %s7667_s24 }
 0x560   :  { %901 = vadd.xlane.f32.xlu0 %v900_v9 }
 0x562   :  { %7344 = vrot.lane.b32.xlu1 %v7790_v27, %s7659_s12 }
 0x566   :  { %7349 = vrot.lane.b32.xlu1 %v7798_v32, %s7659_s12 }
 0x56a   :  { %1093 = vrot.lane.b32.xlu1 %v7820_v43, %s7668_s4 }
 0x576   :  { %7339 = vrot.lane.b32.xlu0 %v7798_v32, %s7667_s24 }
 0x5da   :  { %v899_v10 = vpop.xlane.xlu1 %898 }
 0x5db   :  { %7473 = vrcp.f32 %v899_v10 }
 0x5de   :  { %v7335_v11 = vpop.permute.xlu1 %7334 }
 0x5df   :  { %v7337_v12 = vunpack.i.h.bf16 %v7335_v11  ;;  %v7336_v13 = vunpack.i.l.bf16 %v7335_v11 }
 0x5e1   :  { %v7074_v14 = vpack.c.bf16 %v7337_v12, %v7336_v13 }
 0x5e2   :  { %v7345_v17 = vpop.permute.xlu1 %7344 }
 0x5e3   :  { %v7347_v19 = vunpack.i.h.bf16 %v7345_v17  ;;  %v7346_v21 = vunpack.i.l.bf16 %v7345_v17  ;;  %7075 = vmatprep.subr.bf16.mxu1 %v7074_v14 }
 0x5e4   :  { %7077 = vmatpush3.bf16.msra.mxu1 %v7074_v14 }
 0x5e5   :  { %v7474_v22 = vpop.eup %7473  ;;  %v7082_v23 = vpack.c.bf16 %v7347_v19, %v7346_v21  ;;  %v881_v24 = vpop.xlane.xlu0 %880 }
 0x5e6   :  { %v887_v25 = vsub.f32 %v864_v5, %v881_v24  ;;  %v913_v26 = vmul.f32 %v7474_v22, %v7470_v63  ;;  %v7350_v36 = vpop.permute.xlu1 %7349 }
 0x5e7   :  { %7084 = vmatprep.subr.msk.bf16.mxu1 %vm7808_vm4, %v7082_v23  ;;  %v7352_v39 = vunpack.i.h.bf16 %v7350_v36  ;;  %v7351_v40 = vunpack.i.l.bf16 %v7350_v36 }
 0x5e8   :  { %v893_v29 = vmul.f32 1.442695, %v887_v25  ;;  %6622 = vmatprep.mubr.msk.f32.mxu1 %vm472_vm5, %v913_v26 }
 0x5e9   :  { %v884_v30 = vpop.xlane.xlu0 %883  ;;  %v7088_v48 = vpack.c.bf16 %v7352_v39, %v7351_v40 }
 0x5ea   :  { %7475 = vpow2.f32 %v893_v29  ;;  %v888_v31 = vsub.f32 %v6617_v4, %v884_v30  ;;  %v1094_v53 = vpop.permute.xlu1 %1093 }
 0x5ec   :  { %v895_v34 = vmul.f32 1.442695, %v888_v31 }
 0x5ed   :  { %v902_v35 = vpop.xlane.xlu0 %901 }
 0x5ee   :  { %7477 = vpow2.f32 %v895_v34 }
 0x5ef   :  { %7479 = vrcp.f32 %v902_v35 }
 0x5f1   :  { %v7340_v38 = vpop.permute.xlu0 %7339 }
 0x5f2   :  { %v7342_v41 = vunpack.i.h.bf16 %v7340_v38  ;;  %v7341_v42 = vunpack.i.l.bf16 %v7340_v38 }
 0x5f4   :  { %v7476_v45 = vpop.eup %7475  ;;  %v7078_v46 = vpack.c.bf16 %v7342_v41, %v7341_v42 }
 0x5f5   :  { %v903_v47 = vsel %vm472_vm5, %v7476_v45, 0.0 }
 0x5f6   :  { %904 = vadd.xlane.f32.xlu1 %v903_v47  ;;  %7079 = vmatprep.subr.bf16.mxu0 %v7078_v46 }
 0x5f7   :  { %7081 = vmatpush3.bf16.msra.mxu0 %v7078_v46 }
 0x5f8   :  { %v7478_v49 = vpop.eup %7477  ;;  %7090 = vmatprep.subr.msk.bf16.mxu0 %vm7808_vm4, %v7088_v48 }
 0x5f9   :  { %v7480_v50 = vpop.eup %7479  ;;  %v906_v51 = vsel %vm472_vm5, %v7478_v49, 0.0 }
 0x5fa   :  { %907 = vadd.xlane.f32.xlu0 %v906_v51  ;;  %v914_v52 = vmul.f32 %v7480_v50, %v7472_v8 }
 0x5fc   :  { %6623 = vmatmul.mubr.msk.f32.vlgmr.msra.gmra.mrb[12].mxu1 %vm472_vm5, %v914_v52 }
 0x5fd   :  { %7087 = vmatpush3.bf16.xpose.msk.msra.mxu1 %vm7808_vm4, %v7082_v23 }
 0x607   :  { %1184 = vrot.lane.b32.xlu1 %v7824_v44, %s7668_s4 }
 0x610   :  { %1091 = vrot.lane.b32.xlu0 %v7792_v28, %s7668_s4 }
 0x614   :  { %1182 = vrot.lane.b32.xlu0 %v7800_v33, %s7668_s4 }
 0x683   :  { %v905_v54 = vpop.xlane.xlu1 %904 }
 0x684   :  { %7481 = vrcp.f32 %v905_v54 }
 0x687   :  { %v908_v55 = vpop.xlane.xlu0 %907  ;;  %v1185_v1 = vpop.permute.xlu1 %1184 }
 0x688   :  { %7483 = vrcp.f32 %v908_v55 }
 0x68b   :  { %v1092_v56 = vpop.permute.xlu0 %1091 }
 0x68c   :  { %6636 = vmatprep.mubr.msk.f32.mxu1 %vm295_vm3, %v1092_v56 }
 0x68d   :  { %6637 = vmatmul.mubr.msk.f32.vlgmr.msra.gmra.mrb[14].mxu1 %vm295_vm3, %v1094_v53 }
 0x68e   :  { %v7482_v57 = vpop.eup %7481 }
 0x68f   :  { %v915_v58 = vmul.f32 %v7482_v57, %v7476_v45  ;;  %v1183_v63 = vpop.permute.xlu0 %1182 }
 0x691   :  { %6629 = vmatprep.mubr.msk.f32.mxu0 %vm472_vm5, %v915_v58 }
 0x692   :  { %v7484_v61 = vpop.eup %7483 }
 0x693   :  { %v916_v62 = vmul.f32 %v7484_v61, %v7478_v49 }
 0x695   :  { %6630 = vmatmul.mubr.msk.f32.vlgmr.msra.gmra.mrb[8].mxu0 %vm472_vm5, %v916_v62 }
 0x696   :  { %7093 = vmatpush3.bf16.xpose.msk.msra.mxu0 %vm7808_vm4, %v7088_v48  ;;  %6643 = vmatprep.mubr.msk.f32.mxu0 %vm295_vm3, %v1183_v63 }
 0x69d   :  { %6644 = vmatmul.mubr.msk.f32.vlgmr.msra.gmra.mrb[10].mxu0 %vm295_vm3, %v1185_v1 }
 0x6cf   :  { %v7916_v3 = vpop.f32.mrb[12].mxu1 }
 0x6d0   :  { %v7918_v4 = vpop.f32.mrb[13].mxu1 }
 0x760   :  { %v6638_v5 = vpop.f32.mrb[14].mxu1 }
 0x761   :  { %v1173_v6 = vpop.f32.mrb[15].mxu1  ;;  %v1276_v7 = vsel %vm472_vm5, %v6638_v5, -inf }
 0x762   :  { %1277 = vmax.xlane.f32.xlu1 %v1276_v7  ;;  %v1273_v8 = vsel %vm472_vm5, %v1173_v6, -inf }
 0x763   :  { %1274 = vmax.xlane.f32.xlu0 %v1273_v8 }
 0x768   :  { %v7922_v9 = vpop.f32.mrb[8].mxu0 }
 0x769   :  { %v7924_v10 = vpop.f32.mrb[9].mxu0 }
 0x770   :  { %v6645_v11 = vpop.f32.mrb[10].mxu0 }
 0x771   :  { %v1264_v12 = vpop.f32.mrb[11].mxu0  ;;  %v1282_v14 = vsel %vm472_vm5, %v6645_v11, -inf }
 0x772   :  { %v1279_v13 = vsel %vm472_vm5, %v1264_v12, -inf }
 0x773   :  { %1280 = vmax.xlane.f32.xlu0 %v1279_v13 }
 0x777   :  { %1283 = vmax.xlane.f32.xlu0 %v1282_v14 }
 0x7ef   :  { %v1278_v17 = vpop.xlane.xlu1 %1277 }
 0x7f0   :  { %v1286_v19 = vsub.f32 %v6638_v5, %v1278_v17  ;;  %v1275_v21 = vpop.xlane.xlu0 %1274 }
 0x7f1   :  { %v1285_v22 = vsub.f32 %v1173_v6, %v1275_v21 }
 0x7f2   :  { %v1291_v23 = vmul.f32 1.442695, %v1286_v19 }
 0x7f3   :  { %v1289_v24 = vmul.f32 1.442695, %v1285_v22 }
 0x7f4   :  { %7485 = vpow2.f32 %v1291_v23 }
 0x7f5   :  { %7487 = vpow2.f32 %v1289_v24 }
 0x7fe   :  { %v7486_v25 = vpop.eup %7485 }
 0x7ff   :  { %v7488_v26 = vpop.eup %7487  ;;  %v1300_v29 = vsel %vm472_vm5, %v7486_v25, 0.0 }
 0x800   :  { %1301 = vadd.xlane.f32.xlu0 %v1300_v29  ;;  %v1297_v30 = vsel %vm472_vm5, %v7488_v26, 0.0  ;;  %v1281_v31 = vpop.xlane.xlu0 %1280 }
 0x801   :  { %1298 = vadd.xlane.f32.xlu1 %v1297_v30  ;;  %v1287_v38 = vsub.f32 %v1264_v12, %v1281_v31 }
 0x803   :  { %v1293_v39 = vmul.f32 1.442695, %v1287_v38 }
 0x804   :  { %v1284_v34 = vpop.xlane.xlu0 %1283 }
 0x805   :  { %v1288_v35 = vsub.f32 %v6645_v11, %v1284_v34 }
 0x807   :  { %v1295_v36 = vmul.f32 1.442695, %v1288_v35 }
 0x809   :  { %7489 = vpow2.f32 %v1295_v36 }
 0x80a   :  { %7491 = vpow2.f32 %v1293_v39 }
 0x812   :  { %7354 = vrot.lane.b32.xlu1 %v7790_v27, %s7669_s26 }
 0x813   :  { %v7490_v40 = vpop.eup %7489 }
 0x814   :  { %v1306_v41 = vsel %vm472_vm5, %v7490_v40, 0.0  ;;  %v7492_v42 = vpop.eup %7491 }
 0x815   :  { %v1303_v45 = vsel %vm472_vm5, %v7492_v42, 0.0 }
 0x816   :  { %7364 = vrot.lane.b32.xlu1 %v7790_v27, %s7670_s27  ;;  %7359 = vrot.lane.b32.xlu0 %v7798_v32, %s7669_s26 }
 0x81a   :  { %7369 = vrot.lane.b32.xlu1 %v7798_v32, %s7670_s27 }
 0x81e   :  { %1493 = vrot.lane.b32.xlu1 %v7820_v43, %s7671_s28 }
 0x835   :  { %1307 = vadd.xlane.f32.xlu0 %v1306_v41 }
 0x842   :  { %1304 = vadd.xlane.f32.xlu1 %v1303_v45 }
 0x84b   :  { %1491 = vrot.lane.b32.xlu0 %v7792_v28, %s7671_s28 }
 0x84f   :  { %1582 = vrot.lane.b32.xlu0 %v7800_v33, %s7671_s28 }
 0x853   :  { %1584 = vrot.lane.b32.xlu1 %v7824_v44, %s7671_s28 }
 0x88d   :  { %v1302_v43 = vpop.xlane.xlu0 %1301 }
 0x88e   :  { %7493 = vrcp.f32 %v1302_v43  ;;  %v1299_v46 = vpop.xlane.xlu1 %1298 }
 0x88f   :  { %7495 = vrcp.f32 %v1299_v46 }
 0x891   :  { %v7360_v47 = vpop.permute.xlu0 %7359 }
 0x892   :  { %v7362_v48 = vunpack.i.h.bf16 %v7360_v47  ;;  %v7361_v49 = vunpack.i.l.bf16 %v7360_v47  ;;  %v7355_v50 = vpop.permute.xlu1 %7354 }
 0x893   :  { %v7357_v51 = vunpack.i.h.bf16 %v7355_v50  ;;  %v7356_v52 = vunpack.i.l.bf16 %v7355_v50 }
 0x894   :  { %v7098_v53 = vpack.c.bf16 %v7362_v48, %v7361_v49 }
 0x895   :  { %v7094_v54 = vpack.c.bf16 %v7357_v51, %v7356_v52 }
 0x896   :  { %v7365_v55 = vpop.permute.xlu1 %7364  ;;  %7099 = vmatprep.subr.bf16.mxu0 %v7098_v53 }
 0x897   :  { %v7367_v28 = vunpack.i.h.bf16 %v7365_v55  ;;  %v7366_v56 = vunpack.i.l.bf16 %v7365_v55  ;;  %7095 = vmatprep.subr.bf16.mxu1 %v7094_v54  ;;  %7101 = vmatpush3.bf16.msra.mxu0 %v7098_v53 }
 0x898   :  { %v7494_v33 = vpop.eup %7493  ;;  %7097 = vmatpush3.bf16.msra.mxu1 %v7094_v54 }
 0x899   :  { %v7496_v44 = vpop.eup %7495  ;;  %v7102_v57 = vpack.c.bf16 %v7367_v28, %v7366_v56  ;;  %v1314_v1 = vmul.f32 %v7494_v33, %v7486_v25 }
 0x89a   :  { %v7370_v58 = vpop.permute.xlu1 %7369  ;;  %v1313_v61 = vmul.f32 %v7496_v44, %v7488_v26 }
 0x89b   :  { %v7372_v62 = vunpack.i.h.bf16 %v7370_v58  ;;  %v7371_v63 = vunpack.i.l.bf16 %v7370_v58  ;;  %7104 = vmatprep.subr.msk.bf16.mxu1 %vm7808_vm4, %v7102_v57 }
 0x89c   :  { %6650 = vmatprep.mubr.msk.f32.mxu1 %vm472_vm5, %v1313_v61 }
 0x89d   :  { %v7108_v5 = vpack.c.bf16 %v7372_v62, %v7371_v63  ;;  %6651 = vmatmul.mubr.msk.f32.vlgmr.msra.gmra.mrb[16].mxu1 %vm472_vm5, %v1314_v1 }
 0x89e   :  { %v1494_v8 = vpop.permute.xlu1 %1493 }
 0x89f   :  { %7110 = vmatprep.subr.msk.bf16.mxu0 %vm7808_vm4, %v7108_v5 }
 0x8a1   :  { %7107 = vmatpush3.bf16.xpose.msk.msra.mxu1 %vm7808_vm4, %v7102_v57 }
 0x8c2   :  { %v1308_v6 = vpop.xlane.xlu0 %1307 }
 0x8c3   :  { %7497 = vrcp.f32 %v1308_v6 }
 0x8c6   :  { %v1492_v7 = vpop.permute.xlu0 %1491 }
 0x8c7   :  { %6664 = vmatprep.mubr.msk.f32.mxu1 %vm295_vm3, %v1492_v7 }
 0x8c8   :  { %6665 = vmatmul.mubr.msk.f32.vlgmr.msra.gmra.mrb[18].mxu1 %vm295_vm3, %v1494_v8 }
 0x8ca   :  { %v1583_v19 = vpop.permute.xlu0 %1582 }
 0x8cd   :  { %v7498_v12 = vpop.eup %7497 }
 0x8ce   :  { %v1316_v17 = vmul.f32 %v7498_v12, %v7490_v40 }
 0x8cf   :  { %v1305_v11 = vpop.xlane.xlu1 %1304 }
 0x8d0   :  { %7499 = vrcp.f32 %v1305_v11 }
 0x8d3   :  { %v1585_v21 = vpop.permute.xlu1 %1584 }
 0x8da   :  { %v7500_v13 = vpop.eup %7499 }
 0x8db   :  { %v1315_v14 = vmul.f32 %v7500_v13, %v7492_v42 }
 0x8dd   :  { %6657 = vmatprep.mubr.msk.f32.mxu0 %vm472_vm5, %v1315_v14 }
 0x8de   :  { %6658 = vmatmul.mubr.msk.f32.vlgmr.msra.gmra.mrb[12].mxu0 %vm472_vm5, %v1316_v17 }
 0x8df   :  { %7113 = vmatpush3.bf16.xpose.msk.msra.mxu0 %vm7808_vm4, %v7108_v5  ;;  %6671 = vmatprep.mubr.msk.f32.mxu0 %vm295_vm3, %v1583_v19 }
 0x8e6   :  { %6672 = vmatmul.mubr.msk.f32.vlgmr.msra.gmra.mrb[14].mxu0 %vm295_vm3, %v1585_v21  ;;  %v280_v21 = vld [vmem:[#allocation2 + $0x8] sm:$0xff] }
 0x970   :  { %v6652_v22 = vpop.f32.mrb[16].mxu1 }
 0x971   :  { %v1395_v23 = vpop.f32.mrb[17].mxu1 }
 0x99b   :  { %v6666_v24 = vpop.f32.mrb[18].mxu1 }
 0x99c   :  { %v1573_v25 = vpop.f32.mrb[19].mxu1  ;;  %v1676_v26 = vsel %vm472_vm5, %v6666_v24, -inf }
 0x99d   :  { %1677 = vmax.xlane.f32.xlu1 %v1676_v26  ;;  %v1673_v29 = vsel %vm472_vm5, %v1573_v25, -inf }
 0x99e   :  { %1674 = vmax.xlane.f32.xlu0 %v1673_v29 }
 0x9b1   :  { %v7966_v30 = vpop.f32.mrb[12].mxu0 }
 0x9b2   :  { %v7968_v31 = vpop.f32.mrb[13].mxu0 }
 0x9b9   :  { %v6673_v34 = vpop.f32.mrb[14].mxu0 }
 0x9ba   :  { %v1664_v35 = vpop.f32.mrb[15].mxu0  ;;  %v1682_v38 = vsel %vm472_vm5, %v6673_v34, -inf }
 0x9bb   :  { %v1679_v36 = vsel %vm472_vm5, %v1664_v35, -inf }
 0x9bc   :  { %1680 = vmax.xlane.f32.xlu0 %v1679_v36 }
 0x9c0   :  { %1683 = vmax.xlane.f32.xlu0 %v1682_v38 }
 0xa2a   :  { %v1678_v39 = vpop.xlane.xlu1 %1677 }
 0xa2b   :  { %v1686_v40 = vsub.f32 %v6666_v24, %v1678_v39  ;;  %v1675_v41 = vpop.xlane.xlu0 %1674 }
 0xa2c   :  { %v1685_v42 = vsub.f32 %v1573_v25, %v1675_v41  ;;  %v283_v25 = vld [vmem:[#allocation2 + $0xf8] sm:$0xff] }
 0xa2d   :  { %v1691_v45 = vmul.f32 1.442695, %v1686_v40 }
 0xa2e   :  { %v1689_v43 = vmul.f32 1.442695, %v1685_v42 }
 0xa2f   :  { %7501 = vpow2.f32 %v1691_v45 }
 0xa30   :  { %7503 = vpow2.f32 %v1689_v43 }
 0xa39   :  { %v7502_v46 = vpop.eup %7501 }
 0xa3a   :  { %v7504_v47 = vpop.eup %7503  ;;  %v1700_v48 = vsel %vm472_vm5, %v7502_v46, 0.0 }
 0xa3b   :  { %1701 = vadd.xlane.f32.xlu0 %v1700_v48  ;;  %v1697_v49 = vsel %vm472_vm5, %v7504_v47, 0.0 }
 0xa3c   :  { %1698 = vadd.xlane.f32.xlu1 %v1697_v49 }
 0xa49   :  { %v1681_v50 = vpop.xlane.xlu0 %1680 }
 0xa4a   :  { %v1687_v51 = vsub.f32 %v1664_v35, %v1681_v50 }
 0xa4c   :  { %v1693_v52 = vmul.f32 1.442695, %v1687_v51 }
 0xa4d   :  { %v1684_v53 = vpop.xlane.xlu0 %1683 }
 0xa4e   :  { %7505 = vpow2.f32 %v1693_v52  ;;  %v1688_v54 = vsub.f32 %v6673_v34, %v1684_v53 }
 0xa50   :  { %v1695_v55 = vmul.f32 1.442695, %v1688_v54 }
 0xa52   :  { %7507 = vpow2.f32 %v1695_v55 }
 0xa58   :  { %v7506_v28 = vpop.eup %7505 }
 0xa59   :  { %v1703_v56 = vsel %vm472_vm5, %v7506_v28, 0.0 }
 0xa5a   :  { %1704 = vadd.xlane.f32.xlu1 %v1703_v56 }
 0xa5c   :  { %v7508_v33 = vpop.eup %7507 }
 0xa5d   :  { %v1706_v44 = vsel %vm472_vm5, %v7508_v33, 0.0 }
 0xa5e   :  { %1707 = vadd.xlane.f32.xlu0 %v1706_v44 }
 0xa6b   :  { %7374 = vrot.lane.b32.xlu1 %v7790_v27, %s7672_s29 }
 0xa6f   :  { %1895 = vrot.lane.b32.xlu1 %v7918_v4, %s7673_s30 }
 0xa73   :  { %1897 = vrot.lane.b32.xlu1 %v7916_v3, %s7673_s30 }
 0xa74   :  { %7379 = vrot.lane.b32.xlu0 %v7798_v32, %s7672_s29 }
 0xa77   :  { %1913 = vrot.lane.b32.xlu1 %v6652_v22, %s7662_s25  ;;  %v281_v22 = vld [vmem:[#allocation2 + $0x58] sm:$0xff] }
 0xa78   :  { %1911 = vrot.lane.b32.xlu0 %v1395_v23, %s7662_s25  ;;  %v282_v23 = vld [vmem:[#allocation2 + $0xa8] sm:$0xff]  ;;  %v7122_v24 = vpack.c.bf16 %v281_v22, %v280_v21 }
 0xa79   :  { %v7126_v26 = vpack.c.bf16 %v283_v25, %v282_v23 }
 0xac8   :  { %v1702_v27 = vpop.xlane.xlu0 %1701 }
 0xac9   :  { %v1699_v57 = vpop.xlane.xlu1 %1698 }
 0xaca   :  { %7509 = vrcp.f32 %v1699_v57 }
 0xacb   :  { %7511 = vrcp.f32 %v1702_v27 }
 0xad4   :  { %v7510_v58 = vpop.eup %7509 }
 0xad5   :  { %v1713_v61 = vmul.f32 %v7510_v58, %v7504_v47  ;;  %v7512_v5 = vpop.eup %7511 }
 0xad6   :  { %v1714_v12 = vmul.f32 %v7512_v5, %v7502_v46 }
 0xad7   :  { %6678 = vmatprep.mubr.msk.f32.mxu1 %vm472_vm5, %v1713_v61 }
 0xae7   :  { %v1705_v62 = vpop.xlane.xlu1 %1704 }
 0xae8   :  { %7513 = vrcp.f32 %v1705_v62 }
 0xaeb   :  { %v7375_v4 = vpop.permute.xlu1 %7374  ;;  %v1708_v63 = vpop.xlane.xlu0 %1707 }
 0xaec   :  { %v7377_v3 = vunpack.i.h.bf16 %v7375_v4  ;;  %v7376_v1 = vunpack.i.l.bf16 %v7375_v4  ;;  %7515 = vrcp.f32 %v1708_v63 }
 0xaee   :  { %v7114_v32 = vpack.c.bf16 %v7377_v3, %v7376_v1 }
 0xaef   :  { %v7380_v6 = vpop.permute.xlu0 %7379  ;;  %v1896_v38 = vpop.permute.xlu1 %1895 }
 0xaf0   :  { %v7382_v7 = vunpack.i.h.bf16 %v7380_v6  ;;  %v7381_v8 = vunpack.i.l.bf16 %v7380_v6  ;;  %7115 = vmatprep.subr.bf16.mxu1 %v7114_v32 }
 0xaf1   :  { %7117 = vmatpush3.bf16.msra.mxu1 %v7114_v32 }
 0xaf2   :  { %v7514_v11 = vpop.eup %7513  ;;  %v7118_v13 = vpack.c.bf16 %v7382_v7, %v7381_v8  ;;  %7123 = vmatprep.subr.bf16.mxu1 %v7122_v24 }
 0xaf3   :  { %v1715_v14 = vmul.f32 %v7514_v11, %v7506_v28  ;;  %v1898_v39 = vpop.permute.xlu1 %1897  ;;  %v1912_v41 = vpop.permute.xlu0 %1911 }
 0xaf4   :  { %6679 = vmatmul.mubr.msk.f32.vlgmr.msra.gmra.mrb[20].mxu1 %vm472_vm5, %v1714_v12  ;;  %7119 = vmatprep.subr.bf16.mxu0 %v7118_v13  ;;  %v1940_v42 = vsel %vm295_vm3, %v7870_v59, %v1898_v39  ;;  %v2130_v39 = vld [vmem:[#allocation2 + $0xb0] sm:$0xff] }
 0xaf5   :  { %7121 = vmatpush3.bf16.msra.mxu0 %v7118_v13  ;;  %6685 = vmatprep.mubr.msk.f32.mxu0 %vm472_vm5, %v1715_v14 }
 0xaf6   :  { %v7516_v17 = vpop.eup %7515  ;;  %7125 = vmatpush3.bf16.msra.mxu1 %v7122_v24 }
 0xaf7   :  { %v1716_v19 = vmul.f32 %v7516_v17, %v7508_v33  ;;  %7127 = vmatprep.subr.bf16.mxu1 %v7126_v26  ;;  %v1914_v40 = vpop.permute.xlu1 %1913 }
 0xaf9   :  { %6686 = vmatmul.mubr.msk.f32.vlgmr.msra.gmra.mrb[16].mxu0 %vm472_vm5, %v1716_v19 }
 0xafa   :  { %7129 = vmatpush3.bf16.msra.mxu1 %v7126_v26 }
 0xbc7   :  { %v6680_v29 = vpop.f32.mrb[20].mxu1 }
 0xbc8   :  { %1929 = vrot.lane.b32.xlu1 %v6680_v29, %s7674_s8  ;;  %v1795_v34 = vpop.f32.mrb[21].mxu1 }
 0xbc9   :  { %1927 = vrot.lane.b32.xlu0 %v1795_v34, %s7674_s8 }
 0xbcc   :  { %1901 = vrot.lane.b32.xlu1 %v7922_v9, %s7673_s30  ;;  %v6687_v35 = vpop.f32.mrb[16].mxu0  ;;  %v1939_v9 = vsel %vm295_vm3, %v7872_v60, %v1896_v38 }
 0xbcd   :  { %1899 = vrot.lane.b32.xlu0 %v7924_v10, %s7673_s30  ;;  %v1882_v36 = vpop.f32.mrb[17].mxu0 }
 0xbd0   :  { %1917 = vrot.lane.b32.xlu1 %v7966_v30, %s7662_s25  ;;  %v1943_v30 = vsel %vm472_vm5, %v1939_v9, %v1912_v41  ;;  %v2425_v9 = vld [vmem:[%s8598_s3 + $0x4] sm:$0xf] }
 0xbd1   :  { %1915 = vrot.lane.b32.xlu0 %v7968_v31, %s7662_s25  ;;  %v1944_v31 = vsel %vm472_vm5, %v1940_v42, %v1914_v40  ;;  %v2131_v40 = vld [vmem:[#allocation2 + $0x100] sm:$0xff]  ;;  %v2239_v42 = vld [vmem:[#allocation4 + $0x10] sm:$0xff] }
 0xbd2   :  { %v7134_v41 = vpack.c.bf16 %v2131_v40, %v2130_v39 }
 0xbd4   :  { %1933 = vrot.lane.b32.xlu1 %v6687_v35, %s7674_s8  ;;  %v2128_v35 = vld [vmem:[#allocation2 + $0x10] sm:$0xff] }
 0xbd5   :  { %1931 = vrot.lane.b32.xlu0 %v1882_v36, %s7674_s8  ;;  %v2129_v36 = vld [vmem:[#allocation2 + $0x60] sm:$0xff] }
 0xbd6   :  { %v7130_v38 = vpack.c.bf16 %v2129_v36, %v2128_v35 }
 0xbd8   :  { %7131 = vmatprep.subr.bf16.mxu0 %v7130_v38 }
 0xbd9   :  { %7133 = vmatpush3.bf16.msra.mxu0 %v7130_v38 }
 0xbda   :  { %7135 = vmatprep.subr.bf16.mxu0 %v7134_v41 }
 0xbdd   :  { %7137 = vmatpush3.bf16.msra.mxu0 %v7134_v41  ;;  %v2510_v41 = vld [vmem:[%s8597_s2 + $0x10] sm:$0xff] }
 0xbde   :  { %6738 = vmatprep.subr.msk.mxu0 %vm78_vm0, %v2425_v9 }
 0xc3a   :  { %v1930_v10 = vpop.permute.xlu1 %1929 }
 0xc3b   :  { %v1928_v45 = vpop.permute.xlu0 %1927  ;;  %v1949_v46 = vsel %vm1947_vm6, %v1944_v31, %v1930_v10  ;;  %v2238_v10 = vld [vmem:[#allocation4] sm:$0xff]  ;;  %v2241_v31 = vld [vmem:[#allocation4 + $0x30] sm:$0xff] }
 0xc3c   :  { %v1948_v43 = vsel %vm1947_vm6, %v1943_v30, %v1928_v45  ;;  %v2240_v30 = vld [vmem:[#allocation4 + $0x20] sm:$0xff]  ;;  %v7138_v45 = vpack.c.bf16 %v2239_v42, %v2238_v10 }
 0xc3d   :  { %6696 = vmatprep.mubr.msk.f32.mxu1 %vm182_vm2, %v1948_v43  ;;  %v7142_v43 = vpack.c.bf16 %v2241_v31, %v2240_v30 }
 0xc3e   :  { %v1902_v47 = vpop.permute.xlu1 %1901  ;;  %6697 = vmatmul.mubr.msk.f32.vlgmr.msra.gmra.mrb[22].mxu1 %vm182_vm2, %v1949_v46  ;;  %v2242_v46 = vld [vmem:[#allocation4 + $0x40] sm:$0xff]  ;;  %7139 = vmatprep.subr.bf16.mxu1 %v7138_v45 }
 0xc3f   :  { %v1900_v48 = vpop.permute.xlu0 %1899  ;;  %v1942_v51 = vsel %vm295_vm3, %v7874_v0, %v1902_v47  ;;  %v2243_v47 = vld [vmem:[#allocation4 + $0x50] sm:$0xff]  ;;  %7141 = vmatpush3.bf16.msra.mxu1 %v7138_v45 }
 0xc40   :  { %v1941_v59 = vsel %vm295_vm3, %v7877_v2, %v1900_v48  ;;  %v6202_v2 = vld [vmem:[%s8601_s6 + $0x1] ss:$0 sm:$0xff]  ;;  %7143 = vmatprep.subr.bf16.mxu1 %v7142_v43  ;;  %v7146_v48 = vpack.c.bf16 %v2243_v47, %v2242_v46 }
 0xc42   :  { %v1918_v60 = vpop.permute.xlu1 %1917 }
 0xc43   :  { %v1916_v49 = vpop.permute.xlu0 %1915  ;;  %v1946_v54 = vsel %vm472_vm5, %v1942_v51, %v1918_v60  ;;  %7145 = vmatpush3.bf16.msra.mxu1 %v7142_v43  ;;  %v7675_v43 = vmov 0.0  }
 0xc44   :  { %v1945_v52 = vsel %vm472_vm5, %v1941_v59, %v1916_v49  ;;  %7147 = vmatprep.subr.bf16.mxu1 %v7146_v48 }
 0xc46   :  { %v1934_v50 = vpop.permute.xlu1 %1933 }
 0xc47   :  { %v1932_v53 = vpop.permute.xlu0 %1931  ;;  %v1951_v28 = vsel %vm1947_vm6, %v1946_v54, %v1934_v50  ;;  %7149 = vmatpush3.bf16.msra.mxu1 %v7146_v48  ;;  %v8113_v48 = vld [vmem:[%s8601_s6 + $0x5] ss:$0 sm:$0xff] }
 0xc48   :  { %v1950_v55 = vsel %vm1947_vm6, %v1945_v52, %v1932_v53 }
 0xc49   :  { %6699 = vmatprep.mubr.msk.f32.mxu1 %vm182_vm2, %v1950_v55 }
 0xc4a   :  { %6700 = vmatmul.mubr.msk.f32.gmra.mrb[24].mxu1 %vm182_vm2, %v1951_v28  ;;  %v6207_v28 = vld [vmem:[%s8601_s6 + $0x2] ss:$0 sm:$0xff] }
 0xd11   :  { %v6698_v56 = vpop.f32.mrb[22].mxu1 }
 0xd12   :  { %v2040_v33 = vadd.f32 %v6698_v56, %v6202_v2  ;;  %v2034_v0 = vpop.f32.mrb[23].mxu1 }
 0xd13   :  { %v2035_v44 = vadd.f32 %v6202_v2, %v2034_v0 }
 0xd14   :  { %v2056_v57 = vadd.f32 %v2040_v33, %v7773_v16 }
 0xd15   :  { %v2055_v58 = vadd.f32 %v2035_v44, %v7771_v15 }
 0xd16   :  { %v2062_v61 = vsel %vm182_vm2, %v2056_v57, 0.0 }
 0xd17   :  { %2063 = vadd.xlane.f32.xlu1 %v2062_v61  ;;  %v2059_v27 = vsel %vm182_vm2, %v2055_v58, 0.0 }
 0xd18   :  { %2060 = vadd.xlane.f32.xlu0 %v2059_v27 }
 0xd1d   :  { %v6701_v62 = vpop.f32.mrb[24].mxu1 }
 0xd1e   :  { %v2044_v4 = vpop.f32.mrb[25].mxu1  ;;  %v2050_v63 = vadd.f32 %v6701_v62, %v6202_v2 }
 0xd1f   :  { %v2045_v3 = vadd.f32 %v6202_v2, %v2044_v4 }
 0xd20   :  { %v2058_v5 = vadd.f32 %v2050_v63, %v7777_v18 }
 0xd21   :  { %v2057_v1 = vadd.f32 %v2045_v3, %v7781_v20 }
 0xd22   :  { %v2068_v16 = vsel %vm182_vm2, %v2058_v5, 0.0 }
 0xd23   :  { %v2065_v32 = vsel %vm182_vm2, %v2057_v1, 0.0 }
 0xd24   :  { %2066 = vadd.xlane.f32.xlu0 %v2065_v32 }
 0xd28   :  { %2069 = vadd.xlane.f32.xlu0 %v2068_v16 }
 0xda4   :  { %v2064_v15 = vpop.xlane.xlu1 %2063 }
 0xda5   :  { %v2073_v6 = vmul.f32 0.03125, %v2064_v15  ;;  %v2061_v7 = vpop.xlane.xlu0 %2060 }
 0xda6   :  { %v2072_v8 = vmul.f32 0.03125, %v2061_v7 }
 0xda7   :  { %v2077_v11 = vsub.f32 %v2056_v57, %v2073_v6 }
 0xda8   :  { %v2076_v12 = vsub.f32 %v2055_v58, %v2072_v8  ;;  %v6208_v58 = vld [vmem:[%s8601_s6 + $0x3] ss:$0 sm:$0xff] }
 0xda9   :  { %v2081_v13 = vmul.f32 %v2077_v11, %v2077_v11  ;;  %v2423_v8 = vld [vmem:[%s8596_s1] sm:$0xff] }
 0xdaa   :  { %v2080_v14 = vmul.f32 %v2076_v12, %v2076_v12 }
 0xdab   :  { %v2087_v17 = vsel %vm182_vm2, %v2081_v13, 0.0  ;;  %v2245_v13 = vld [vmem:[#allocation4 + $0x70] sm:$0xff] }
 0xdac   :  { %2088 = vadd.xlane.f32.xlu0 %v2087_v17  ;;  %v2084_v20 = vsel %vm182_vm2, %v2080_v14, 0.0  ;;  %v2513_v17 = vld [vmem:[#allocation2 + $0x18] sm:$0xff] }
 0xdad   :  { %2085 = vadd.xlane.f32.xlu1 %v2084_v20  ;;  %v2514_v20 = vld [vmem:[#allocation2 + $0x68] sm:$0xff] }
 0xdb1   :  { %v2067_v19 = vpop.xlane.xlu0 %2066 }
 0xdb2   :  { %v2074_v18 = vmul.f32 0.03125, %v2067_v19  ;;  %v7154_v19 = vpack.c.bf16 %v2514_v20, %v2513_v17 }
 0xdb4   :  { %v8035_v21 = vsub.f32 %v2057_v1, %v2074_v18  ;;  %v2515_v18 = vld [vmem:[#allocation2 + $0xb8] sm:$0xff] }
 0xdb5   :  { %v2070_v22 = vpop.xlane.xlu0 %2069 }
 0xdb6   :  { %v2075_v23 = vmul.f32 0.03125, %v2070_v22  ;;  %v2082_v24 = vmul.f32 %v8035_v21, %v8035_v21 }
 0xdb8   :  { %v8039_v25 = vsub.f32 %v2058_v5, %v2075_v23  ;;  %v2090_v26 = vsel %vm182_vm2, %v2082_v24, 0.0  ;;  %v6209_v23 = vld [vmem:[%s8601_s6 + $0x4] ss:$0 sm:$0xff] }
 0xdb9   :  { %2091 = vadd.xlane.f32.xlu1 %v2090_v26 }
 0xdba   :  { %v2083_v29 = vmul.f32 %v8039_v25, %v8039_v25 }
 0xdbc   :  { %v2093_v34 = vsel %vm182_vm2, %v2083_v29, 0.0 }
 0xdbd   :  { %2094 = vadd.xlane.f32.xlu0 %v2093_v34 }
 0xe39   :  { %v2089_v60 = vpop.xlane.xlu0 %2088 }
 0xe3a   :  { %v2097_v49 = vmul.f32 0.03125, %v2089_v60  ;;  %v2086_v59 = vpop.xlane.xlu1 %2085 }
 0xe3b   :  { %v2096_v50 = vmul.f32 0.03125, %v2086_v59 }
 0xe3c   :  { %v2101_v51 = vadd.f32 1e-05, %v2097_v49  ;;  %v6224_v49 = vld [vmem:[%s8601_s6 + $0x8] ss:$0 sm:$0xff] }
 0xe3d   :  { %v2100_v52 = vadd.f32 1e-05, %v2096_v50 }
 0xe3e   :  { %7517 = vrsqrt.f32 %v2101_v51 }
 0xe3f   :  { %7519 = vrsqrt.f32 %v2100_v52 }
 0xe46   :  { %v2092_v53 = vpop.xlane.xlu1 %2091 }
 0xe47   :  { %v2098_v54 = vmul.f32 0.03125, %v2092_v53 }
 0xe48   :  { %v7518_v55 = vpop.eup %7517 }
 0xe49   :  { %v7520_v2 = vpop.eup %7519  ;;  %v2109_v56 = vmul.f32 %v7518_v55, %v2077_v11  ;;  %v2102_v33 = vadd.f32 1e-05, %v2098_v54  ;;  %v2424_v11 = vld [vmem:[%s8596_s1 + $0x8] sm:$0xff] }
 0xe4a   :  { %v2095_v0 = vpop.xlane.xlu0 %2094  ;;  %v2108_v44 = vmul.f32 %v7520_v2, %v2076_v12  ;;  %v2244_v12 = vld [vmem:[#allocation4 + $0x60] sm:$0xff] }
 0xe4b   :  { %7521 = vrsqrt.f32 %v2102_v33  ;;  %v2099_v57 = vmul.f32 0.03125, %v2095_v0  ;;  %v2117_v61 = vmul.f32 %v6207_v28, %v2109_v56  ;;  %v7150_v14 = vpack.c.bf16 %v2245_v13, %v2244_v12 }
 0xe4c   :  { %v2116_v27 = vmul.f32 %v6207_v28, %v2108_v44  ;;  %v54_v33 = vlaneseq }
 0xe4d   :  { %v2103_v62 = vadd.f32 1e-05, %v2099_v57  ;;  %v8057_v63 = vadd.f32 %v6208_v58, %v2117_v61  ;;  %7151 = vmatprep.subr.bf16.mxu1 %v7150_v14 }
 0xe4e   :  { %v8055_v4 = vadd.f32 %v6208_v58, %v2116_v27  ;;  %7153 = vmatpush3.bf16.msra.mxu1 %v7150_v14  ;;  %v55_v0 = vshrl.u32 %v54_v33, 7  ;;  %v57_v44 = vand.u32 127, %v54_v33 }
 0xe4f   :  { %7523 = vrsqrt.f32 %v2103_v62  ;;  %6759 = vmatprep.subr.mxu1 %v7675_v43 }
 0xe50   :  { %6710 = vmatprep.mubr.msk.f32.mxu0 %vm182_vm2, %v8055_v4  ;;  %vm58_vm9 = vcmp.gt.s32.totalorder %v57_v44, %v55_v0 }
 0xe51   :  { %6711 = vmatmul.mubr.msk.f32.vlgmr.msra.gmra.mrb[18].mxu0 %vm182_vm2, %v8057_v63  ;;  %v8150_v57 = vsel %vm58_vm9, -1e+09, %v7675_v43 }
 0xe52   :  { %6739 = vmatpush3.msk.msra.mxu0 %vm78_vm0, %v2425_v9 }
 0xe53   :  { %7155 = vmatprep.subr.bf16.mxu0 %v7154_v19 }
 0xe55   :  { %v7522_v3 = vpop.eup %7521 }
 0xe56   :  { %v2110_v1 = vmul.f32 %v7522_v3, %v8035_v21  ;;  %v2516_v21 = vld [vmem:[#allocation2 + $0x108] sm:$0xff] }
 0xe57   :  { %v7158_v22 = vpack.c.bf16 %v2516_v21, %v2515_v18 }
 0xe58   :  { %v2118_v32 = vmul.f32 %v6207_v28, %v2110_v1 }
 0xe59   :  { %v7524_v5 = vpop.eup %7523 }
 0xe5a   :  { %v8065_v16 = vadd.f32 %v6208_v58, %v2118_v32  ;;  %v2111_v15 = vmul.f32 %v7524_v5, %v8039_v25 }
 0xe5c   :  { %6713 = vmatprep.mubr.msk.f32.mxu0 %vm182_vm2, %v8065_v16  ;;  %v2119_v6 = vmul.f32 %v6207_v28, %v2111_v15 }
 0xe5e   :  { %v8070_v7 = vadd.f32 %v6208_v58, %v2119_v6 }
 0xe60   :  { %6714 = vmatmul.mubr.msk.f32.gmra.mrb[20].mxu0 %vm182_vm2, %v8070_v7 }
 0xe61   :  { %6740 = vmatprep.mubr.msk.f32.mxu0 %vm65_vm1, %v2423_v8 }
 0xe64   :  { %6741 = vmatmul.mubr.msk.f32.vlgmr.msra.gmra.mrb[22].mxu0 %vm65_vm1, %v2424_v11 }
 0xe65   :  { %7157 = vmatpush3.bf16.msra.mxu0 %v7154_v19 }
 0xe66   :  { %7159 = vmatprep.subr.bf16.mxu0 %v7158_v22 }
 0xe69   :  { %7161 = vmatpush3.bf16.msra.mxu0 %v7158_v22 }
 0xe6a   :  { %6754 = vmatprep.subr.mxu0 %v7675_v43 }
 0xf24   :  { %v6712_v24 = vpop.f32.mrb[18].mxu0 }
 0xf25   :  { %v2221_v25 = vadd.f32 %v6712_v24, %v6209_v23  ;;  %v2215_v26 = vpop.f32.mrb[19].mxu0 }
 0xf26   :  { %v2216_v29 = vadd.f32 %v6209_v23, %v2215_v26 }
 0xf27   :  { %v2235_v35 = vmax.f32 %v2221_v25, 0.0 }
 0xf28   :  { %v2234_v34 = vmax.f32 %v2216_v29, 0.0 }
 0xf2a   :  { %6732 = vmatprep.mubr.msk.f32.mxu1 %vm2251_vm7, %v2234_v34 }
 0xf2b   :  { %6733 = vmatmul.mubr.msk.f32.vlgmr.msra.gmra.mrb[26].mxu1 %vm2251_vm7, %v2235_v35 }
 0xf33   :  { %v6715_v36 = vpop.f32.mrb[20].mxu0 }
 0xf34   :  { %v2231_v38 = vadd.f32 %v6715_v36, %v6209_v23  ;;  %v2225_v39 = vpop.f32.mrb[21].mxu0 }
 0xf35   :  { %v2226_v40 = vadd.f32 %v6209_v23, %v2225_v39 }
 0xf36   :  { %v2237_v42 = vmax.f32 %v2231_v38, 0.0 }
 0xf37   :  { %v2236_v9 = vmax.f32 %v2226_v40, 0.0  ;;  %v6742_v10 = vpop.f32.mrb[22].mxu0 }
 0xf38   :  { %v2501_v30 = vpop.f32.mrb[23].mxu0  ;;  %v8093_v31 = vadd.f32 %v6742_v10, %v2510_v41 }
 0xf39   :  { %v8090_v45 = vadd.f32 %v2510_v41, %v2501_v30  ;;  %6735 = vmatprep.mubr.msk.f32.mxu1 %vm2251_vm7, %v2236_v9 }
 0xf3a   :  { %6736 = vmatmul.mubr.msk.f32.gmra.mrb[28].mxu1 %vm2251_vm7, %v2237_v42 }
 0xf3b   :  { %6751 = vmatprep.mubr.msk.f32.mxu0 %vm182_vm2, %v8090_v45  ;;  %6761 = vmatprep.mubr.msk.f32.mxu1 %vm7676_vm8, %v7675_v43 }
 0xf3c   :  { %6752 = vmatmul.mubr.msk.f32.vlgmr.msra.gmra.mrb[24].mxu0 %vm182_vm2, %v8093_v31 }
 0xf3d   :  { %6756 = vmatprep.mubr.msk.f32.mxu0 %vm7676_vm8, %v7675_v43 }
 0xffe   :  { %v8102_v46 = vpop.f32.mrb[26].mxu1 }
 0xfff   :  { %v8104_v47 = vpop.f32.mrb[27].mxu1 }
0x100d   :  { %v6737_v60 = vpop.f32.mrb[28].mxu1 }
0x100e   :  { %v8119_v59 = vadd.f32 %v6737_v60, %v8113_v48  ;;  %v8121_v50 = vpop.f32.mrb[29].mxu1 }
0x100f   :  { %v6753_v51 = vpop.f32.mrb[24].mxu0 }
0x1010   :  { %v8123_v52 = vadd.f32 %v6753_v51, %v6224_v49  ;;  %v2594_v53 = vpop.f32.mrb[25].mxu0 }
0x1011   :  { %v8125_v54 = vadd.f32 %v6224_v49, %v2594_v53 }
0x1012   :  { %2689 = vrot.lane.b32.xlu0 %v8123_v52, %s7663_s20  ;;  %v8134_v2 = vmul.f32 0.35355338, %v8123_v52 }
0x1013   :  { %2611 = vrot.lane.b32.xlu1 %v8125_v54, %s7663_s20  ;;  %v8138_v56 = vmul.f32 0.35355338, %v8125_v54 }
0x1084   :  { %v2690_v55 = vpop.permute.xlu0 %2689 }
0x1085   :  { %6760 = vmatpush3.xpose.msk.msra.mxu1 %vm295_vm3, %v2690_v55  ;;  %v2612_v28 = vpop.permute.xlu1 %2611 }
0x1086   :  { %6755 = vmatpush3.xpose.msk.msra.mxu0 %vm295_vm3, %v2612_v28  ;;  %6769 = vmatprep.subr.mxu1 %v7675_v43 }
0x1087   :  { %6764 = vmatprep.subr.mxu0 %v7675_v43 }
0x1088   :  { %6762 = vmatmul.mubr.msk.f32.vlgmr.msra.gmra.mrb[30].mxu1 %vm295_vm3, %v8134_v2 }
0x1089   :  { %6757 = vmatmul.mubr.msk.f32.vlgmr.msra.gmra.mrb[26].mxu0 %vm295_vm3, %v8138_v56  ;;  %6771 = vmatprep.mubr.msk.f32.mxu1 %vm7676_vm8, %v7675_v43 }
0x108a   :  { %6766 = vmatprep.mubr.msk.f32.mxu0 %vm7676_vm8, %v7675_v43 }
0x115b   :  { %v2762_v58 = vpop.f32.mrb[30].mxu1 }
0x115c   :  { %v2763_v61 = vadd.f32 %v2762_v58, %v8150_v57  ;;  %v2684_v27 = vpop.f32.mrb[26].mxu0  ;;  %v6763_v62 = vpop.f32.mrb[31].mxu1 }
0x115d   :  { %v2685_v3 = vadd.f32 %v2684_v27, %v8150_v57  ;;  %v6758_v1 = vpop.f32.mrb[27].mxu0 }
0x115e   :  { %v2769_v32 = vsel %vm295_vm3, %v2763_v61, -inf }
0x115f   :  { %2770 = vmax.xlane.f32.xlu0 %v2769_v32  ;;  %v2766_v5 = vsel %vm295_vm3, %v2685_v3, -inf }
0x1160   :  { %2767 = vmax.xlane.f32.xlu1 %v2766_v5 }
0x1171   :  { %2788 = vrot.lane.b32.xlu1 %v8125_v54, %s7664_s21 }
0x1175   :  { %2942 = vrot.lane.b32.xlu1 %v8125_v54, %s7665_s22  ;;  %2864 = vrot.lane.b32.xlu0 %v8123_v52, %s7664_s21 }
0x1179   :  { %3020 = vrot.lane.b32.xlu1 %v8123_v52, %s7665_s22 }
0x11ec   :  { %v2771_v15 = vpop.xlane.xlu0 %2770 }
0x11ed   :  { %v2773_v6 = vsub.f32 %v2763_v61, %v2771_v15  ;;  %v2768_v8 = vpop.xlane.xlu1 %2767 }
0x11ee   :  { %v2772_v11 = vsub.f32 %v2685_v3, %v2768_v8 }
0x11ef   :  { %v2776_v12 = vmul.f32 1.442695, %v2773_v6 }
0x11f0   :  { %v2774_v13 = vmul.f32 1.442695, %v2772_v11  ;;  %v2865_v14 = vpop.permute.xlu0 %2864 }
0x11f1   :  { %7525 = vpow2.f32 %v2776_v12  ;;  %v2789_v17 = vpop.permute.xlu1 %2788  ;;  %6770 = vmatpush3.msra.mxu1 %v2865_v14 }
0x11f2   :  { %7527 = vpow2.f32 %v2774_v13  ;;  %6765 = vmatpush3.msra.mxu0 %v2789_v17  ;;  %6779 = vmatprep.subr.mxu1 %v7675_v43 }
0x11f3   :  { %6774 = vmatprep.subr.mxu0 %v7675_v43 }
0x11f5   :  { %v2943_v22 = vpop.permute.xlu1 %2942 }
0x11f9   :  { %v3021_v23 = vpop.permute.xlu1 %3020 }
0x11fb   :  { %v7526_v20 = vpop.eup %7525 }
0x11fc   :  { %v7528_v19 = vpop.eup %7527  ;;  %v2781_v18 = vsel %vm295_vm3, %v7526_v20, 0.0 }
0x11fd   :  { %2782 = vadd.xlane.f32.xlu0 %v2781_v18  ;;  %v2778_v21 = vsel %vm295_vm3, %v7528_v19, 0.0 }
0x11fe   :  { %2779 = vadd.xlane.f32.xlu1 %v2778_v21 }
0x120f   :  { %3018 = vrot.lane.b32.xlu1 %v8134_v2, %s7666_s23 }
0x1213   :  { %2940 = vrot.lane.b32.xlu0 %v8138_v56, %s7666_s23 }
0x128a   :  { %v2783_v24 = vpop.xlane.xlu0 %2782 }
0x128b   :  { %7529 = vrcp.f32 %v2783_v24  ;;  %v2780_v25 = vpop.xlane.xlu1 %2779 }
0x128c   :  { %7531 = vrcp.f32 %v2780_v25 }
0x128e   :  { %v2941_v38 = vpop.permute.xlu0 %2940 }
0x128f   :  { %v3019_v36 = vpop.permute.xlu1 %3018 }
0x1295   :  { %v7530_v26 = vpop.eup %7529 }
0x1296   :  { %v7532_v29 = vpop.eup %7531  ;;  %v2787_v34 = vmul.f32 %v7530_v26, %v7526_v20 }
0x1297   :  { %v2786_v35 = vmul.f32 %v7532_v29, %v7528_v19 }
0x1298   :  { %6772 = vmatmul.mubr.msk.f32.vlgmr.msra.gmra.mrb[32].mxu1 %vm295_vm3, %v2787_v34 }
0x1299   :  { %6780 = vmatpush3.xpose.msk.msra.mxu1 %vm295_vm3, %v3021_v23  ;;  %6767 = vmatmul.mubr.msk.f32.vlgmr.msra.gmra.mrb[28].mxu0 %vm295_vm3, %v2786_v35 }
0x129a   :  { %6775 = vmatpush3.xpose.msk.msra.mxu0 %vm295_vm3, %v2943_v22  ;;  %6781 = vmatprep.mubr.msk.f32.mxu1 %vm7676_vm8, %v7675_v43 }
0x129b   :  { %6776 = vmatprep.mubr.msk.f32.mxu0 %vm7676_vm8, %v7675_v43  ;;  %6784 = vmatprep.subr.mxu0 %v7675_v43 }
0x129c   :  { %6782 = vmatmul.mubr.msk.f32.vlgmr.msra.gmra.mrb[34].mxu1 %vm295_vm3, %v3019_v36  ;;  %6789 = vmatprep.subr.mxu1 %v7675_v43 }
0x129d   :  { %6777 = vmatmul.mubr.msk.f32.vlgmr.msra.gmra.mrb[30].mxu0 %vm295_vm3, %v2941_v38  ;;  %6791 = vmatprep.mubr.msk.f32.mxu1 %vm7676_vm8, %v7675_v43 }
0x129e   :  { %6786 = vmatprep.mubr.msk.f32.mxu0 %vm7676_vm8, %v7675_v43 }
0x136b   :  { %v8188_v39 = vpop.f32.mrb[32].mxu1 }
0x136c   :  { %v8190_v40 = vpop.f32.mrb[28].mxu0  ;;  %v6773_v41 = vpop.f32.mrb[33].mxu1 }
0x136d   :  { %v6768_v9 = vpop.f32.mrb[29].mxu0 }
0x136f   :  { %v3092_v10 = vpop.f32.mrb[34].mxu1 }
0x1370   :  { %v3093_v42 = vadd.f32 %v3092_v10, %v8150_v57  ;;  %v3014_v30 = vpop.f32.mrb[30].mxu0  ;;  %v6783_v60 = vpop.f32.mrb[35].mxu1 }
0x1371   :  { %v3015_v49 = vadd.f32 %v3014_v30, %v8150_v57  ;;  %v6778_v51 = vpop.f32.mrb[31].mxu0 }
0x1372   :  { %v3099_v53 = vsel %vm295_vm3, %v3093_v42, -inf }
0x1373   :  { %3100 = vmax.xlane.f32.xlu1 %v3099_v53  ;;  %v3096_v55 = vsel %vm295_vm3, %v3015_v49, -inf }
0x1374   :  { %3097 = vmax.xlane.f32.xlu0 %v3096_v55 }
0x1384   :  { %3118 = vrot.lane.b32.xlu1 %v8125_v54, %s7667_s24 }
0x1388   :  { %3272 = vrot.lane.b32.xlu1 %v8125_v54, %s7659_s12 }
0x138a   :  { %3194 = vrot.lane.b32.xlu0 %v8123_v52, %s7667_s24 }
0x138c   :  { %3350 = vrot.lane.b32.xlu1 %v8123_v52, %s7659_s12 }
0x1390   :  { %3348 = vrot.lane.b32.xlu1 %v8134_v2, %s7668_s4 }
0x1400   :  { %v3101_v28 = vpop.xlane.xlu1 %3100 }
0x1401   :  { %v3103_v33 = vsub.f32 %v3093_v42, %v3101_v28  ;;  %v3098_v0 = vpop.xlane.xlu0 %3097 }
0x1402   :  { %v3102_v44 = vsub.f32 %v3015_v49, %v3098_v0 }
0x1403   :  { %v3106_v58 = vmul.f32 1.442695, %v3103_v33 }
0x1404   :  { %v3104_v61 = vmul.f32 1.442695, %v3102_v44  ;;  %v3119_v27 = vpop.permute.xlu1 %3118 }
0x1405   :  { %7533 = vpow2.f32 %v3106_v58  ;;  %v3195_v62 = vpop.permute.xlu0 %3194  ;;  %6785 = vmatpush3.msra.mxu0 %v3119_v27 }
0x1406   :  { %6790 = vmatpush3.msra.mxu1 %v3195_v62  ;;  %6794 = vmatprep.subr.mxu0 %v7675_v43  ;;  %7535 = vpow2.f32 %v3104_v61 }
0x1407   :  { %6799 = vmatprep.subr.mxu1 %v7675_v43 }
0x1408   :  { %v3273_v8 = vpop.permute.xlu1 %3272 }
0x140c   :  { %v3351_v12 = vpop.permute.xlu1 %3350 }
0x140f   :  { %v7534_v3 = vpop.eup %7533 }
0x1410   :  { %v3111_v1 = vsel %vm295_vm3, %v7534_v3, 0.0  ;;  %v7536_v32 = vpop.eup %7535  ;;  %v3349_v20 = vpop.permute.xlu1 %3348 }
0x1411   :  { %3112 = vadd.xlane.f32.xlu0 %v3111_v1  ;;  %v3108_v5 = vsel %vm295_vm3, %v7536_v32, 0.0 }
0x1415   :  { %3109 = vadd.xlane.f32.xlu0 %v3108_v5 }
0x142b   :  { %3270 = vrot.lane.b32.xlu0 %v8138_v56, %s7668_s4 }
0x149e   :  { %v3113_v15 = vpop.xlane.xlu0 %3112 }
0x149f   :  { %7537 = vrcp.f32 %v3113_v15 }
0x14a2   :  { %v3110_v6 = vpop.xlane.xlu0 %3109 }
0x14a3   :  { %7539 = vrcp.f32 %v3110_v6 }
0x14a6   :  { %v3271_v19 = vpop.permute.xlu0 %3270 }
0x14a9   :  { %v7538_v11 = vpop.eup %7537 }
0x14aa   :  { %v3117_v13 = vmul.f32 %v7538_v11, %v7534_v3 }
0x14ac   :  { %6792 = vmatmul.mubr.msk.f32.vlgmr.msra.gmra.mrb[36].mxu1 %vm295_vm3, %v3117_v13 }
0x14ad   :  { %v7540_v14 = vpop.eup %7539  ;;  %6800 = vmatpush3.xpose.msk.msra.mxu1 %vm295_vm3, %v3351_v12  ;;  %6801 = vmatprep.mubr.msk.f32.mxu1 %vm7676_vm8, %v7675_v43 }
0x14ae   :  { %v3116_v17 = vmul.f32 %v7540_v14, %v7536_v32  ;;  %6809 = vmatprep.subr.mxu1 %v7675_v43 }
0x14b0   :  { %6787 = vmatmul.mubr.msk.f32.vlgmr.msra.gmra.mrb[32].mxu0 %vm295_vm3, %v3116_v17  ;;  %6802 = vmatmul.mubr.msk.f32.vlgmr.msra.gmra.mrb[38].mxu1 %vm295_vm3, %v3349_v20 }
0x14b1   :  { %6795 = vmatpush3.xpose.msk.msra.mxu0 %vm295_vm3, %v3273_v8  ;;  %6796 = vmatprep.mubr.msk.f32.mxu0 %vm7676_vm8, %v7675_v43 }
0x14b2   :  { %6804 = vmatprep.subr.mxu0 %v7675_v43  ;;  %6811 = vmatprep.mubr.msk.f32.mxu1 %vm7676_vm8, %v7675_v43 }
0x14b4   :  { %6797 = vmatmul.mubr.msk.f32.vlgmr.msra.gmra.mrb[34].mxu0 %vm295_vm3, %v3271_v19 }
0x14b5   :  { %6806 = vmatprep.mubr.msk.f32.mxu0 %vm7676_vm8, %v7675_v43 }
0x157f   :  { %v8228_v18 = vpop.f32.mrb[36].mxu1 }
0x1580   :  { %v6793_v21 = vpop.f32.mrb[37].mxu1 }
0x1583   :  { %v8230_v22 = vpop.f32.mrb[32].mxu0  ;;  %v3422_v23 = vpop.f32.mrb[38].mxu1 }
0x1584   :  { %v3423_v24 = vadd.f32 %v3422_v23, %v8150_v57  ;;  %v6788_v25 = vpop.f32.mrb[33].mxu0  ;;  %v6803_v26 = vpop.f32.mrb[39].mxu1 }
0x1586   :  { %v3429_v29 = vsel %vm295_vm3, %v3423_v24, -inf }
0x1587   :  { %v3344_v34 = vpop.f32.mrb[34].mxu0  ;;  %3430 = vmax.xlane.f32.xlu1 %v3429_v29 }
0x1588   :  { %v3345_v35 = vadd.f32 %v3344_v34, %v8150_v57  ;;  %v6798_v36 = vpop.f32.mrb[35].mxu0 }
0x158a   :  { %v3426_v38 = vsel %vm295_vm3, %v3345_v35, -inf }
0x158b   :  { %3427 = vmax.xlane.f32.xlu0 %v3426_v38 }
0x1598   :  { %3448 = vrot.lane.b32.xlu1 %v8125_v54, %s7669_s26 }
0x159c   :  { %3602 = vrot.lane.b32.xlu1 %v8125_v54, %s7670_s27 }
0x15a0   :  { %3680 = vrot.lane.b32.xlu1 %v8123_v52, %s7670_s27 }
0x15a1   :  { %3524 = vrot.lane.b32.xlu0 %v8123_v52, %s7669_s26 }
0x15a4   :  { %3678 = vrot.lane.b32.xlu1 %v8134_v2, %s7671_s28 }
0x1614   :  { %v3431_v41 = vpop.xlane.xlu1 %3430 }
0x1615   :  { %v3433_v9 = vsub.f32 %v3423_v24, %v3431_v41 }
0x1617   :  { %v3436_v10 = vmul.f32 1.442695, %v3433_v9 }
0x1618   :  { %v3428_v42 = vpop.xlane.xlu0 %3427  ;;  %v3449_v30 = vpop.permute.xlu1 %3448 }
0x1619   :  { %7541 = vpow2.f32 %v3436_v10  ;;  %v3432_v60 = vsub.f32 %v3345_v35, %v3428_v42  ;;  %6805 = vmatpush3.msra.mxu0 %v3449_v30  ;;  %v2603_v30 = vld [vmem:[#allocation2 + $0x20] sm:$0xff] }
0x161a   :  { %6814 = vmatprep.subr.mxu0 %v7675_v43 }
0x161b   :  { %v3434_v49 = vmul.f32 1.442695, %v3432_v60  ;;  %v2604_v60 = vld [vmem:[#allocation2 + $0x70] sm:$0xff] }
0x161c   :  { %v3525_v51 = vpop.permute.xlu0 %3524  ;;  %v3603_v44 = vpop.permute.xlu1 %3602 }
0x161d   :  { %7543 = vpow2.f32 %v3434_v49  ;;  %6810 = vmatpush3.msra.mxu1 %v3525_v51  ;;  %v7162_v49 = vpack.c.bf16 %v2604_v60, %v2603_v30  ;;  %v2606_v51 = vld [vmem:[#allocation2 + $0x110] sm:$0xff]  ;;  %v4178_v60 = vld [vmem:[#allocation2 + $0x80] sm:$0xff] }
0x161e   :  { %6819 = vmatprep.subr.mxu1 %v7675_v43 }
0x1620   :  { %v3681_v61 = vpop.permute.xlu1 %3680 }
0x1623   :  { %v7542_v53 = vpop.eup %7541 }
0x1624   :  { %v3441_v55 = vsel %vm295_vm3, %v7542_v53, 0.0 }
0x1625   :  { %3442 = vadd.xlane.f32.xlu0 %v3441_v55 }
0x1627   :  { %v7544_v2 = vpop.eup %7543 }
0x1628   :  { %v3438_v28 = vsel %vm295_vm3, %v7544_v2, 0.0 }
0x1629   :  { %3439 = vadd.xlane.f32.xlu0 %v3438_v28 }
0x163f   :  { %3600 = vrot.lane.b32.xlu0 %v8138_v56, %s7671_s28  ;;  %v3679_v56 = vpop.permute.xlu1 %3678 }
0x16b2   :  { %v3443_v33 = vpop.xlane.xlu0 %3442 }
0x16b3   :  { %7545 = vrcp.f32 %v3443_v33 }
0x16b6   :  { %v3440_v0 = vpop.xlane.xlu0 %3439 }
0x16b7   :  { %7547 = vrcp.f32 %v3440_v0  ;;  %v2331_v0 = vadd.f32 %v8113_v48, %v8104_v47 }
0x16ba   :  { %v3601_v1 = vpop.permute.xlu0 %3600 }
0x16bd   :  { %v7546_v58 = vpop.eup %7545 }
0x16be   :  { %v3447_v27 = vmul.f32 %v7546_v58, %v7542_v53  ;;  %v2351_v58 = vadd.f32 %v2331_v0, %v8055_v4 }
0x16c0   :  { %6812 = vmatmul.mubr.msk.f32.vlgmr.msra.gmra.mrb[40].mxu1 %vm295_vm3, %v3447_v27  ;;  %v2341_v27 = vadd.f32 %v8113_v48, %v8121_v50 }
0x16c1   :  { %v7548_v62 = vpop.eup %7547  ;;  %6820 = vmatpush3.xpose.msk.msra.mxu1 %vm295_vm3, %v3681_v61  ;;  %6821 = vmatprep.mubr.msk.f32.mxu1 %vm7676_vm8, %v7675_v43 }
0x16c2   :  { %v3446_v3 = vmul.f32 %v7548_v62, %v7544_v2  ;;  %6829 = vmatprep.subr.mxu1 %v7675_v43  ;;  %v2355_v62 = vsel %vm182_vm2, %v2351_v58, 0.0 }
0x16c4   :  { %6807 = vmatmul.mubr.msk.f32.vlgmr.msra.gmra.mrb[36].mxu0 %vm295_vm3, %v3446_v3  ;;  %6822 = vmatmul.mubr.msk.f32.vlgmr.msra.gmra.mrb[42].mxu1 %vm295_vm3, %v3679_v56  ;;  %v8298_v3 = vadd.f32 %v2341_v27, %v8065_v16 }
0x16c5   :  { %6815 = vmatpush3.xpose.msk.msra.mxu0 %vm295_vm3, %v3603_v44  ;;  %6816 = vmatprep.mubr.msk.f32.mxu0 %vm7676_vm8, %v7675_v43  ;;  %v2336_v44 = vadd.f32 %v8102_v46, %v8113_v48 }
0x16c6   :  { %6824 = vmatprep.subr.mxu0 %v7675_v43  ;;  %6831 = vmatprep.mubr.msk.f32.mxu1 %vm7676_vm8, %v7675_v43  ;;  %v2361_v47 = vsel %vm182_vm2, %v8298_v3, 0.0 }
0x16c7   :  { %v2352_v61 = vadd.f32 %v2336_v44, %v8057_v63 }
0x16c8   :  { %6817 = vmatmul.mubr.msk.f32.vlgmr.msra.gmra.mrb[38].mxu0 %vm295_vm3, %v3601_v1 }
0x16c9   :  { %6826 = vmatprep.mubr.msk.f32.mxu0 %vm7676_vm8, %v7675_v43  ;;  %v2358_v56 = vsel %vm182_vm2, %v2352_v61, 0.0 }
0x1793   :  { %v3596_v32 = vpop.f32.mrb[40].mxu1 }
0x1794   :  { %v6813_v5 = vpop.f32.mrb[41].mxu1 }
0x1797   :  { %v3520_v15 = vpop.f32.mrb[36].mxu0  ;;  %v3752_v6 = vpop.f32.mrb[42].mxu1 }
0x1798   :  { %v3753_v8 = vadd.f32 %v3752_v6, %v8150_v57  ;;  %v6808_v11 = vpop.f32.mrb[37].mxu0  ;;  %v6823_v12 = vpop.f32.mrb[43].mxu1 }
0x179a   :  { %v3759_v13 = vsel %vm295_vm3, %v3753_v8, -inf }
0x179b   :  { %v3674_v14 = vpop.f32.mrb[38].mxu0  ;;  %3760 = vmax.xlane.f32.xlu1 %v3759_v13 }
0x179c   :  { %v3675_v17 = vadd.f32 %v3674_v14, %v8150_v57  ;;  %v6818_v20 = vpop.f32.mrb[39].mxu0 }
0x179e   :  { %v3756_v19 = vsel %vm295_vm3, %v3675_v17, -inf }
0x179f   :  { %3757 = vmax.xlane.f32.xlu0 %v3756_v19 }
0x17ac   :  { %3778 = vrot.lane.b32.xlu1 %v8125_v54, %s7672_s29 }
0x17b0   :  { %3932 = vrot.lane.b32.xlu1 %v8230_v22, %s7673_s30 }
0x17b4   :  { %3934 = vrot.lane.b32.xlu1 %v8228_v18, %s7673_s30 }
0x17b8   :  { %3942 = vrot.lane.b32.xlu1 %v3596_v32, %s7662_s25 }
0x1828   :  { %v3761_v21 = vpop.xlane.xlu1 %3760 }
0x1829   :  { %v3763_v23 = vsub.f32 %v3753_v8, %v3761_v21 }
0x182b   :  { %v3766_v24 = vmul.f32 1.442695, %v3763_v23  ;;  %v6251_v23 = vld [vmem:[%s8601_s6 + $0x9] ss:$0 sm:$0xff] }
0x182c   :  { %v3758_v25 = vpop.xlane.xlu0 %3757  ;;  %v3779_v57 = vpop.permute.xlu1 %3778 }
0x182d   :  { %7549 = vpow2.f32 %v3766_v24  ;;  %v3762_v26 = vsub.f32 %v3675_v17, %v3758_v25  ;;  %6825 = vmatpush3.msra.mxu0 %v3779_v57 }
0x182e   :  { %7163 = vmatprep.subr.bf16.mxu0 %v7162_v49 }
0x182f   :  { %v3764_v29 = vmul.f32 1.442695, %v3762_v26 }
0x1830   :  { %v3933_v46 = vpop.permute.xlu1 %3932 }
0x1831   :  { %7551 = vpow2.f32 %v3764_v29  ;;  %v3954_v48 = vsel %vm295_vm3, %v8190_v40, %v3933_v46 }
0x1834   :  { %v3935_v4 = vpop.permute.xlu1 %3934 }
0x1835   :  { %v3955_v16 = vsel %vm295_vm3, %v8188_v39, %v3935_v4 }
0x1837   :  { %v7550_v34 = vpop.eup %7549 }
0x1838   :  { %v3771_v54 = vsel %vm295_vm3, %v7550_v34, 0.0  ;;  %v3943_v1 = vpop.permute.xlu1 %3942 }
0x1839   :  { %3772 = vadd.xlane.f32.xlu0 %v3771_v54 }
0x183b   :  { %v7552_v22 = vpop.eup %7551 }
0x183c   :  { %v3768_v35 = vsel %vm295_vm3, %v7552_v22, 0.0 }
0x183d   :  { %3769 = vadd.xlane.f32.xlu0 %v3768_v35 }
0x1853   :  { %3854 = vrot.lane.b32.xlu0 %v8123_v52, %s7672_s29  ;;  %v2605_v52 = vld [vmem:[#allocation2 + $0xc0] sm:$0xff] }
0x1854   :  { %v7166_v53 = vpack.c.bf16 %v2606_v51, %v2605_v52  ;;  %v4179_v52 = vld [vmem:[#allocation2 + $0xd0] sm:$0xff]  ;;  %v4180_v51 = vld [vmem:[#allocation2 + $0x120] sm:$0xff] }
0x1857   :  { %3940 = vrot.lane.b32.xlu0 %v3520_v15, %s7662_s25  ;;  %v3957_v15 = vsel %vm472_vm5, %v3955_v16, %v3943_v1 }
0x18c6   :  { %v3773_v18 = vpop.xlane.xlu0 %3772 }
0x18c7   :  { %7553 = vrcp.f32 %v3773_v18  ;;  %v8323_v18 = vld [vmem:[%s8601_s6 + $0x6] ss:$0 sm:$0xff] }
0x18ca   :  { %v3770_v36 = vpop.xlane.xlu0 %3769 }
0x18cb   :  { %7555 = vrcp.f32 %v3770_v36  ;;  %v2354_v36 = vadd.f32 %v8119_v59, %v8070_v7  ;;  %v4177_v59 = vld [vmem:[#allocation2 + $0x30] sm:$0xff] }
0x18ce   :  { %v3855_v38 = vpop.permute.xlu0 %3854 }
0x18cf   :  { %6830 = vmatpush3.msra.mxu1 %v3855_v38 }
0x18d1   :  { %v7554_v41 = vpop.eup %7553 }
0x18d2   :  { %v3777_v9 = vmul.f32 %v7554_v41, %v7550_v34  ;;  %v3941_v63 = vpop.permute.xlu0 %3940 }
0x18d3   :  { %v3956_v32 = vsel %vm472_vm5, %v3954_v48, %v3941_v63 }
0x18d4   :  { %6832 = vmatmul.mubr.msk.f32.vlgmr.msra.gmra.mrb[44].mxu1 %vm295_vm3, %v3777_v9 }
0x18d5   :  { %v7556_v10 = vpop.eup %7555 }
0x18d6   :  { %v3776_v42 = vmul.f32 %v7556_v10, %v7552_v22  ;;  %v2364_v10 = vsel %vm182_vm2, %v2354_v36, 0.0 }
0x18d8   :  { %6827 = vmatmul.mubr.msk.f32.vlgmr.msra.gmra.mrb[40].mxu0 %vm295_vm3, %v3776_v42 }
0x18d9   :  { %7165 = vmatpush3.bf16.msra.mxu0 %v7162_v49  ;;  %v7178_v49 = vpack.c.bf16 %v4178_v60, %v4177_v59 }
0x18da   :  { %7167 = vmatprep.subr.bf16.mxu0 %v7166_v53 }
0x18dd   :  { %7169 = vmatpush3.bf16.msra.mxu0 %v7166_v53  ;;  %v7182_v53 = vpack.c.bf16 %v4180_v51, %v4179_v52 }
0x18de   :  { %7179 = vmatprep.subr.bf16.mxu0 %v7178_v49 }
0x19a7   :  { %v3926_v55 = vpop.f32.mrb[44].mxu1 }
0x19a8   :  { %3950 = vrot.lane.b32.xlu1 %v3926_v55, %s7674_s8  ;;  %v6833_v2 = vpop.f32.mrb[45].mxu1 }
0x19ab   :  { %v3850_v28 = vpop.f32.mrb[40].mxu0 }
0x19ac   :  { %3948 = vrot.lane.b32.xlu0 %v3850_v28, %s7674_s8  ;;  %v6828_v33 = vpop.f32.mrb[41].mxu0 }
0x19cb   :  { %2356 = vadd.xlane.f32.xlu0 %v2355_v62 }
0x19cc   :  { %2359 = vadd.xlane.f32.xlu1 %v2358_v56 }
0x19d0   :  { %2362 = vadd.xlane.f32.xlu1 %v2361_v47 }
0x1a1a   :  { %v3951_v50 = vpop.permute.xlu1 %3950 }
0x1a1b   :  { %v3959_v8 = vsel %vm1947_vm6, %v3957_v15, %v3951_v50 }
0x1a1e   :  { %v3949_v5 = vpop.permute.xlu0 %3948 }
0x1a1f   :  { %v3958_v6 = vsel %vm1947_vm6, %v3956_v32, %v3949_v5 }
0x1a20   :  { %6842 = vmatprep.mubr.msk.f32.mxu0 %vm182_vm2, %v3958_v6 }
0x1a21   :  { %6843 = vmatmul.mubr.msk.f32.vlgmr.msra.gmra.mrb[42].mxu0 %vm182_vm2, %v3959_v8 }
0x1a22   :  { %7181 = vmatpush3.bf16.msra.mxu0 %v7178_v49 }
0x1a23   :  { %7183 = vmatprep.subr.bf16.mxu0 %v7182_v53 }
0x1a26   :  { %7185 = vmatpush3.bf16.msra.mxu0 %v7182_v53 }
0x1a58   :  { %v2357_v11 = vpop.xlane.xlu0 %2356 }
0x1a59   :  { %v2367_v12 = vmul.f32 0.03125, %v2357_v11  ;;  %v2360_v39 = vpop.xlane.xlu1 %2359 }
0x1a5a   :  { %v2368_v34 = vmul.f32 0.03125, %v2360_v39  ;;  %v4090_v39 = vld [vmem:[#allocation2 + $0x118] sm:$0xff] }
0x1a5b   :  { %v2371_v40 = vsub.f32 %v2351_v58, %v2367_v12  ;;  %v4087_v12 = vld [vmem:[#allocation2 + $0x28] sm:$0xff] }
0x1a5c   :  { %v2372_v38 = vsub.f32 %v2352_v61, %v2368_v34 }
0x1a5d   :  { %v2375_v13 = vmul.f32 %v2371_v40, %v2371_v40  ;;  %v2363_v17 = vpop.xlane.xlu1 %2362 }
0x1a5e   :  { %v2376_v30 = vmul.f32 %v2372_v38, %v2372_v38  ;;  %v2369_v28 = vmul.f32 0.03125, %v2363_v17 }
0x1a5f   :  { %v2379_v14 = vsel %vm182_vm2, %v2375_v13, 0.0  ;;  %v4089_v13 = vld [vmem:[#allocation2 + $0xc8] sm:$0xff] }
0x1a60   :  { %2380 = vadd.xlane.f32.xlu1 %v2379_v14  ;;  %v2382_v7 = vsel %vm182_vm2, %v2376_v30, 0.0  ;;  %v8339_v61 = vsub.f32 %v8298_v3, %v2369_v28  ;;  %v7174_v17 = vpack.c.bf16 %v4090_v39, %v4089_v13 }
0x1a62   :  { %v2377_v63 = vmul.f32 %v8339_v61, %v8339_v61 }
0x1a64   :  { %v2385_v5 = vsel %vm182_vm2, %v2377_v63, 0.0 }
0x1aed   :  { %v2381_v20 = vpop.xlane.xlu1 %2380 }
0x1aee   :  { %v2391_v19 = vmul.f32 0.03125, %v2381_v20  ;;  %v7677_v20 = vmov 0.0|0.0  }
0x1aef   :  { %7190 = vmatprep.subr.bf16.mxu0 %v7677_v20 }
0x1af0   :  { %v2395_v21 = vadd.f32 1e-05, %v2391_v19 }
0x1af2   :  { %7557 = vrsqrt.f32 %v2395_v21 }
0x1af4   :  { %v6844_v24 = vpop.f32.mrb[42].mxu0 }
0x1af5   :  { %v4042_v25 = vadd.f32 %v6844_v24, %v6251_v23  ;;  %v4036_v57 = vpop.f32.mrb[43].mxu0 }
0x1af6   :  { %v4037_v26 = vadd.f32 %v6251_v23, %v4036_v57 }
0x1af7   :  { %v4048_v29 = vadd.f32 %v4042_v25, %v8093_v31 }
0x1af8   :  { %v4047_v54 = vadd.f32 %v4037_v26, %v8090_v45  ;;  %v8331_v45 = vld [vmem:[%s8601_s6 + $0x7] ss:$0 sm:$0xff] }
0x1af9   :  { %v4052_v22 = vsel %vm182_vm2, %v4048_v29, 0.0 }
0x1afa   :  { %4053 = vadd.xlane.f32.xlu0 %v4052_v22  ;;  %v4049_v41 = vsel %vm182_vm2, %v4047_v54, 0.0 }
0x1afc   :  { %v7558_v35 = vpop.eup %7557 }
0x1afd   :  { %v2403_v9 = vmul.f32 %v7558_v35, %v2371_v40  ;;  %v4088_v40 = vld [vmem:[#allocation2 + $0x78] sm:$0xff] }
0x1afe   :  { %4050 = vadd.xlane.f32.xlu0 %v4049_v41  ;;  %v7170_v14 = vpack.c.bf16 %v4088_v40, %v4087_v12  ;;  %v6254_v41 = vld [vmem:[%s8601_s6 + $0xa] ss:$0 sm:$0xff] }
0x1aff   :  { %v2411_v31 = vmul.f32 %v8323_v18, %v2403_v9 }
0x1b00   :  { %7171 = vmatprep.subr.bf16.mxu1 %v7170_v14 }
0x1b01   :  { %v2419_v42 = vadd.f32 %v8331_v45, %v2411_v31  ;;  %7173 = vmatpush3.bf16.msra.mxu1 %v7170_v14 }
0x1b02   :  { %2365 = vadd.xlane.f32.xlu0 %v2364_v10  ;;  %7175 = vmatprep.subr.bf16.mxu1 %v7174_v17 }
0x1b03   :  { %6864 = vmatprep.mubr.msk.f32.mxu0 %vm182_vm2, %v2419_v42  ;;  %v6255_v42 = vld [vmem:[%s8601_s6 + $0xb] ss:$0 sm:$0xff] }
0x1b05   :  { %7177 = vmatpush3.bf16.msra.mxu1 %v7174_v17 }
0x1b06   :  { %2383 = vadd.xlane.f32.xlu0 %v2382_v7  ;;  %7186 = vmatprep.subr.bf16.mxu1 %v7677_v20 }
0x1b87   :  { %v4054_v55 = vpop.xlane.xlu0 %4053 }
0x1b88   :  { %v4056_v2 = vmul.f32 0.03125, %v4054_v55 }
0x1b8a   :  { %v4058_v33 = vsub.f32 %v4048_v29, %v4056_v2 }
0x1b8b   :  { %v4051_v0 = vpop.xlane.xlu0 %4050 }
0x1b8c   :  { %v4055_v44 = vmul.f32 0.03125, %v4051_v0  ;;  %v4060_v58 = vmul.f32 %v4058_v33, %v4058_v33 }
0x1b8e   :  { %v4057_v27 = vsub.f32 %v4047_v54, %v4055_v44  ;;  %v4064_v62 = vsel %vm182_vm2, %v4060_v58, 0.0 }
0x1b8f   :  { %v2366_v56 = vpop.xlane.xlu0 %2365  ;;  %4065 = vadd.xlane.f32.xlu0 %v4064_v62 }
0x1b90   :  { %v2370_v47 = vmul.f32 0.03125, %v2366_v56  ;;  %v4059_v46 = vmul.f32 %v4057_v27, %v4057_v27 }
0x1b92   :  { %v2374_v4 = vsub.f32 %v2354_v36, %v2370_v47  ;;  %v4061_v1 = vsel %vm182_vm2, %v4059_v46, 0.0 }
0x1b93   :  { %v2384_v48 = vpop.xlane.xlu0 %2383  ;;  %4062 = vadd.xlane.f32.xlu1 %v4061_v1 }
0x1b94   :  { %v2392_v50 = vmul.f32 0.03125, %v2384_v48  ;;  %v2378_v16 = vmul.f32 %v2374_v4, %v2374_v4 }
0x1b96   :  { %v2396_v32 = vadd.f32 1e-05, %v2392_v50  ;;  %v2388_v3 = vsel %vm182_vm2, %v2378_v16, 0.0 }
0x1b97   :  { %2389 = vadd.xlane.f32.xlu0 %v2388_v3  ;;  %2386 = vadd.xlane.f32.xlu1 %v2385_v5 }
0x1b98   :  { %7559 = vrsqrt.f32 %v2396_v32 }
0x1ba2   :  { %v7560_v15 = vpop.eup %7559 }
0x1ba3   :  { %v2404_v6 = vmul.f32 %v7560_v15, %v2372_v38 }
0x1ba5   :  { %v2412_v8 = vmul.f32 %v8323_v18, %v2404_v6 }
0x1ba7   :  { %v2420_v11 = vadd.f32 %v8331_v45, %v2412_v8 }
0x1ba9   :  { %6865 = vmatmul.mubr.msk.f32.vlgmr.msra.gmra.mrb[44].mxu0 %vm182_vm2, %v2420_v11 }
0x1c1c   :  { %v4066_v19 = vpop.xlane.xlu0 %4065 }
0x1c1d   :  { %v4068_v21 = vmul.f32 0.03125, %v4066_v19 }
0x1c1f   :  { %v4070_v23 = vadd.f32 1e-05, %v4068_v21 }
0x1c20   :  { %v4063_v24 = vpop.xlane.xlu1 %4062 }
0x1c21   :  { %7561 = vrsqrt.f32 %v4070_v23  ;;  %v4067_v25 = vmul.f32 0.03125, %v4063_v24 }
0x1c23   :  { %v4069_v57 = vadd.f32 1e-05, %v4067_v25 }
0x1c24   :  { %v2390_v26 = vpop.xlane.xlu0 %2389  ;;  %v2387_v29 = vpop.xlane.xlu1 %2386 }
0x1c25   :  { %7563 = vrsqrt.f32 %v4069_v57  ;;  %v2394_v34 = vmul.f32 0.03125, %v2390_v26  ;;  %v2393_v54 = vmul.f32 0.03125, %v2387_v29 }
0x1c27   :  { %v2398_v22 = vadd.f32 1e-05, %v2394_v34  ;;  %v2397_v35 = vadd.f32 1e-05, %v2393_v54 }
0x1c29   :  { %7565 = vrsqrt.f32 %v2398_v22 }
0x1c2a   :  { %7567 = vrsqrt.f32 %v2397_v35 }
0x1c2b   :  { %v7562_v36 = vpop.eup %7561 }
0x1c2c   :  { %v4074_v38 = vmul.f32 %v7562_v36, %v4058_v33  ;;  %v6259_v33 = vld [vmem:[%s8601_s6 + $0xd] ss:$0 sm:$0xff] }
0x1c2e   :  { %v4080_v10 = vmul.f32 %v6254_v41, %v4074_v38 }
0x1c2f   :  { %v7564_v9 = vpop.eup %7563 }
0x1c30   :  { %v4073_v31 = vmul.f32 %v7564_v9, %v4057_v27  ;;  %v8360_v52 = vadd.f32 %v6255_v42, %v4080_v10 }
0x1c32   :  { %v4079_v30 = vmul.f32 %v6254_v41, %v4073_v31 }
0x1c33   :  { %v7566_v7 = vpop.eup %7565 }
0x1c34   :  { %v7568_v59 = vpop.eup %7567  ;;  %v8358_v60 = vadd.f32 %v6255_v42, %v4079_v30  ;;  %v2406_v49 = vmul.f32 %v7566_v7, %v2374_v4 }
0x1c35   :  { %v2405_v51 = vmul.f32 %v7568_v59, %v8339_v61 }
0x1c36   :  { %6853 = vmatprep.mubr.msk.f32.mxu1 %vm182_vm2, %v8358_v60  ;;  %v2414_v53 = vmul.f32 %v8323_v18, %v2406_v49 }
0x1c37   :  { %6854 = vmatmul.mubr.msk.f32.vlgmr.msra.gmra.mrb[46].mxu1 %vm182_vm2, %v8360_v52  ;;  %v2413_v55 = vmul.f32 %v8323_v18, %v2405_v51 }
0x1c38   :  { %v2422_v2 = vadd.f32 %v8331_v45, %v2414_v53  ;;  %6874 = vmatprep.mubr.msk.f32.mxu1 %vm7676_vm8, %v7675_v43 }
0x1c39   :  { %v2421_v28 = vadd.f32 %v8331_v45, %v2413_v55  ;;  %v6256_v45 = vld [vmem:[%s8601_s6 + $0xc] ss:$0 sm:$0xff] }
0x1c3b   :  { %6867 = vmatprep.mubr.msk.f32.mxu0 %vm182_vm2, %v2421_v28 }
0x1c3c   :  { %6868 = vmatmul.mubr.msk.f32.gmra.mrb[46].mxu0 %vm182_vm2, %v2422_v2 }
0x1c3d   :  { %6881 = vmatprep.mubr.msk.f32.mxu0 %vm7676_vm8, %v7675_v43 }
0x1c7c   :  { %v6866_v0 = vpop.f32.mrb[44].mxu0 }
0x1c7d   :  { %v4270_v18 = vadd.f32 %v6866_v0, %v6259_v33  ;;  %v4264_v44 = vpop.f32.mrb[45].mxu0 }
0x1c7e   :  { %v4265_v58 = vadd.f32 %v6259_v33, %v4264_v44 }
0x1c80   :  { %v7187_v61 = vpack.c.bf16 %v4270_v18, %v4265_v58  ;;  %v8380_v27 = vpack.i.bf16 %v4270_v18, %v4265_v58 }
0x1c82   :  { %7189 = vmatpush3.bf16.xpose.msk.msra.mxu1 %vm7808_vm4, %v7187_v61 }
0x1c83   :  { %7194 = vmatprep.subr.bf16.mxu1 %v7677_v20 }
0x1d0a   :  { %v6855_v62 = vpop.f32.mrb[46].mxu1 }
0x1d0b   :  { %v4168_v56 = vpop.f32.mrb[47].mxu1  ;;  %v4174_v32 = vadd.f32 %v6855_v62, %v6256_v45 }
0x1d0c   :  { %v4169_v47 = vadd.f32 %v6256_v45, %v4168_v56 }
0x1d0d   :  { %v8399_v3 = vmul.f32 0.35355338, %v4174_v32 }
0x1d0e   :  { %v8388_v46 = vmul.f32 0.35355338, %v4169_v47 }
0x1d0f   :  { %v6869_v4 = vpop.f32.mrb[46].mxu0 }
0x1d10   :  { %v4280_v1 = vadd.f32 %v6869_v4, %v6259_v33  ;;  %v4274_v63 = vpop.f32.mrb[47].mxu0  ;;  %6875 = vmatmul.mubr.msk.f32.vlgmr.msra.gmra.mrb[48].mxu1 %vm295_vm3, %v8388_v46 }
0x1d11   :  { %v4275_v48 = vadd.f32 %v6259_v33, %v4274_v63  ;;  %6888 = vmatprep.mubr.msk.f32.mxu1 %vm7676_vm8, %v7675_v43 }
0x1d13   :  { %v7191_v50 = vpack.c.bf16 %v4280_v1, %v4275_v48  ;;  %v8394_v16 = vpack.i.bf16 %v4280_v1, %v4275_v48 }
0x1d15   :  { %7193 = vmatpush3.bf16.xpose.msk.msra.mxu0 %vm7808_vm4, %v7191_v50 }
0x1d16   :  { %7200 = vmatprep.subr.bf16.mxu0 %v7677_v20 }
0x1d1c   :  { %6882 = vmatmul.mubr.msk.f32.vlgmr.msra.gmra.mrb[48].mxu0 %vm295_vm3, %v8399_v3 }
0x1d1d   :  { %6902 = vmatprep.mubr.msk.f32.mxu0 %vm7676_vm8, %v7675_v43 }
0x1de3   :  { %v4365_v5 = vpop.f32.mrb[48].mxu1 }
0x1de4   :  { %v6876_v15 = vpop.f32.mrb[49].mxu1  ;;  %v4448_v6 = vsel %vm472_vm5, %v4365_v5, -inf }
0x1de5   :  { %4449 = vmax.xlane.f32.xlu1 %v4448_v6 }
0x1def   :  { %v4444_v8 = vpop.f32.mrb[48].mxu0 }
0x1df0   :  { %v6883_v11 = vpop.f32.mrb[49].mxu0  ;;  %v4451_v12 = vsel %vm472_vm5, %v4444_v8, -inf }
0x1df1   :  { %4452 = vmax.xlane.f32.xlu0 %v4451_v12 }
0x1df6   :  { %7384 = vrot.lane.b32.xlu1 %v8380_v27, %s7663_s20 }
0x1dfa   :  { %7394 = vrot.lane.b32.xlu1 %v8380_v27, %s7666_s23 }
0x1e72   :  { %v4450_v40 = vpop.xlane.xlu1 %4449 }
0x1e73   :  { %v4454_v13 = vsub.f32 %v4365_v5, %v4450_v40 }
0x1e75   :  { %v4456_v14 = vmul.f32 1.442695, %v4454_v13 }
0x1e76   :  { %v7385_v39 = vpop.permute.xlu1 %7384 }
0x1e77   :  { %7569 = vpow2.f32 %v4456_v14  ;;  %v7387_v17 = vunpack.i.h.bf16 %v7385_v39  ;;  %v7386_v19 = vunpack.i.l.bf16 %v7385_v39 }
0x1e79   :  { %v7195_v21 = vpack.c.bf16 %v7387_v17, %v7386_v19 }
0x1e7a   :  { %v7395_v23 = vpop.permute.xlu1 %7394 }
0x1e7b   :  { %v7397_v24 = vunpack.i.h.bf16 %v7395_v23  ;;  %v7396_v25 = vunpack.i.l.bf16 %v7395_v23  ;;  %7196 = vmatpush3.bf16.msra.mxu1 %v7195_v21 }
0x1e7c   :  { %7197 = vmatprep.subr.bf16.mxu1 %v7677_v20 }
0x1e7d   :  { %v7201_v57 = vpack.c.bf16 %v7397_v24, %v7396_v25 }
0x1e7e   :  { %v4453_v26 = vpop.xlane.xlu0 %4452 }
0x1e7f   :  { %v4455_v29 = vsub.f32 %v4444_v8, %v4453_v26  ;;  %7203 = vmatpush3.bf16.xpose.msk.msra.mxu0 %vm7808_vm4, %v7201_v57 }
0x1e80   :  { %7208 = vmatprep.subr.bf16.mxu0 %v7677_v20 }
0x1e81   :  { %v7570_v34 = vpop.eup %7569  ;;  %v4458_v54 = vmul.f32 1.442695, %v4455_v29 }
0x1e82   :  { %v4460_v22 = vsel %vm472_vm5, %v7570_v34, 0.0 }
0x1e83   :  { %7571 = vpow2.f32 %v4458_v54  ;;  %4461 = vadd.xlane.f32.xlu1 %v4460_v22 }
0x1e8d   :  { %v7572_v35 = vpop.eup %7571 }
0x1e8e   :  { %v4463_v36 = vsel %vm472_vm5, %v7572_v35, 0.0 }
0x1e8f   :  { %4464 = vadd.xlane.f32.xlu0 %v4463_v36 }
0x1e94   :  { %7399 = vrot.lane.b32.xlu1 %v8394_v16, %s7666_s23 }
0x1e98   :  { %4710 = vrot.lane.b32.xlu1 %v8399_v3, %s7666_s23 }
0x1ea5   :  { %7389 = vrot.lane.b32.xlu0 %v8394_v16, %s7663_s20 }
0x1ea9   :  { %4628 = vrot.lane.b32.xlu0 %v8388_v46, %s7666_s23 }
0x1f10   :  { %v4462_v38 = vpop.xlane.xlu1 %4461 }
0x1f11   :  { %7573 = vrcp.f32 %v4462_v38 }
0x1f14   :  { %v7400_v49 = vpop.permute.xlu1 %7399 }
0x1f15   :  { %v7402_v53 = vunpack.i.h.bf16 %v7400_v49  ;;  %v7401_v55 = vunpack.i.l.bf16 %v7400_v49 }
0x1f17   :  { %v7205_v28 = vpack.c.bf16 %v7402_v53, %v7401_v55 }
0x1f18   :  { %v4711_v33 = vpop.permute.xlu1 %4710 }
0x1f1b   :  { %v7574_v41 = vpop.eup %7573 }
0x1f1c   :  { %v4468_v9 = vmul.f32 %v7574_v41, %v7570_v34  ;;  %v4465_v31 = vpop.xlane.xlu0 %4464 }
0x1f1d   :  { %7575 = vrcp.f32 %v4465_v31 }
0x1f1e   :  { %6889 = vmatmul.mubr.msk.f32.vlgmr.msra.gmra.mrb[50].mxu1 %vm472_vm5, %v4468_v9 }
0x1f1f   :  { %6895 = vmatprep.mubr.msk.f32.mxu1 %vm7676_vm8, %v7675_v43 }
0x1f20   :  { %v7390_v10 = vpop.permute.xlu0 %7389 }
0x1f21   :  { %v7392_v42 = vunpack.i.h.bf16 %v7390_v10  ;;  %v7391_v30 = vunpack.i.l.bf16 %v7390_v10 }
0x1f23   :  { %v7198_v7 = vpack.c.bf16 %v7392_v42, %v7391_v30 }
0x1f24   :  { %v4629_v59 = vpop.permute.xlu0 %4628 }
0x1f25   :  { %7199 = vmatpush3.bf16.msra.mxu1 %v7198_v7  ;;  %6903 = vmatmul.mubr.msk.f32.vlgmr.msra.gmra.mrb[50].mxu0 %vm295_vm3, %v4629_v59 }
0x1f26   :  { %7204 = vmatprep.subr.bf16.mxu1 %v7677_v20  ;;  %6916 = vmatprep.mubr.msk.f32.mxu0 %vm7676_vm8, %v7675_v43 }
0x1f27   :  { %v7576_v51 = vpop.eup %7575 }
0x1f28   :  { %v4469_v2 = vmul.f32 %v7576_v51, %v7572_v35 }
0x1f2a   :  { %6896 = vmatmul.mubr.msk.f32.vlgmr.msra.gmra.mrb[52].mxu1 %vm472_vm5, %v4469_v2 }
0x1f2b   :  { %6909 = vmatprep.mubr.msk.f32.mxu1 %vm7676_vm8, %v7675_v43 }
0x1f2e   :  { %7207 = vmatpush3.bf16.xpose.msk.msra.mxu1 %vm7808_vm4, %v7205_v28 }
0x1f2f   :  { %7211 = vmatprep.subr.bf16.mxu1 %v7677_v20 }
0x1f35   :  { %6910 = vmatmul.mubr.msk.f32.vlgmr.msra.gmra.mrb[54].mxu1 %vm295_vm3, %v4711_v33 }
0x1f36   :  { %6923 = vmatprep.mubr.msk.f32.mxu1 %vm7676_vm8, %v7675_v43 }
0x1ff1   :  { %v8441_v0 = vpop.f32.mrb[50].mxu1 }
0x1ff2   :  { %v6890_v18 = vpop.f32.mrb[51].mxu1 }
0x1ff8   :  { %v4706_v44 = vpop.f32.mrb[50].mxu0 }
0x1ff9   :  { %v6904_v58 = vpop.f32.mrb[51].mxu0  ;;  %v4792_v61 = vsel %vm472_vm5, %v4706_v44, -inf }
0x1ffa   :  { %4793 = vmax.xlane.f32.xlu0 %v4792_v61 }
0x1ffd   :  { %v8444_v45 = vpop.f32.mrb[52].mxu1 }
0x1ffe   :  { %v6897_v62 = vpop.f32.mrb[53].mxu1 }
0x2008   :  { %v4788_v56 = vpop.f32.mrb[54].mxu1 }
0x2009   :  { %v6911_v47 = vpop.f32.mrb[55].mxu1  ;;  %v4795_v4 = vsel %vm472_vm5, %v4788_v56, -inf }
0x200a   :  { %4796 = vmax.xlane.f32.xlu1 %v4795_v4 }
0x201b   :  { %7404 = vrot.lane.b32.xlu1 %v8380_v27, %s7665_s22 }
0x201f   :  { %7414 = vrot.lane.b32.xlu1 %v8380_v27, %s7668_s4 }
0x2023   :  { %7419 = vrot.lane.b32.xlu1 %v8394_v16, %s7668_s4 }
0x2027   :  { %5054 = vrot.lane.b32.xlu1 %v8399_v3, %s7668_s4 }
0x2087   :  { %v4794_v1 = vpop.xlane.xlu0 %4793 }
0x2088   :  { %v4798_v63 = vsub.f32 %v4706_v44, %v4794_v1 }
0x208a   :  { %v4800_v48 = vmul.f32 1.442695, %v4798_v63 }
0x208c   :  { %7577 = vpow2.f32 %v4800_v48 }
0x2096   :  { %v7578_v50 = vpop.eup %7577 }
0x2097   :  { %v4797_v32 = vpop.xlane.xlu1 %4796  ;;  %v4804_v5 = vsel %vm472_vm5, %v7578_v50, 0.0 }
0x2098   :  { %v4799_v15 = vsub.f32 %v4788_v56, %v4797_v32  ;;  %4805 = vadd.xlane.f32.xlu0 %v4804_v5 }
0x209a   :  { %v4802_v6 = vmul.f32 1.442695, %v4799_v15 }
0x209b   :  { %v7405_v8 = vpop.permute.xlu1 %7404 }
0x209c   :  { %7579 = vpow2.f32 %v4802_v6  ;;  %v7407_v11 = vunpack.i.h.bf16 %v7405_v8  ;;  %v7406_v12 = vunpack.i.l.bf16 %v7405_v8 }
0x209e   :  { %v7209_v40 = vpack.c.bf16 %v7407_v11, %v7406_v12 }
0x209f   :  { %v7415_v17 = vpop.permute.xlu1 %7414 }
0x20a0   :  { %7210 = vmatpush3.bf16.msra.mxu0 %v7209_v40  ;;  %v7417_v19 = vunpack.i.h.bf16 %v7415_v17  ;;  %v7416_v21 = vunpack.i.l.bf16 %v7415_v17 }
0x20a1   :  { %7214 = vmatprep.subr.bf16.mxu0 %v7677_v20 }
0x20a2   :  { %v7215_v25 = vpack.c.bf16 %v7417_v19, %v7416_v21 }
0x20a3   :  { %v7420_v35 = vpop.permute.xlu1 %7419 }
0x20a4   :  { %v7422_v38 = vunpack.i.h.bf16 %v7420_v35  ;;  %v7421_v41 = vunpack.i.l.bf16 %v7420_v35 }
0x20a6   :  { %v7580_v13 = vpop.eup %7579  ;;  %v7219_v31 = vpack.c.bf16 %v7422_v38, %v7421_v41 }
0x20a7   :  { %v4807_v14 = vsel %vm472_vm5, %v7580_v13, 0.0  ;;  %v5055_v10 = vpop.permute.xlu1 %5054 }
0x20a8   :  { %4808 = vadd.xlane.f32.xlu0 %v4807_v14 }
0x20be   :  { %7409 = vrot.lane.b32.xlu0 %v8394_v16, %s7665_s22 }
0x20c2   :  { %4972 = vrot.lane.b32.xlu0 %v8388_v46, %s7668_s4 }
0x2125   :  { %v4806_v39 = vpop.xlane.xlu0 %4805 }
0x2126   :  { %7581 = vrcp.f32 %v4806_v39 }
0x2130   :  { %v7582_v23 = vpop.eup %7581 }
0x2131   :  { %v4812_v24 = vmul.f32 %v7582_v23, %v7578_v50 }
0x2133   :  { %6917 = vmatmul.mubr.msk.f32.vlgmr.msra.gmra.mrb[52].mxu0 %vm472_vm5, %v4812_v24 }
0x2134   :  { %7217 = vmatpush3.bf16.xpose.msk.msra.mxu0 %vm7808_vm4, %v7215_v25  ;;  %6930 = vmatprep.mubr.msk.f32.mxu0 %vm7676_vm8, %v7675_v43 }
0x2135   :  { %v4809_v57 = vpop.xlane.xlu0 %4808  ;;  %7222 = vmatprep.subr.bf16.mxu0 %v7677_v20 }
0x2136   :  { %7583 = vrcp.f32 %v4809_v57 }
0x2139   :  { %v7410_v26 = vpop.permute.xlu0 %7409 }
0x213a   :  { %v7412_v29 = vunpack.i.h.bf16 %v7410_v26  ;;  %v7411_v34 = vunpack.i.l.bf16 %v7410_v26 }
0x213c   :  { %v7212_v54 = vpack.c.bf16 %v7412_v29, %v7411_v34 }
0x213d   :  { %v4973_v22 = vpop.permute.xlu0 %4972 }
0x213e   :  { %7213 = vmatpush3.bf16.msra.mxu1 %v7212_v54  ;;  %6931 = vmatmul.mubr.msk.f32.vlgmr.msra.gmra.mrb[54].mxu0 %vm295_vm3, %v4973_v22 }
0x213f   :  { %7218 = vmatprep.subr.bf16.mxu1 %v7677_v20  ;;  %6944 = vmatprep.mubr.msk.f32.mxu0 %vm7676_vm8, %v7675_v43 }
0x2140   :  { %v7584_v36 = vpop.eup %7583 }
0x2141   :  { %v4813_v9 = vmul.f32 %v7584_v36, %v7580_v13 }
0x2143   :  { %6924 = vmatmul.mubr.msk.f32.vlgmr.msra.gmra.mrb[56].mxu1 %vm472_vm5, %v4813_v9 }
0x2144   :  { %6937 = vmatprep.mubr.msk.f32.mxu1 %vm7676_vm8, %v7675_v43 }
0x2147   :  { %7221 = vmatpush3.bf16.xpose.msk.msra.mxu1 %vm7808_vm4, %v7219_v31 }
0x2148   :  { %7225 = vmatprep.subr.bf16.mxu1 %v7677_v20 }
0x214e   :  { %6938 = vmatmul.mubr.msk.f32.vlgmr.msra.gmra.mrb[58].mxu1 %vm295_vm3, %v5055_v10 }
0x214f   :  { %6951 = vmatprep.mubr.msk.f32.mxu1 %vm7676_vm8, %v7675_v43 }
0x2206   :  { %v8481_v42 = vpop.f32.mrb[52].mxu0 }
0x2207   :  { %v6918_v30 = vpop.f32.mrb[53].mxu0 }
0x2211   :  { %v5050_v7 = vpop.f32.mrb[54].mxu0 }
0x2212   :  { %v6932_v59 = vpop.f32.mrb[55].mxu0  ;;  %v5136_v49 = vsel %vm472_vm5, %v5050_v7, -inf }
0x2213   :  { %5137 = vmax.xlane.f32.xlu0 %v5136_v49 }
0x2216   :  { %v8484_v51 = vpop.f32.mrb[56].mxu1 }
0x2217   :  { %v6925_v53 = vpop.f32.mrb[57].mxu1 }
0x2221   :  { %v5132_v55 = vpop.f32.mrb[58].mxu1 }
0x2222   :  { %v6939_v2 = vpop.f32.mrb[59].mxu1  ;;  %v5139_v28 = vsel %vm472_vm5, %v5132_v55, -inf }
0x2223   :  { %5140 = vmax.xlane.f32.xlu1 %v5139_v28 }
0x2234   :  { %7424 = vrot.lane.b32.xlu1 %v8380_v27, %s7659_s12 }
0x2238   :  { %7434 = vrot.lane.b32.xlu1 %v8380_v27, %s7671_s28 }
0x223c   :  { %7439 = vrot.lane.b32.xlu1 %v8394_v16, %s7671_s28 }
0x2240   :  { %5398 = vrot.lane.b32.xlu1 %v8399_v3, %s7671_s28 }
0x22a0   :  { %v5138_v33 = vpop.xlane.xlu0 %5137 }
0x22a1   :  { %v5142_v18 = vsub.f32 %v5050_v7, %v5138_v33 }
0x22a3   :  { %v5144_v44 = vmul.f32 1.442695, %v5142_v18 }
0x22a5   :  { %7585 = vpow2.f32 %v5144_v44 }
0x22af   :  { %v7586_v58 = vpop.eup %7585 }
0x22b0   :  { %v5141_v61 = vpop.xlane.xlu1 %5140  ;;  %v5148_v62 = vsel %vm472_vm5, %v7586_v58, 0.0 }
0x22b1   :  { %v5143_v56 = vsub.f32 %v5132_v55, %v5141_v61  ;;  %5149 = vadd.xlane.f32.xlu0 %v5148_v62 }
0x22b3   :  { %v5146_v47 = vmul.f32 1.442695, %v5143_v56 }
0x22b4   :  { %v7425_v4 = vpop.permute.xlu1 %7424 }
0x22b5   :  { %7587 = vpow2.f32 %v5146_v47  ;;  %v7427_v1 = vunpack.i.h.bf16 %v7425_v4  ;;  %v7426_v63 = vunpack.i.l.bf16 %v7425_v4 }
0x22b7   :  { %v7223_v48 = vpack.c.bf16 %v7427_v1, %v7426_v63  ;;  %v4284_v1 = vld [vmem:[#allocation2 + $0x88] sm:$0xff]  ;;  %v4285_v63 = vld [vmem:[#allocation2 + $0xd8] sm:$0xff] }
0x22b8   :  { %v7435_v5 = vpop.permute.xlu1 %7434 }
0x22b9   :  { %7224 = vmatpush3.bf16.msra.mxu0 %v7223_v48  ;;  %v7437_v15 = vunpack.i.h.bf16 %v7435_v5  ;;  %v7436_v6 = vunpack.i.l.bf16 %v7435_v5 }
0x22ba   :  { %7228 = vmatprep.subr.bf16.mxu0 %v7677_v20 }
0x22bb   :  { %v7229_v12 = vpack.c.bf16 %v7437_v15, %v7436_v6 }
0x22bc   :  { %v7440_v19 = vpop.permute.xlu1 %7439 }
0x22bd   :  { %v7442_v23 = vunpack.i.h.bf16 %v7440_v19  ;;  %v7441_v24 = vunpack.i.l.bf16 %v7440_v19 }
0x22bf   :  { %v7588_v3 = vpop.eup %7587  ;;  %v7233_v57 = vpack.c.bf16 %v7442_v23, %v7441_v24 }
0x22c0   :  { %v5151_v50 = vsel %vm472_vm5, %v7588_v3, 0.0  ;;  %v5399_v26 = vpop.permute.xlu1 %5398 }
0x22c1   :  { %5152 = vadd.xlane.f32.xlu0 %v5151_v50 }
0x22d7   :  { %7429 = vrot.lane.b32.xlu0 %v8394_v16, %s7659_s12 }
0x22db   :  { %5316 = vrot.lane.b32.xlu0 %v8388_v46, %s7671_s28 }
0x233e   :  { %v5150_v32 = vpop.xlane.xlu0 %5149 }
0x233f   :  { %7589 = vrcp.f32 %v5150_v32 }
0x2349   :  { %v7590_v8 = vpop.eup %7589 }
0x234a   :  { %v5156_v11 = vmul.f32 %v7590_v8, %v7586_v58 }
0x234c   :  { %6945 = vmatmul.mubr.msk.f32.vlgmr.msra.gmra.mrb[56].mxu0 %vm472_vm5, %v5156_v11 }
0x234d   :  { %7231 = vmatpush3.bf16.xpose.msk.msra.mxu0 %vm7808_vm4, %v7229_v12  ;;  %6958 = vmatprep.mubr.msk.f32.mxu0 %vm7676_vm8, %v7675_v43 }
0x234e   :  { %v5153_v40 = vpop.xlane.xlu0 %5152  ;;  %7236 = vmatprep.subr.bf16.mxu0 %v7677_v20 }
0x234f   :  { %7591 = vrcp.f32 %v5153_v40 }
0x2352   :  { %v7430_v46 = vpop.permute.xlu0 %7429 }
0x2353   :  { %v7432_v13 = vunpack.i.h.bf16 %v7430_v46  ;;  %v7431_v14 = vunpack.i.l.bf16 %v7430_v46 }
0x2355   :  { %v7226_v39 = vpack.c.bf16 %v7432_v13, %v7431_v14 }
0x2356   :  { %v5317_v17 = vpop.permute.xlu0 %5316 }
0x2357   :  { %7227 = vmatpush3.bf16.msra.mxu1 %v7226_v39  ;;  %6959 = vmatmul.mubr.msk.f32.vlgmr.msra.gmra.mrb[58].mxu0 %vm295_vm3, %v5317_v17 }
0x2358   :  { %7232 = vmatprep.subr.bf16.mxu1 %v7677_v20  ;;  %6972 = vmatprep.mubr.msk.f32.mxu0 %vm7676_vm8, %v7675_v43 }
0x2359   :  { %v7592_v21 = vpop.eup %7591 }
0x235a   :  { %v5157_v25 = vmul.f32 %v7592_v21, %v7588_v3  ;;  %v4286_v3 = vld [vmem:[#allocation2 + $0x128] sm:$0xff] }
0x235b   :  { %v7246_v50 = vpack.c.bf16 %v4286_v3, %v4285_v63 }
0x235c   :  { %6952 = vmatmul.mubr.msk.f32.vlgmr.msra.gmra.mrb[60].mxu1 %vm472_vm5, %v5157_v25 }
0x235d   :  { %6965 = vmatprep.mubr.msk.f32.mxu1 %vm7676_vm8, %v7675_v43 }
0x2360   :  { %7235 = vmatpush3.bf16.xpose.msk.msra.mxu1 %vm7808_vm4, %v7233_v57 }
0x2361   :  { %7239 = vmatprep.subr.bf16.mxu1 %v7677_v20 }
0x2367   :  { %6966 = vmatmul.mubr.msk.f32.vlgmr.msra.gmra.mrb[62].mxu1 %vm295_vm3, %v5399_v26 }
0x2368   :  { %6979 = vmatprep.mubr.msk.f32.mxu1 %vm7676_vm8, %v7675_v43 }
0x241f   :  { %v5233_v29 = vpop.f32.mrb[56].mxu0 }
0x2420   :  { %v6946_v34 = vpop.f32.mrb[57].mxu0 }
0x242a   :  { %v5394_v54 = vpop.f32.mrb[58].mxu0 }
0x242b   :  { %v6960_v22 = vpop.f32.mrb[59].mxu0  ;;  %v5480_v35 = vsel %vm472_vm5, %v5394_v54, -inf }
0x242c   :  { %5481 = vmax.xlane.f32.xlu0 %v5480_v35 }
0x242f   :  { %v5312_v36 = vpop.f32.mrb[60].mxu1 }
0x2430   :  { %v6953_v38 = vpop.f32.mrb[61].mxu1 }
0x243a   :  { %v5476_v41 = vpop.f32.mrb[62].mxu1 }
0x243b   :  { %v6967_v37 = vpop.f32.mrb[63].mxu1  ;;  %v5483_v9 = vsel %vm472_vm5, %v5476_v41, -inf }
0x243c   :  { %5484 = vmax.xlane.f32.xlu1 %v5483_v9 }
0x244d   :  { %7444 = vrot.lane.b32.xlu1 %v8380_v27, %s7670_s27 }
0x2451   :  { %5662 = vrot.lane.b32.xlu1 %v8481_v42, %s7673_s30 }
0x2455   :  { %5664 = vrot.lane.b32.xlu1 %v8484_v51, %s7673_s30 }
0x2459   :  { %5672 = vrot.lane.b32.xlu1 %v5312_v36, %s7662_s25 }
0x24b9   :  { %v5482_v43 = vpop.xlane.xlu0 %5481 }
0x24ba   :  { %v5486_v20 = vsub.f32 %v5394_v54, %v5482_v43 }
0x24bc   :  { %v5488_v31 = vmul.f32 1.442695, %v5486_v20 }
0x24be   :  { %7593 = vpow2.f32 %v5488_v31  ;;  %v5818_v31 = vld [vmem:[#allocation2 + $0x90] sm:$0xff] }
0x24c8   :  { %v7594_v10 = vpop.eup %7593 }
0x24c9   :  { %v5485_v30 = vpop.xlane.xlu1 %5484  ;;  %v5492_v7 = vsel %vm472_vm5, %v7594_v10, 0.0 }
0x24ca   :  { %v5487_v59 = vsub.f32 %v5476_v41, %v5485_v30  ;;  %5493 = vadd.xlane.f32.xlu0 %v5492_v7  ;;  %v5819_v30 = vld [vmem:[#allocation2 + $0xe0] sm:$0xff]  ;;  %v5820_v7 = vld [vmem:[#allocation2 + $0x130] sm:$0xff] }
0x24cc   :  { %v5490_v49 = vmul.f32 1.442695, %v5487_v59  ;;  %v7254_v59 = vpack.c.bf16 %v5820_v7, %v5819_v30 }
0x24cd   :  { %v7445_v27 = vpop.permute.xlu1 %7444 }
0x24ce   :  { %7595 = vpow2.f32 %v5490_v49  ;;  %v7447_v53 = vunpack.i.h.bf16 %v7445_v27  ;;  %v7446_v42 = vunpack.i.l.bf16 %v7445_v27  ;;  %v5909_v49 = vld [vmem:[#allocation4 + $0x8] sm:$0xff]  ;;  %v5910_v27 = vld [vmem:[#allocation4 + $0x18] sm:$0xff] }
0x24d0   :  { %v7237_v55 = vpack.c.bf16 %v7447_v53, %v7446_v42  ;;  %v5911_v53 = vld [vmem:[#allocation4 + $0x28] sm:$0xff]  ;;  %v7258_v42 = vpack.c.bf16 %v5910_v27, %v5909_v49 }
0x24d1   :  { %v5663_v8 = vpop.permute.xlu1 %5662 }
0x24d2   :  { %7238 = vmatpush3.bf16.msra.mxu0 %v7237_v55  ;;  %v5684_v12 = vsel %vm295_vm3, %v8441_v0, %v5663_v8  ;;  %v6296_v0 = vld [vmem:[%s8601_s6 + $0xe] ss:$0 sm:$0xff]  ;;  %v5912_v55 = vld [vmem:[#allocation4 + $0x38] sm:$0xff] }
0x24d5   :  { %v5665_v14 = vpop.permute.xlu1 %5664 }
0x24d6   :  { %v5685_v17 = vsel %vm295_vm3, %v8444_v45, %v5665_v14 }
0x24d8   :  { %v7596_v51 = vpop.eup %7595 }
0x24d9   :  { %v5495_v2 = vsel %vm472_vm5, %v7596_v51, 0.0  ;;  %v5673_v39 = vpop.permute.xlu1 %5672 }
0x24da   :  { %5496 = vadd.xlane.f32.xlu0 %v5495_v2  ;;  %v5687_v19 = vsel %vm472_vm5, %v5685_v17, %v5673_v39  ;;  %v5913_v2 = vld [vmem:[#allocation4 + $0x48] sm:$0xff]  ;;  %v6304_v17 = vld [vmem:[%s8601_s6 + $0x12] ss:$0 sm:$0xff] }
0x24f0   :  { %7449 = vrot.lane.b32.xlu0 %v8394_v16, %s7670_s27  ;;  %v4283_v16 = vld [vmem:[#allocation2 + $0x38] sm:$0xff] }
0x24f1   :  { %v7242_v48 = vpack.c.bf16 %v4284_v1, %v4283_v16  ;;  %v6300_v1 = vld [vmem:[%s8601_s6 + $0x10] ss:$0 sm:$0xff] }
0x24f3   :  { %7243 = vmatprep.subr.bf16.mxu0 %v7242_v48 }
0x24f4   :  { %5670 = vrot.lane.b32.xlu0 %v5233_v29, %s7662_s25 }
0x2557   :  { %v5494_v28 = vpop.xlane.xlu0 %5493 }
0x2558   :  { %7597 = vrcp.f32 %v5494_v28  ;;  %v5914_v28 = vld [vmem:[#allocation4 + $0x58] sm:$0xff] }
0x2562   :  { %v7598_v33 = vpop.eup %7597 }
0x2563   :  { %v5500_v18 = vmul.f32 %v7598_v33, %v7594_v10  ;;  %v7266_v33 = vpack.c.bf16 %v5914_v28, %v5913_v2  ;;  %v6308_v28 = vld [vmem:[%s8601_s6 + $0x14] ss:$0 sm:$0xff] }
0x2565   :  { %6973 = vmatmul.mubr.msk.f32.vlgmr.msra.gmra.mrb[60].mxu0 %vm472_vm5, %v5500_v18 }
0x2566   :  { %7245 = vmatpush3.bf16.msra.mxu0 %v7242_v48 }
0x2567   :  { %v5497_v44 = vpop.xlane.xlu0 %5496  ;;  %7247 = vmatprep.subr.bf16.mxu0 %v7246_v50 }
0x2568   :  { %7599 = vrcp.f32 %v5497_v44 }
0x256a   :  { %7249 = vmatpush3.bf16.msra.mxu0 %v7246_v50 }
0x256b   :  { %v7450_v58 = vpop.permute.xlu0 %7449  ;;  %7259 = vmatprep.subr.bf16.mxu0 %v7258_v42 }
0x256c   :  { %v7452_v61 = vunpack.i.h.bf16 %v7450_v58  ;;  %v7451_v62 = vunpack.i.l.bf16 %v7450_v58 }
0x256e   :  { %v7240_v56 = vpack.c.bf16 %v7452_v61, %v7451_v62 }
0x256f   :  { %v5671_v11 = vpop.permute.xlu0 %5670 }
0x2570   :  { %7241 = vmatpush3.bf16.msra.mxu1 %v7240_v56  ;;  %v5686_v40 = vsel %vm472_vm5, %v5684_v12, %v5671_v11  ;;  %v6301_v11 = vld [vmem:[%s8601_s6 + $0x11] ss:$0 sm:$0xff] }
0x2572   :  { %v7600_v47 = vpop.eup %7599 }
0x2573   :  { %v5501_v4 = vmul.f32 %v7600_v47, %v7596_v51  ;;  %v7262_v51 = vpack.c.bf16 %v5912_v55, %v5911_v53 }
0x2575   :  { %6980 = vmatmul.mubr.msk.f32.vlgmr.msra.gmra.mrb[64].mxu1 %vm472_vm5, %v5501_v4  ;;  %v6299_v4 = vld [vmem:[%s8601_s6 + $0xf] ss:$0 sm:$0xff] }
0x2638   :  { %v5577_v32 = vpop.f32.mrb[60].mxu0 }
0x2639   :  { %5678 = vrot.lane.b32.xlu0 %v5577_v32, %s7674_s8  ;;  %v6974_v5 = vpop.f32.mrb[61].mxu0 }
0x2648   :  { %v5656_v15 = vpop.f32.mrb[64].mxu1 }
0x2649   :  { %5680 = vrot.lane.b32.xlu1 %v5656_v15, %s7674_s8  ;;  %v6981_v6 = vpop.f32.mrb[65].mxu1  ;;  %v5915_v15 = vld [vmem:[#allocation4 + $0x68] sm:$0xff] }
0x264a   :  { %v5916_v6 = vld [vmem:[#allocation4 + $0x78] sm:$0xff] }
0x264b   :  { %v7270_v8 = vpack.c.bf16 %v5916_v6, %v5915_v15 }
0x26ab   :  { %v5679_v46 = vpop.permute.xlu0 %5678 }
0x26ac   :  { %v5688_v13 = vsel %vm1947_vm6, %v5686_v40, %v5679_v46 }
0x26ad   :  { %6990 = vmatprep.mubr.msk.f32.mxu0 %vm182_vm2, %v5688_v13 }
0x26bb   :  { %v5681_v21 = vpop.permute.xlu1 %5680 }
0x26bc   :  { %v5689_v23 = vsel %vm1947_vm6, %v5687_v19, %v5681_v21 }
0x26bd   :  { %6991 = vmatmul.mubr.msk.f32.vlgmr.msra.gmra.mrb[62].mxu0 %vm182_vm2, %v5689_v23 }
0x26be   :  { %7261 = vmatpush3.bf16.msra.mxu0 %v7258_v42  ;;  %v6307_v42 = vld [vmem:[%s8601_s6 + $0x13] ss:$0 sm:$0xff] }
0x26bf   :  { %7263 = vmatprep.subr.bf16.mxu0 %v7262_v51 }
0x26c2   :  { %7265 = vmatpush3.bf16.msra.mxu0 %v7262_v51 }
0x26c3   :  { %7267 = vmatprep.subr.bf16.mxu0 %v7266_v33 }
0x26c6   :  { %7269 = vmatpush3.bf16.msra.mxu0 %v7266_v33 }
0x26c7   :  { %7271 = vmatprep.subr.bf16.mxu0 %v7270_v8 }
0x26ca   :  { %7273 = vmatpush3.bf16.msra.mxu0 %v7270_v8 }
0x2790   :  { %v6992_v24 = vpop.f32.mrb[62].mxu0 }
0x2791   :  { %v5772_v25 = vadd.f32 %v6992_v24, %v6296_v0  ;;  %v5766_v57 = vpop.f32.mrb[63].mxu0 }
0x2792   :  { %v5767_v26 = vadd.f32 %v6296_v0, %v5766_v57 }
0x2793   :  { %v5778_v29 = vadd.f32 %v5772_v25, %v8360_v52 }
0x2794   :  { %v5777_v34 = vadd.f32 %v5767_v26, %v8358_v60  ;;  %v5817_v60 = vld [vmem:[#allocation2 + $0x40] sm:$0xff] }
0x2795   :  { %v5782_v45 = vsel %vm182_vm2, %v5778_v29, 0.0  ;;  %v7250_v10 = vpack.c.bf16 %v5818_v31, %v5817_v60  ;;  %v6048_v60 = vld [vmem:[#allocation2 + $0x138] sm:$0xff] }
0x2796   :  { %5783 = vadd.xlane.f32.xlu1 %v5782_v45  ;;  %v5779_v54 = vsel %vm182_vm2, %v5777_v34, 0.0 }
0x2797   :  { %5780 = vadd.xlane.f32.xlu0 %v5779_v54  ;;  %7251 = vmatprep.subr.bf16.mxu1 %v7250_v10 }
0x2798   :  { %7253 = vmatpush3.bf16.msra.mxu1 %v7250_v10 }
0x2799   :  { %7255 = vmatprep.subr.bf16.mxu1 %v7254_v59 }
0x279c   :  { %7257 = vmatpush3.bf16.msra.mxu1 %v7254_v59 }
0x2823   :  { %v5784_v22 = vpop.xlane.xlu1 %5783 }
0x2824   :  { %v5786_v35 = vmul.f32 0.03125, %v5784_v22  ;;  %v5781_v36 = vpop.xlane.xlu0 %5780 }
0x2825   :  { %v5785_v38 = vmul.f32 0.03125, %v5781_v36 }
0x2826   :  { %v5788_v41 = vsub.f32 %v5778_v29, %v5786_v35 }
0x2827   :  { %v5787_v37 = vsub.f32 %v5777_v34, %v5785_v38 }
0x2828   :  { %v5790_v20 = vmul.f32 %v5788_v41, %v5788_v41 }
0x2829   :  { %v5789_v9 = vmul.f32 %v5787_v37, %v5787_v37 }
0x282a   :  { %v5794_v52 = vsel %vm182_vm2, %v5790_v20, 0.0 }
0x282b   :  { %v5791_v43 = vsel %vm182_vm2, %v5789_v9, 0.0  ;;  %v6045_v9 = vld [vmem:[#allocation2 + $0x48] sm:$0xff] }
0x282c   :  { %5792 = vadd.xlane.f32.xlu0 %v5791_v43  ;;  %v6046_v43 = vld [vmem:[#allocation2 + $0x98] sm:$0xff] }
0x282d   :  { %v7274_v20 = vpack.c.bf16 %v6046_v43, %v6045_v9 }
0x282f   :  { %7275 = vmatprep.subr.bf16.mxu1 %v7274_v20 }
0x2830   :  { %5795 = vadd.xlane.f32.xlu0 %v5794_v52  ;;  %v6047_v52 = vld [vmem:[#allocation2 + $0xe8] sm:$0xff] }
0x2831   :  { %v7278_v31 = vpack.c.bf16 %v6048_v60, %v6047_v52 }
0x28b9   :  { %v5793_v18 = vpop.xlane.xlu0 %5792 }
0x28ba   :  { %v5797_v44 = vmul.f32 0.03125, %v5793_v18 }
0x28bc   :  { %v5799_v58 = vadd.f32 1e-05, %v5797_v44 }
0x28bd   :  { %v5796_v61 = vpop.xlane.xlu0 %5795 }
0x28be   :  { %7601 = vrsqrt.f32 %v5799_v58  ;;  %v5798_v62 = vmul.f32 0.03125, %v5796_v61  ;;  %v6309_v61 = vld [vmem:[%s8601_s6 + $0x15] ss:$0 sm:$0xff] }
0x28c0   :  { %v5800_v56 = vadd.f32 1e-05, %v5798_v62 }
0x28c2   :  { %7603 = vrsqrt.f32 %v5800_v56 }
0x28c8   :  { %v7602_v47 = vpop.eup %7601 }
0x28c9   :  { %v5803_v16 = vmul.f32 %v7602_v47, %v5787_v37 }
0x28cb   :  { %v5809_v63 = vmul.f32 %v6299_v4, %v5803_v16 }
0x28cc   :  { %v7604_v48 = vpop.eup %7603 }
0x28cd   :  { %v5804_v3 = vmul.f32 %v7604_v48, %v5788_v41  ;;  %v5815_v50 = vadd.f32 %v6300_v1, %v5809_v63 }
0x28cf   :  { %v5810_v32 = vmul.f32 %v6299_v4, %v5804_v3  ;;  %7001 = vmatprep.mubr.msk.f32.mxu1 %vm182_vm2, %v5815_v50 }
0x28d1   :  { %v5816_v5 = vadd.f32 %v6300_v1, %v5810_v32 }
0x28d3   :  { %7002 = vmatmul.mubr.msk.f32.vlgmr.msra.gmra.mrb[66].mxu1 %vm182_vm2, %v5816_v5 }
0x28d4   :  { %7277 = vmatpush3.bf16.msra.mxu1 %v7274_v20 }
0x28d5   :  { %7279 = vmatprep.subr.bf16.mxu1 %v7278_v31 }
0x28d8   :  { %7281 = vmatpush3.bf16.msra.mxu1 %v7278_v31 }
0x29a6   :  { %v7003_v12 = vpop.f32.mrb[66].mxu1 }
0x29a7   :  { %v5904_v40 = vadd.f32 %v7003_v12, %v6301_v11  ;;  %v5898_v46 = vpop.f32.mrb[67].mxu1 }
0x29a8   :  { %v5899_v13 = vadd.f32 %v6301_v11, %v5898_v46 }
0x29a9   :  { %v5908_v39 = vmax.f32 %v5904_v40, 0.0 }
0x29aa   :  { %v5907_v14 = vmax.f32 %v5899_v13, 0.0 }
0x29ac   :  { %7020 = vmatprep.mubr.msk.f32.mxu0 %vm2251_vm7, %v5907_v14 }
0x29ad   :  { %7021 = vmatmul.mubr.msk.f32.vlgmr.msra.gmra.mrb[64].mxu0 %vm2251_vm7, %v5908_v39 }
0x2a80   :  { %v7022_v19 = vpop.f32.mrb[64].mxu0 }
0x2a81   :  { %v6000_v21 = vadd.f32 %v7022_v19, %v6304_v17  ;;  %v5994_v23 = vpop.f32.mrb[65].mxu0 }
0x2a82   :  { %v5995_v0 = vadd.f32 %v6304_v17, %v5994_v23 }
0x2a83   :  { %v6006_v24 = vadd.f32 %v6000_v21, %v5816_v5 }
0x2a84   :  { %v6005_v25 = vadd.f32 %v5995_v0, %v5815_v50 }
0x2a85   :  { %v6010_v57 = vsel %vm182_vm2, %v6006_v24, 0.0 }
0x2a86   :  { %6011 = vadd.xlane.f32.xlu0 %v6010_v57  ;;  %v6007_v26 = vsel %vm182_vm2, %v6005_v25, 0.0 }
0x2a87   :  { %6008 = vadd.xlane.f32.xlu1 %v6007_v26 }
0x2b13   :  { %v6012_v29 = vpop.xlane.xlu0 %6011 }
0x2b14   :  { %v6014_v34 = vmul.f32 0.03125, %v6012_v29  ;;  %v6009_v45 = vpop.xlane.xlu1 %6008 }
0x2b15   :  { %v6013_v54 = vmul.f32 0.03125, %v6009_v45 }
0x2b16   :  { %v6016_v22 = vsub.f32 %v6006_v24, %v6014_v34 }
0x2b17   :  { %v6015_v35 = vsub.f32 %v6005_v25, %v6013_v54 }
0x2b18   :  { %v6018_v36 = vmul.f32 %v6016_v22, %v6016_v22 }
0x2b19   :  { %v6017_v38 = vmul.f32 %v6015_v35, %v6015_v35 }
0x2b1a   :  { %v6022_v41 = vsel %vm182_vm2, %v6018_v36, 0.0 }
0x2b1b   :  { %6023 = vadd.xlane.f32.xlu0 %v6022_v41  ;;  %v6019_v37 = vsel %vm182_vm2, %v6017_v38, 0.0 }
0x2b1c   :  { %6020 = vadd.xlane.f32.xlu1 %v6019_v37 }
0x2ba8   :  { %v6024_v10 = vpop.xlane.xlu0 %6023 }
0x2ba9   :  { %v6026_v30 = vmul.f32 0.03125, %v6024_v10  ;;  %v6021_v7 = vpop.xlane.xlu1 %6020 }
0x2baa   :  { %v6025_v59 = vmul.f32 0.03125, %v6021_v7 }
0x2bab   :  { %v6028_v49 = vadd.f32 1e-05, %v6026_v30 }
0x2bac   :  { %v6027_v27 = vadd.f32 1e-05, %v6025_v59 }
0x2bad   :  { %7605 = vrsqrt.f32 %v6028_v49 }
0x2bae   :  { %7607 = vrsqrt.f32 %v6027_v27 }
0x2bb7   :  { %v7606_v53 = vpop.eup %7605 }
0x2bb8   :  { %v7608_v55 = vpop.eup %7607  ;;  %v6032_v51 = vmul.f32 %v7606_v53, %v6016_v22 }
0x2bb9   :  { %v6031_v2 = vmul.f32 %v7608_v55, %v6015_v35 }
0x2bba   :  { %v6038_v33 = vmul.f32 %v6307_v42, %v6032_v51 }
0x2bbb   :  { %v6037_v18 = vmul.f32 %v6307_v42, %v6031_v2 }
0x2bbc   :  { %v6044_v58 = vadd.f32 %v6308_v28, %v6038_v33 }
0x2bbd   :  { %v6043_v44 = vadd.f32 %v6308_v28, %v6037_v18 }
0x2bbf   :  { %7031 = vmatprep.mubr.msk.f32.mxu1 %vm182_vm2, %v6043_v44 }
0x2bc0   :  { %7032 = vmatmul.mubr.msk.f32.vlgmr.msra.gmra.mrb[68].mxu1 %vm182_vm2, %v6044_v58 }
0x2c93   :  { %v7033_v62 = vpop.f32.mrb[68].mxu1 }
0x2c94   :  { %v6132_v56 = vadd.f32 %v7033_v62, %v6309_v61  ;;  %v6126_v47 = vpop.f32.mrb[69].mxu1 }
0x2c95   :  { %v6127_v4 = vadd.f32 %v6309_v61, %v6126_v47 }
0x2c96   :  { %6137 = vst.msk [vmem:[%s8602_s7 + $0x8] sm:$0xff] %vm6135_vm10, %v6132_v56 }
0x2c97   :  { %6136 = vst.msk [vmem:[%s8602_s7] sm:$0xff] %vm6135_vm10, %v6127_v4 }
0x2c98   :  { %6142 = vsyncpa [#allocation3], 1 }
0x2c99   :  { %6143 = vsyncpa [#allocation5], 1 }

</bundles_post_ra>
